<compile_context>
chip_gen: v6e
topology: v6e:2x2x1
jax: 0.10.0
libtpu: 0.0.40
codegen_flags: <defaults>
</compile_context>

<pallas_src>
import functools

import jax
import jax.numpy as jnp
from jax import lax
from jax.experimental import pallas as pl
from jax.experimental.pallas import tpu as pltpu


# ------------------------------ fused kernel --------------------------------

def _fused_forward_kernel(
        x_in_ref, sr_ref, sl_ref, bsl_ref, bsr_ref,
        enc_w_ref, enc_b_ref,
        c1_wI_ref, c1_bI_ref,
        c2_wI_ref, c2_bI_ref, bn1_sI_ref, bn1_bI_ref,
        wih1_ref, whh1_ref, lb1_ref,
        wih2_ref, whh2_ref, lb2_ref,
        c3_wT_ref, c3_b_ref, bn2_s_ref, bn2_b_ref,
        fc1_w_ref, fc1_b_ref, fc2_w_ref, fc2_b_ref,
        o_ref,
        lout_ref):
    f32 = jnp.float32
    N = x_in_ref.shape[0]            # batch
    H = whh1_ref.shape[0]            # LSTM hidden size (= 4*hidden of the module)
    NT = lout_ref.shape[0]           # N * T (time-major rows: r = t*N + n)
    T = NT // N                      # LSTM sequence length == conv2 channels
    C3 = c3_wT_ref.shape[2]          # conv3 output channels

    def dot(a, b):
        return jnp.dot(a, b, preferred_element_type=f32)

    # ---- fused sensor/centroid encoders (block-diagonal linear) -> (N, L) ----
    x_cat = dot(x_in_ref[...], enc_w_ref[...]) + enc_b_ref[...]
    sr = sr_ref[...]                 # X @ sr : column l <- column l-1 (zero pad)
    sl = sl_ref[...]                 # X @ sl : column l <- column l+1 (zero pad)
    # all three conv1 taps stacked along rows: (3N, L), tap-major, batch-minor
    x_taps = jnp.concatenate([dot(x_cat, sr), x_cat, dot(x_cat, sl)], axis=0)

    # ---- conv1(1 -> h, k=3, pad=1) + ReLU, batch-interleaved rows (c*N + n) ----
    a1 = jnp.maximum(dot(c1_wI_ref[...], x_taps) + c1_bI_ref[...], 0.0)   # (C1*N, L)
    # TODO(synk): F.dropout(p=0.4) after every relu is stochastic; identity here.

    # ---- conv2(h -> 2h) + ReLU + inference BN1 (fused scale/shift), rows (t*N + n) ----
    a2 = (dot(c2_wI_ref[0], dot(a1, sr)) + dot(c2_wI_ref[1], a1)
          + dot(c2_wI_ref[2], dot(a1, sl)) + c2_bI_ref[...])              # (T*N, L)
    a2 = jnp.maximum(a2, 0.0)
    a2 = a2 * bn1_sI_ref[...] + bn1_bI_ref[...]

    # ---- hoisted LSTM layer-1 input projection for all (t, n): one matmul ----
    gx = dot(a2, wih1_ref[...]) + lb1_ref[...]                            # (T*N, 4H)

    # ---- stacked 2-layer LSTM, batched over N, fully unrolled over T ----
    whh1 = whh1_ref[...]
    wih2 = wih2_ref[...]
    whh2 = whh2_ref[...]
    lb2 = lb2_ref[...]

    def lstm_cell(gates, c_prev):
        # PyTorch gate order i, f, g, o; sigmoid on full vreg, tanh only on g lanes.
        act = jax.nn.sigmoid(gates)
        i = act[:, 0:H]
        f = act[:, H:2 * H]
        o = act[:, 3 * H:4 * H]
        g = jnp.tanh(gates[:, 2 * H:3 * H])
        c_new = f * c_prev + i * g
        return o * jnp.tanh(c_new), c_new

    zeros_nh = jnp.zeros((N, H), f32)
    h1, c1 = zeros_nh, zeros_nh
    h2, c2 = zeros_nh, zeros_nh
    for t in range(T):               # static unroll -> cross-step overlap for LLO
        gx_t = gx[t * N:(t + 1) * N, :]                                   # (N, 4H)
        h1, c1 = lstm_cell(gx_t + dot(h1, whh1), c1)
        h2, c2 = lstm_cell(dot(h1, wih2) + dot(h2, whh2) + lb2, c2)
        lout_ref[t * N:(t + 1) * N, :] = h2     # time-major stash: rows t*N + n

    # ---- conv3(4h -> 8h) + ReLU + BN2 + ReLU, batch folded over rows (t*N + n) ----
    lall = lout_ref[...]                                                  # (N*T, H)
    a3 = (dot(bsl_ref[...], dot(lall, c3_wT_ref[0]))                      # tap uses t-1
          + dot(lall, c3_wT_ref[1])                                       # center tap
          + dot(bsr_ref[...], dot(lall, c3_wT_ref[2]))                    # tap uses t+1
          + c3_b_ref[...])                                                # (N*T, C3)
    a3 = jnp.maximum(a3, 0.0)
    a3 = jnp.maximum(a3 * bn2_s_ref[...] + bn2_b_ref[...], 0.0)           # relu4

    # ---- head: fc1 (block-accumulated over contiguous time slices) + ReLU + fc2 ----
    y = jnp.zeros((N, fc1_b_ref.shape[1]), f32) + fc1_b_ref[...]
    for t in range(T):
        y = y + dot(a3[t * N:(t + 1) * N, :], fc1_w_ref[t * C3:(t + 1) * C3, :])
    y = jnp.maximum(y, 0.0)
    logits = dot(y, fc2_w_ref[...]) + fc2_b_ref[...]
    m = jnp.max(logits, axis=1, keepdims=True)
    e = jnp.exp(logits - m)
    o_ref[...] = e * pl.reciprocal(jnp.sum(e, axis=1, keepdims=True), approx=True)


# ------------------------------ forward wrapper ------------------------------

def _shift_matrices(L, dtype=jnp.float32):
    r = jnp.arange(L)[:, None]
    c = jnp.arange(L)[None, :]
    sr = (c == r + 1).astype(dtype)   # X @ sr : column l <- column l-1
    sl = (c == r - 1).astype(dtype)   # X @ sl : column l <- column l+1
    return sr, sl


def _time_shift_matrices(N, T, dtype=jnp.float32):
    # Time-major rows r = t*N + n; +-N row shifts never cross batch elements and
    # the t=0 / t=T-1 boundaries are zero automatically.
    M = N * T
    r = jnp.arange(M)[:, None]
    c = jnp.arange(M)[None, :]
    bsl = (c == r - N).astype(dtype)   # bsl @ X : row (t,n) <- row (t-1,n)
    bsr = (c == r + N).astype(dtype)   # bsr @ X : row (t,n) <- row (t+1,n)
    return bsl, bsr


def concatenated_nn_forward(params, x_sensor, x_centroid):
    p = params
    N = x_sensor.shape[0]
    # sensor(x_sensor.permute(0,2,1)) / centroid(x_centroid) stand-ins are linear
    # encoders; their concat is realized as one block-diagonal matmul in-kernel.
    xs = jnp.transpose(x_sensor, (0, 2, 1)).reshape(N, -1)
    x_in = jnp.concatenate([xs, x_centroid], axis=1).astype(jnp.float32)

    L = p["enc_w"].shape[1]
    T = p["c2_w"].shape[1]
    H = p["l1_whh"].shape[0]
    num_classes = p["fc2_w"].shape[1]

    f32 = jnp.float32
    eye_n = jnp.eye(N, dtype=f32)
    ones_n = jnp.ones((N, 1), f32)

    sr, sl = _shift_matrices(L)
    bsl, bsr = _time_shift_matrices(N, T)

    # Batch-interleaved (channel-major, batch-minor rows) conv weights / affine params:
    # kron(W, I_N) keeps each batch element on its own row stripe so the whole batch
    # runs through one matmul per conv tap.
    c1_wI = jnp.concatenate(
        [jnp.kron(p["c1_w"][:, k:k + 1], eye_n) for k in range(3)], axis=1)   # (C1*N, 3N)
    c1_bI = jnp.kron(p["c1_b"], ones_n)                                       # (C1*N, 1)
    c2_wI = jnp.stack([jnp.kron(p["c2_w"][k], eye_n) for k in range(3)])      # (3, C2*N, C1*N)
    c2_bI = jnp.kron(p["c2_b"], ones_n)                                       # (C2*N, 1)
    bn1_sI = jnp.kron(p["bn1_scale"], ones_n)
    bn1_bI = jnp.kron(p["bn1_shift"], ones_n)

    return pl.pallas_call(
        _fused_forward_kernel,
        out_shape=jax.ShapeDtypeStruct((N, num_classes), jnp.float32),
        scratch_shapes=[pltpu.VMEM((N * T, H), jnp.float32)],
    )(x_in, sr, sl, bsl, bsr,
      p["enc_w"], p["enc_b"],
      c1_wI, c1_bI,
      c2_wI, c2_bI, bn1_sI, bn1_bI,
      p["l1_wih"], p["l1_whh"], p["l1_b"],
      p["l2_wih"], p["l2_whh"], p["l2_b"],
      p["c3_wT"], p["c3_b"], p["bn2_scale"], p["bn2_shift"],
      p["fc1_wm"], p["fc1_b"], p["fc2_w"], p["fc2_b"])


# -------------------------------- parameters ---------------------------------

def init_params(key, *, hidden=8, input_size=16, num_classes=4,
                sensor_in=32, centroid_in=6, f_sensor=8, f_centroid=8):
    assert f_sensor + f_centroid == input_size
    keys = jax.random.split(key, 24)

    def rnd(k, shape, scale=0.1):
        return (scale * jax.random.normal(k, shape)).astype(jnp.float32)

    h = hidden
    L = input_size               # conv length == LSTM input feature size
    C1, C2, C3 = h, 2 * h, 8 * h
    T = C2                       # LSTM sequence length
    H = 4 * h                    # LSTM hidden size
    eps = 1e-5

    # fused sensor/centroid encoders -> one block-diagonal linear
    sensor_w = rnd(keys[0], (sensor_in, f_sensor))
    centroid_w = rnd(keys[1], (centroid_in, f_centroid))
    enc_w = jnp.zeros((sensor_in + centroid_in, L), jnp.float32)
    enc_w = enc_w.at[:sensor_in, :f_sensor].set(sensor_w)
    enc_w = enc_w.at[sensor_in:, f_sensor:].set(centroid_w)
    enc_b = jnp.concatenate(
        [rnd(keys[2], (1, f_sensor)), rnd(keys[3], (1, f_centroid))], axis=1)

    # BatchNorm1d (inference, running_mean=0 / running_var=1) folded to scale/shift
    bn1_gamma = 1.0 + rnd(keys[8], (C2, 1))
    bn1_beta = rnd(keys[9], (C2, 1))
    bn2_gamma = 1.0 + rnd(keys[10], (1, C3))
    bn2_beta = rnd(keys[11], (1, C3))

    # Conv1d(4h, 8h, 3): tap-major, pre-transposed to (k, C_in, C_out) for the
    # transposed-layout (time rows, channel lanes) conv3 matmul in the kernel.
    c3_w = rnd(keys[12], (3, C3, H))
    c3_wT = jnp.transpose(c3_w, (0, 2, 1))

    # fc1 stand-in (the module re-creates fc1 with fresh random weights every
    # forward): rows re-ordered from (channel*T + t) to (t*C3 + channel) so the
    # kernel can consume conv3's (time-row, channel-lane) output directly.
    fc1_w = rnd(keys[13], (C3 * T, 256))
    fc1_wm = fc1_w.reshape(C3, T, 256).transpose(1, 0, 2).reshape(T * C3, 256)

    return dict(
        enc_w=enc_w, enc_b=enc_b,
        c1_w=rnd(keys[4], (C1, 3)),          # Conv1d(1, h, 3) taps, (C_out, k)
        c1_b=rnd(keys[5], (C1, 1)),
        c2_w=rnd(keys[6], (3, C2, C1)),      # Conv1d(h, 2h, 3), tap-major
        c2_b=rnd(keys[7], (C2, 1)),
        bn1_scale=bn1_gamma / jnp.sqrt(1.0 + eps),
        bn1_shift=bn1_beta,
        # 2-layer LSTM(input=L, hidden=4h); bias = b_ih + b_hh combined; i,f,g,o order
        l1_wih=rnd(keys[14], (L, 4 * H)),
        l1_whh=rnd(keys[15], (H, 4 * H)),
        l1_b=rnd(keys[16], (1, 4 * H)),
        l2_wih=rnd(keys[17], (H, 4 * H)),
        l2_whh=rnd(keys[18], (H, 4 * H)),
        l2_b=rnd(keys[19], (1, 4 * H)),
        c3_wT=c3_wT,
        c3_b=rnd(keys[20], (1, C3)),
        bn2_scale=bn2_gamma / jnp.sqrt(1.0 + eps),
        bn2_shift=bn2_beta,
        fc1_wm=fc1_wm,
        fc1_b=rnd(keys[21], (1, 256)),
        fc2_w=rnd(keys[22], (256, num_classes)),
        fc2_b=rnd(keys[23], (1, num_classes)),
    )


# ----------------------------------- main ------------------------------------

if __name__ == "__main__":
    key = jax.random.PRNGKey(0)
    k_param, k_sensor, k_centroid = jax.random.split(key, 3)

    N, T_s, C_s = 2, 8, 4          # x_sensor: (batch, seq, channels)
    D_c = 6                        # x_centroid feature dim
    hidden, input_size, num_classes = 8, 16, 4

    params = init_params(k_param, hidden=hidden, input_size=input_size,
                         num_classes=num_classes, sensor_in=T_s * C_s,
                         centroid_in=D_c, f_sensor=8, f_centroid=8)

    x_sensor = jax.random.normal(k_sensor, (N, T_s, C_s), jnp.float32)
    x_centroid = jax.random.normal(k_centroid, (N, D_c), jnp.float32)

    fwd = jax.jit(functools.partial(concatenated_nn_forward, params))
    out = jax.block_until_ready(fwd(x_sensor, x_centroid))

    assert out.shape == (N, num_classes), out.shape
    assert bool(jnp.all(jnp.isfinite(out)))
    assert bool(jnp.allclose(jnp.sum(out, axis=1), 1.0, atol=5e-3))
    print("KERNEL_OK")
</pallas_src>

<mosaic_0001>
module attributes {stable_mosaic.version = 11 : i64} {
  func.func @_fused_forward_kernel(%arg0: memref<2x38xf32, #tpu.memory_space<vmem>>, %arg1: memref<16x16xf32, #tpu.memory_space<vmem>>, %arg2: memref<16x16xf32, #tpu.memory_space<vmem>>, %arg3: memref<32x32xf32, #tpu.memory_space<vmem>>, %arg4: memref<32x32xf32, #tpu.memory_space<vmem>>, %arg5: memref<38x16xf32, #tpu.memory_space<vmem>>, %arg6: memref<1x16xf32, #tpu.memory_space<vmem>>, %arg7: memref<16x6xf32, #tpu.memory_space<vmem>>, %arg8: memref<16x1xf32, #tpu.memory_space<vmem>>, %arg9: memref<3x32x16xf32, #tpu.memory_space<vmem>>, %arg10: memref<32x1xf32, #tpu.memory_space<vmem>>, %arg11: memref<32x1xf32, #tpu.memory_space<vmem>>, %arg12: memref<32x1xf32, #tpu.memory_space<vmem>>, %arg13: memref<16x128xf32, #tpu.memory_space<vmem>>, %arg14: memref<32x128xf32, #tpu.memory_space<vmem>>, %arg15: memref<1x128xf32, #tpu.memory_space<vmem>>, %arg16: memref<32x128xf32, #tpu.memory_space<vmem>>, %arg17: memref<32x128xf32, #tpu.memory_space<vmem>>, %arg18: memref<1x128xf32, #tpu.memory_space<vmem>>, %arg19: memref<3x32x64xf32, #tpu.memory_space<vmem>>, %arg20: memref<1x64xf32, #tpu.memory_space<vmem>>, %arg21: memref<1x64xf32, #tpu.memory_space<vmem>>, %arg22: memref<1x64xf32, #tpu.memory_space<vmem>>, %arg23: memref<1024x256xf32, #tpu.memory_space<vmem>>, %arg24: memref<1x256xf32, #tpu.memory_space<vmem>>, %arg25: memref<256x4xf32, #tpu.memory_space<vmem>>, %arg26: memref<1x4xf32, #tpu.memory_space<vmem>>, %arg27: memref<2x4xf32, #tpu.memory_space<vmem>>, %arg28: memref<32x32xf32, #tpu.memory_space<vmem>>) attributes {dimension_semantics = [], scalar_prefetch = 0 : i64, scratch_operands = 1 : i64, tpu.core_type = #tpu.core_type<tc>} {
    %c0 = arith.constant 0 : index
    %c0_0 = arith.constant 0 : index
    %0 = vector.load %arg0[%c0, %c0_0] : memref<2x38xf32, #tpu.memory_space<vmem>>, vector<2x38xf32>
    %c0_1 = arith.constant 0 : index
    %c0_2 = arith.constant 0 : index
    %1 = vector.load %arg5[%c0_1, %c0_2] : memref<38x16xf32, #tpu.memory_space<vmem>>, vector<38x16xf32>
    %cst = arith.constant dense<0.000000e+00> : vector<2x16xf32>
    %2 = tpu.matmul %0, %1, %cst {dimension_numbers = #tpu.dot_dimension_numbers<[1], [0], [0], [1], [0, 0, 1, 1], [], []>} : vector<2x38xf32>, vector<38x16xf32>, vector<2x16xf32> -> vector<2x16xf32>
    %c0_3 = arith.constant 0 : index
    %c0_4 = arith.constant 0 : index
    %3 = vector.load %arg6[%c0_3, %c0_4] : memref<1x16xf32, #tpu.memory_space<vmem>>, vector<1x16xf32>
    %4 = vector.broadcast %3 : vector<1x16xf32> to vector<2x16xf32>
    %5 = arith.addf %2, %4 : vector<2x16xf32>
    %c0_5 = arith.constant 0 : index
    %c0_6 = arith.constant 0 : index
    %6 = vector.load %arg1[%c0_5, %c0_6] : memref<16x16xf32, #tpu.memory_space<vmem>>, vector<16x16xf32>
    %c0_7 = arith.constant 0 : index
    %c0_8 = arith.constant 0 : index
    %7 = vector.load %arg2[%c0_7, %c0_8] : memref<16x16xf32, #tpu.memory_space<vmem>>, vector<16x16xf32>
    %cst_9 = arith.constant dense<0.000000e+00> : vector<2x16xf32>
    %8 = tpu.matmul %5, %6, %cst_9 {dimension_numbers = #tpu.dot_dimension_numbers<[1], [0], [0], [1], [0, 0, 1, 1], [], []>} : vector<2x16xf32>, vector<16x16xf32>, vector<2x16xf32> -> vector<2x16xf32>
    %cst_10 = arith.constant dense<0.000000e+00> : vector<2x16xf32>
    %9 = tpu.matmul %5, %7, %cst_10 {dimension_numbers = #tpu.dot_dimension_numbers<[1], [0], [0], [1], [0, 0, 1, 1], [], []>} : vector<2x16xf32>, vector<16x16xf32>, vector<2x16xf32> -> vector<2x16xf32>
    %10 = tpu.concatenate %8, %5, %9 in 0 : vector<2x16xf32>, vector<2x16xf32>, vector<2x16xf32> -> vector<6x16xf32>
    %c0_11 = arith.constant 0 : index
    %c0_12 = arith.constant 0 : index
    %11 = vector.load %arg7[%c0_11, %c0_12] : memref<16x6xf32, #tpu.memory_space<vmem>>, vector<16x6xf32>
    %cst_13 = arith.constant dense<0.000000e+00> : vector<16x16xf32>
    %12 = tpu.matmul %11, %10, %cst_13 {dimension_numbers = #tpu.dot_dimension_numbers<[1], [0], [0], [1], [0, 0, 1, 1], [], []>} : vector<16x6xf32>, vector<6x16xf32>, vector<16x16xf32> -> vector<16x16xf32>
    %c0_14 = arith.constant 0 : index
    %c0_15 = arith.constant 0 : index
    %13 = vector.load %arg8[%c0_14, %c0_15] : memref<16x1xf32, #tpu.memory_space<vmem>>, vector<16x1xf32>
    %14 = vector.broadcast %13 : vector<16x1xf32> to vector<16x16xf32>
    %15 = arith.addf %12, %14 : vector<16x16xf32>
    %cst_16 = arith.constant 0.000000e+00 : f32
    %16 = vector.broadcast %cst_16 : f32 to vector<16x16xf32>
    %17 = arith.maximumf %15, %16 : vector<16x16xf32>
    %c0_17 = arith.constant 0 : index
    %c0_18 = arith.constant 0 : index
    %c0_19 = arith.constant 0 : index
    %18 = vector.load %arg9[%c0_17, %c0_18, %c0_19] : memref<3x32x16xf32, #tpu.memory_space<vmem>>, vector<1x32x16xf32>
    %19 = vector.shape_cast %18 : vector<1x32x16xf32> to vector<32x16xf32>
    %cst_20 = arith.constant dense<0.000000e+00> : vector<16x16xf32>
    %20 = tpu.matmul %17, %6, %cst_20 {dimension_numbers = #tpu.dot_dimension_numbers<[1], [0], [0], [1], [0, 0, 1, 1], [], []>} : vector<16x16xf32>, vector<16x16xf32>, vector<16x16xf32> -> vector<16x16xf32>
    %cst_21 = arith.constant dense<0.000000e+00> : vector<32x16xf32>
    %21 = tpu.matmul %19, %20, %cst_21 {dimension_numbers = #tpu.dot_dimension_numbers<[1], [0], [0], [1], [0, 0, 1, 1], [], []>} : vector<32x16xf32>, vector<16x16xf32>, vector<32x16xf32> -> vector<32x16xf32>
    %c1 = arith.constant 1 : index
    %c0_22 = arith.constant 0 : index
    %c0_23 = arith.constant 0 : index
    %22 = vector.load %arg9[%c1, %c0_22, %c0_23] : memref<3x32x16xf32, #tpu.memory_space<vmem>>, vector<1x32x16xf32>
    %23 = vector.shape_cast %22 : vector<1x32x16xf32> to vector<32x16xf32>
    %cst_24 = arith.constant dense<0.000000e+00> : vector<32x16xf32>
    %24 = tpu.matmul %23, %17, %cst_24 {dimension_numbers = #tpu.dot_dimension_numbers<[1], [0], [0], [1], [0, 0, 1, 1], [], []>} : vector<32x16xf32>, vector<16x16xf32>, vector<32x16xf32> -> vector<32x16xf32>
    %25 = arith.addf %21, %24 : vector<32x16xf32>
    %c2 = arith.constant 2 : index
    %c0_25 = arith.constant 0 : index
    %c0_26 = arith.constant 0 : index
    %26 = vector.load %arg9[%c2, %c0_25, %c0_26] : memref<3x32x16xf32, #tpu.memory_space<vmem>>, vector<1x32x16xf32>
    %27 = vector.shape_cast %26 : vector<1x32x16xf32> to vector<32x16xf32>
    %cst_27 = arith.constant dense<0.000000e+00> : vector<16x16xf32>
    %28 = tpu.matmul %17, %7, %cst_27 {dimension_numbers = #tpu.dot_dimension_numbers<[1], [0], [0], [1], [0, 0, 1, 1], [], []>} : vector<16x16xf32>, vector<16x16xf32>, vector<16x16xf32> -> vector<16x16xf32>
    %cst_28 = arith.constant dense<0.000000e+00> : vector<32x16xf32>
    %29 = tpu.matmul %27, %28, %cst_28 {dimension_numbers = #tpu.dot_dimension_numbers<[1], [0], [0], [1], [0, 0, 1, 1], [], []>} : vector<32x16xf32>, vector<16x16xf32>, vector<32x16xf32> -> vector<32x16xf32>
    %30 = arith.addf %25, %29 : vector<32x16xf32>
    %c0_29 = arith.constant 0 : index
    %c0_30 = arith.constant 0 : index
    %31 = vector.load %arg10[%c0_29, %c0_30] : memref<32x1xf32, #tpu.memory_space<vmem>>, vector<32x1xf32>
    %32 = vector.broadcast %31 : vector<32x1xf32> to vector<32x16xf32>
    %33 = arith.addf %30, %32 : vector<32x16xf32>
    %cst_31 = arith.constant 0.000000e+00 : f32
    %34 = vector.broadcast %cst_31 : f32 to vector<32x16xf32>
    %35 = arith.maximumf %33, %34 : vector<32x16xf32>
    %c0_32 = arith.constant 0 : index
    %c0_33 = arith.constant 0 : index
    %36 = vector.load %arg11[%c0_32, %c0_33] : memref<32x1xf32, #tpu.memory_space<vmem>>, vector<32x1xf32>
    %37 = vector.broadcast %36 : vector<32x1xf32> to vector<32x16xf32>
    %38 = arith.mulf %35, %37 : vector<32x16xf32>
    %c0_34 = arith.constant 0 : index
    %c0_35 = arith.constant 0 : index
    %39 = vector.load %arg12[%c0_34, %c0_35] : memref<32x1xf32, #tpu.memory_space<vmem>>, vector<32x1xf32>
    %40 = vector.broadcast %39 : vector<32x1xf32> to vector<32x16xf32>
    %41 = arith.addf %38, %40 : vector<32x16xf32>
    %c0_36 = arith.constant 0 : index
    %c0_37 = arith.constant 0 : index
    %42 = vector.load %arg13[%c0_36, %c0_37] : memref<16x128xf32, #tpu.memory_space<vmem>>, vector<16x128xf32>
    %cst_38 = arith.constant dense<0.000000e+00> : vector<32x128xf32>
    %43 = tpu.matmul %41, %42, %cst_38 {dimension_numbers = #tpu.dot_dimension_numbers<[1], [0], [0], [1], [0, 0, 1, 1], [], []>} : vector<32x16xf32>, vector<16x128xf32>, vector<32x128xf32> -> vector<32x128xf32>
    %c0_39 = arith.constant 0 : index
    %c0_40 = arith.constant 0 : index
    %44 = vector.load %arg15[%c0_39, %c0_40] : memref<1x128xf32, #tpu.memory_space<vmem>>, vector<1x128xf32>
    %45 = vector.broadcast %44 : vector<1x128xf32> to vector<32x128xf32>
    %46 = arith.addf %43, %45 : vector<32x128xf32>
    %c0_41 = arith.constant 0 : index
    %c0_42 = arith.constant 0 : index
    %47 = vector.load %arg14[%c0_41, %c0_42] : memref<32x128xf32, #tpu.memory_space<vmem>>, vector<32x128xf32>
    %c0_43 = arith.constant 0 : index
    %c0_44 = arith.constant 0 : index
    %48 = vector.load %arg16[%c0_43, %c0_44] : memref<32x128xf32, #tpu.memory_space<vmem>>, vector<32x128xf32>
    %c0_45 = arith.constant 0 : index
    %c0_46 = arith.constant 0 : index
    %49 = vector.load %arg17[%c0_45, %c0_46] : memref<32x128xf32, #tpu.memory_space<vmem>>, vector<32x128xf32>
    %c0_47 = arith.constant 0 : index
    %c0_48 = arith.constant 0 : index
    %50 = vector.load %arg18[%c0_47, %c0_48] : memref<1x128xf32, #tpu.memory_space<vmem>>, vector<1x128xf32>
    %cst_49 = arith.constant 0.000000e+00 : f32
    %51 = vector.broadcast %cst_49 : f32 to vector<2x32xf32>
    %52 = vector.extract_strided_slice %46 {offsets = [0, 0], sizes = [2, 128], strides = [1, 1]} : vector<32x128xf32> to vector<2x128xf32>
    %cst_50 = arith.constant dense<0.000000e+00> : vector<2x128xf32>
    %53 = tpu.matmul %51, %47, %cst_50 {dimension_numbers = #tpu.dot_dimension_numbers<[1], [0], [0], [1], [0, 0, 1, 1], [], []>} : vector<2x32xf32>, vector<32x128xf32>, vector<2x128xf32> -> vector<2x128xf32>
    %54 = arith.addf %52, %53 : vector<2x128xf32>
    %55 = arith.negf %54 : vector<2x128xf32>
    %56 = math.exp %55 : vector<2x128xf32>
    %cst_51 = arith.constant 1.000000e+00 : f32
    %57 = vector.broadcast %cst_51 : f32 to vector<2x128xf32>
    %58 = arith.addf %57, %56 : vector<2x128xf32>
    %59 = arith.divf %57, %58 : vector<2x128xf32>
    %60 = vector.extract_strided_slice %59 {offsets = [0, 0], sizes = [2, 32], strides = [1, 1]} : vector<2x128xf32> to vector<2x32xf32>
    %61 = vector.extract_strided_slice %59 {offsets = [0, 32], sizes = [2, 32], strides = [1, 1]} : vector<2x128xf32> to vector<2x32xf32>
    %62 = vector.extract_strided_slice %59 {offsets = [0, 96], sizes = [2, 32], strides = [1, 1]} : vector<2x128xf32> to vector<2x32xf32>
    %63 = vector.extract_strided_slice %54 {offsets = [0, 64], sizes = [2, 32], strides = [1, 1]} : vector<2x128xf32> to vector<2x32xf32>
    %64 = math.tanh %63 : vector<2x32xf32>
    %65 = arith.mulf %61, %51 : vector<2x32xf32>
    %66 = arith.mulf %60, %64 : vector<2x32xf32>
    %67 = arith.addf %65, %66 : vector<2x32xf32>
    %68 = math.tanh %67 : vector<2x32xf32>
    %69 = arith.mulf %62, %68 : vector<2x32xf32>
    %cst_52 = arith.constant dense<0.000000e+00> : vector<2x128xf32>
    %70 = tpu.matmul %69, %48, %cst_52 {dimension_numbers = #tpu.dot_dimension_numbers<[1], [0], [0], [1], [0, 0, 1, 1], [], []>} : vector<2x32xf32>, vector<32x128xf32>, vector<2x128xf32> -> vector<2x128xf32>
    %cst_53 = arith.constant dense<0.000000e+00> : vector<2x128xf32>
    %71 = tpu.matmul %51, %49, %cst_53 {dimension_numbers = #tpu.dot_dimension_numbers<[1], [0], [0], [1], [0, 0, 1, 1], [], []>} : vector<2x32xf32>, vector<32x128xf32>, vector<2x128xf32> -> vector<2x128xf32>
    %72 = arith.addf %70, %71 : vector<2x128xf32>
    %73 = vector.broadcast %50 : vector<1x128xf32> to vector<2x128xf32>
    %74 = arith.addf %72, %73 : vector<2x128xf32>
    %75 = arith.negf %74 : vector<2x128xf32>
    %76 = math.exp %75 : vector<2x128xf32>
    %cst_54 = arith.constant 1.000000e+00 : f32
    %77 = vector.broadcast %cst_54 : f32 to vector<2x128xf32>
    %78 = arith.addf %77, %76 : vector<2x128xf32>
    %79 = arith.divf %77, %78 : vector<2x128xf32>
    %80 = vector.extract_strided_slice %79 {offsets = [0, 0], sizes = [2, 32], strides = [1, 1]} : vector<2x128xf32> to vector<2x32xf32>
    %81 = vector.extract_strided_slice %79 {offsets = [0, 32], sizes = [2, 32], strides = [1, 1]} : vector<2x128xf32> to vector<2x32xf32>
    %82 = vector.extract_strided_slice %79 {offsets = [0, 96], sizes = [2, 32], strides = [1, 1]} : vector<2x128xf32> to vector<2x32xf32>
    %83 = vector.extract_strided_slice %74 {offsets = [0, 64], sizes = [2, 32], strides = [1, 1]} : vector<2x128xf32> to vector<2x32xf32>
    %84 = math.tanh %83 : vector<2x32xf32>
    %85 = arith.mulf %81, %51 : vector<2x32xf32>
    %86 = arith.mulf %80, %84 : vector<2x32xf32>
    %87 = arith.addf %85, %86 : vector<2x32xf32>
    %88 = math.tanh %87 : vector<2x32xf32>
    %89 = arith.mulf %82, %88 : vector<2x32xf32>
    %c0_55 = arith.constant 0 : index
    %c0_56 = arith.constant 0 : index
    %90 = vector.load %arg28[%c0_55, %c0_56] : memref<32x32xf32, #tpu.memory_space<vmem>>, vector<2x32xf32>
    tpu.vector_store %arg28[%c0_55, %c0_56], %89 {strides = array<i32>} : memref<32x32xf32, #tpu.memory_space<vmem>>, vector<2x32xf32>,
    %91 = vector.extract_strided_slice %46 {offsets = [2, 0], sizes = [2, 128], strides = [1, 1]} : vector<32x128xf32> to vector<2x128xf32>
    %cst_57 = arith.constant dense<0.000000e+00> : vector<2x128xf32>
    %92 = tpu.matmul %69, %47, %cst_57 {dimension_numbers = #tpu.dot_dimension_numbers<[1], [0], [0], [1], [0, 0, 1, 1], [], []>} : vector<2x32xf32>, vector<32x128xf32>, vector<2x128xf32> -> vector<2x128xf32>
    %93 = arith.addf %91, %92 : vector<2x128xf32>
    %94 = arith.negf %93 : vector<2x128xf32>
    %95 = math.exp %94 : vector<2x128xf32>
    %cst_58 = arith.constant 1.000000e+00 : f32
    %96 = vector.broadcast %cst_58 : f32 to vector<2x128xf32>
    %97 = arith.addf %96, %95 : vector<2x128xf32>
    %98 = arith.divf %96, %97 : vector<2x128xf32>
    %99 = vector.extract_strided_slice %98 {offsets = [0, 0], sizes = [2, 32], strides = [1, 1]} : vector<2x128xf32> to vector<2x32xf32>
    %100 = vector.extract_strided_slice %98 {offsets = [0, 32], sizes = [2, 32], strides = [1, 1]} : vector<2x128xf32> to vector<2x32xf32>
    %101 = vector.extract_strided_slice %98 {offsets = [0, 96], sizes = [2, 32], strides = [1, 1]} : vector<2x128xf32> to vector<2x32xf32>
    %102 = vector.extract_strided_slice %93 {offsets = [0, 64], sizes = [2, 32], strides = [1, 1]} : vector<2x128xf32> to vector<2x32xf32>
    %103 = math.tanh %102 : vector<2x32xf32>
    %104 = arith.mulf %100, %67 : vector<2x32xf32>
    %105 = arith.mulf %99, %103 : vector<2x32xf32>
    %106 = arith.addf %104, %105 : vector<2x32xf32>
    %107 = math.tanh %106 : vector<2x32xf32>
    %108 = arith.mulf %101, %107 : vector<2x32xf32>
    %cst_59 = arith.constant dense<0.000000e+00> : vector<2x128xf32>
    %109 = tpu.matmul %108, %48, %cst_59 {dimension_numbers = #tpu.dot_dimension_numbers<[1], [0], [0], [1], [0, 0, 1, 1], [], []>} : vector<2x32xf32>, vector<32x128xf32>, vector<2x128xf32> -> vector<2x128xf32>
    %cst_60 = arith.constant dense<0.000000e+00> : vector<2x128xf32>
    %110 = tpu.matmul %89, %49, %cst_60 {dimension_numbers = #tpu.dot_dimension_numbers<[1], [0], [0], [1], [0, 0, 1, 1], [], []>} : vector<2x32xf32>, vector<32x128xf32>, vector<2x128xf32> -> vector<2x128xf32>
    %111 = arith.addf %109, %110 : vector<2x128xf32>
    %112 = vector.broadcast %50 : vector<1x128xf32> to vector<2x128xf32>
    %113 = arith.addf %111, %112 : vector<2x128xf32>
    %114 = arith.negf %113 : vector<2x128xf32>
    %115 = math.exp %114 : vector<2x128xf32>
    %cst_61 = arith.constant 1.000000e+00 : f32
    %116 = vector.broadcast %cst_61 : f32 to vector<2x128xf32>
    %117 = arith.addf %116, %115 : vector<2x128xf32>
    %118 = arith.divf %116, %117 : vector<2x128xf32>
    %119 = vector.extract_strided_slice %118 {offsets = [0, 0], sizes = [2, 32], strides = [1, 1]} : vector<2x128xf32> to vector<2x32xf32>
    %120 = vector.extract_strided_slice %118 {offsets = [0, 32], sizes = [2, 32], strides = [1, 1]} : vector<2x128xf32> to vector<2x32xf32>
    %121 = vector.extract_strided_slice %118 {offsets = [0, 96], sizes = [2, 32], strides = [1, 1]} : vector<2x128xf32> to vector<2x32xf32>
    %122 = vector.extract_strided_slice %113 {offsets = [0, 64], sizes = [2, 32], strides = [1, 1]} : vector<2x128xf32> to vector<2x32xf32>
    %123 = math.tanh %122 : vector<2x32xf32>
    %124 = arith.mulf %120, %87 : vector<2x32xf32>
    %125 = arith.mulf %119, %123 : vector<2x32xf32>
    %126 = arith.addf %124, %125 : vector<2x32xf32>
    %127 = math.tanh %126 : vector<2x32xf32>
    %128 = arith.mulf %121, %127 : vector<2x32xf32>
    %c2_62 = arith.constant 2 : index
    %c0_63 = arith.constant 0 : index
    %129 = vector.load %arg28[%c2_62, %c0_63] : memref<32x32xf32, #tpu.memory_space<vmem>>, vector<2x32xf32>
    tpu.vector_store %arg28[%c2_62, %c0_63], %128 {strides = array<i32>} : memref<32x32xf32, #tpu.memory_space<vmem>>, vector<2x32xf32>,
    %130 = vector.extract_strided_slice %46 {offsets = [4, 0], sizes = [2, 128], strides = [1, 1]} : vector<32x128xf32> to vector<2x128xf32>
    %cst_64 = arith.constant dense<0.000000e+00> : vector<2x128xf32>
    %131 = tpu.matmul %108, %47, %cst_64 {dimension_numbers = #tpu.dot_dimension_numbers<[1], [0], [0], [1], [0, 0, 1, 1], [], []>} : vector<2x32xf32>, vector<32x128xf32>, vector<2x128xf32> -> vector<2x128xf32>
    %132 = arith.addf %130, %131 : vector<2x128xf32>
    %133 = arith.negf %132 : vector<2x128xf32>
    %134 = math.exp %133 : vector<2x128xf32>
    %cst_65 = arith.constant 1.000000e+00 : f32
    %135 = vector.broadcast %cst_65 : f32 to vector<2x128xf32>
    %136 = arith.addf %135, %134 : vector<2x128xf32>
    %137 = arith.divf %135, %136 : vector<2x128xf32>
    %138 = vector.extract_strided_slice %137 {offsets = [0, 0], sizes = [2, 32], strides = [1, 1]} : vector<2x128xf32> to vector<2x32xf32>
    %139 = vector.extract_strided_slice %137 {offsets = [0, 32], sizes = [2, 32], strides = [1, 1]} : vector<2x128xf32> to vector<2x32xf32>
    %140 = vector.extract_strided_slice %137 {offsets = [0, 96], sizes = [2, 32], strides = [1, 1]} : vector<2x128xf32> to vector<2x32xf32>
    %141 = vector.extract_strided_slice %132 {offsets = [0, 64], sizes = [2, 32], strides = [1, 1]} : vector<2x128xf32> to vector<2x32xf32>
    %142 = math.tanh %141 : vector<2x32xf32>
    %143 = arith.mulf %139, %106 : vector<2x32xf32>
    %144 = arith.mulf %138, %142 : vector<2x32xf32>
    %145 = arith.addf %143, %144 : vector<2x32xf32>
    %146 = math.tanh %145 : vector<2x32xf32>
    %147 = arith.mulf %140, %146 : vector<2x32xf32>
    %cst_66 = arith.constant dense<0.000000e+00> : vector<2x128xf32>
    %148 = tpu.matmul %147, %48, %cst_66 {dimension_numbers = #tpu.dot_dimension_numbers<[1], [0], [0], [1], [0, 0, 1, 1], [], []>} : vector<2x32xf32>, vector<32x128xf32>, vector<2x128xf32> -> vector<2x128xf32>
    %cst_67 = arith.constant dense<0.000000e+00> : vector<2x128xf32>
    %149 = tpu.matmul %128, %49, %cst_67 {dimension_numbers = #tpu.dot_dimension_numbers<[1], [0], [0], [1], [0, 0, 1, 1], [], []>} : vector<2x32xf32>, vector<32x128xf32>, vector<2x128xf32> -> vector<2x128xf32>
    %150 = arith.addf %148, %149 : vector<2x128xf32>
    %151 = vector.broadcast %50 : vector<1x128xf32> to vector<2x128xf32>
    %152 = arith.addf %150, %151 : vector<2x128xf32>
    %153 = arith.negf %152 : vector<2x128xf32>
    %154 = math.exp %153 : vector<2x128xf32>
    %cst_68 = arith.constant 1.000000e+00 : f32
    %155 = vector.broadcast %cst_68 : f32 to vector<2x128xf32>
    %156 = arith.addf %155, %154 : vector<2x128xf32>
    %157 = arith.divf %155, %156 : vector<2x128xf32>
    %158 = vector.extract_strided_slice %157 {offsets = [0, 0], sizes = [2, 32], strides = [1, 1]} : vector<2x128xf32> to vector<2x32xf32>
    %159 = vector.extract_strided_slice %157 {offsets = [0, 32], sizes = [2, 32], strides = [1, 1]} : vector<2x128xf32> to vector<2x32xf32>
    %160 = vector.extract_strided_slice %157 {offsets = [0, 96], sizes = [2, 32], strides = [1, 1]} : vector<2x128xf32> to vector<2x32xf32>
    %161 = vector.extract_strided_slice %152 {offsets = [0, 64], sizes = [2, 32], strides = [1, 1]} : vector<2x128xf32> to vector<2x32xf32>
    %162 = math.tanh %161 : vector<2x32xf32>
    %163 = arith.mulf %159, %126 : vector<2x32xf32>
    %164 = arith.mulf %158, %162 : vector<2x32xf32>
    %165 = arith.addf %163, %164 : vector<2x32xf32>
    %166 = math.tanh %165 : vector<2x32xf32>
    %167 = arith.mulf %160, %166 : vector<2x32xf32>
    %c4 = arith.constant 4 : index
    %c0_69 = arith.constant 0 : index
    %168 = vector.load %arg28[%c4, %c0_69] : memref<32x32xf32, #tpu.memory_space<vmem>>, vector<2x32xf32>
    tpu.vector_store %arg28[%c4, %c0_69], %167 {strides = array<i32>} : memref<32x32xf32, #tpu.memory_space<vmem>>, vector<2x32xf32>,
    %169 = vector.extract_strided_slice %46 {offsets = [6, 0], sizes = [2, 128], strides = [1, 1]} : vector<32x128xf32> to vector<2x128xf32>
    %cst_70 = arith.constant dense<0.000000e+00> : vector<2x128xf32>
    %170 = tpu.matmul %147, %47, %cst_70 {dimension_numbers = #tpu.dot_dimension_numbers<[1], [0], [0], [1], [0, 0, 1, 1], [], []>} : vector<2x32xf32>, vector<32x128xf32>, vector<2x128xf32> -> vector<2x128xf32>
    %171 = arith.addf %169, %170 : vector<2x128xf32>
    %172 = arith.negf %171 : vector<2x128xf32>
    %173 = math.exp %172 : vector<2x128xf32>
    %cst_71 = arith.constant 1.000000e+00 : f32
    %174 = vector.broadcast %cst_71 : f32 to vector<2x128xf32>
    %175 = arith.addf %174, %173 : vector<2x128xf32>
    %176 = arith.divf %174, %175 : vector<2x128xf32>
    %177 = vector.extract_strided_slice %176 {offsets = [0, 0], sizes = [2, 32], strides = [1, 1]} : vector<2x128xf32> to vector<2x32xf32>
    %178 = vector.extract_strided_slice %176 {offsets = [0, 32], sizes = [2, 32], strides = [1, 1]} : vector<2x128xf32> to vector<2x32xf32>
    %179 = vector.extract_strided_slice %176 {offsets = [0, 96], sizes = [2, 32], strides = [1, 1]} : vector<2x128xf32> to vector<2x32xf32>
    %180 = vector.extract_strided_slice %171 {offsets = [0, 64], sizes = [2, 32], strides = [1, 1]} : vector<2x128xf32> to vector<2x32xf32>
    %181 = math.tanh %180 : vector<2x32xf32>
    %182 = arith.mulf %178, %145 : vector<2x32xf32>
    %183 = arith.mulf %177, %181 : vector<2x32xf32>
    %184 = arith.addf %182, %183 : vector<2x32xf32>
    %185 = math.tanh %184 : vector<2x32xf32>
    %186 = arith.mulf %179, %185 : vector<2x32xf32>
    %cst_72 = arith.constant dense<0.000000e+00> : vector<2x128xf32>
    %187 = tpu.matmul %186, %48, %cst_72 {dimension_numbers = #tpu.dot_dimension_numbers<[1], [0], [0], [1], [0, 0, 1, 1], [], []>} : vector<2x32xf32>, vector<32x128xf32>, vector<2x128xf32> -> vector<2x128xf32>
    %cst_73 = arith.constant dense<0.000000e+00> : vector<2x128xf32>
    %188 = tpu.matmul %167, %49, %cst_73 {dimension_numbers = #tpu.dot_dimension_numbers<[1], [0], [0], [1], [0, 0, 1, 1], [], []>} : vector<2x32xf32>, vector<32x128xf32>, vector<2x128xf32> -> vector<2x128xf32>
    %189 = arith.addf %187, %188 : vector<2x128xf32>
    %190 = vector.broadcast %50 : vector<1x128xf32> to vector<2x128xf32>
    %191 = arith.addf %189, %190 : vector<2x128xf32>
    %192 = arith.negf %191 : vector<2x128xf32>
    %193 = math.exp %192 : vector<2x128xf32>
    %cst_74 = arith.constant 1.000000e+00 : f32
    %194 = vector.broadcast %cst_74 : f32 to vector<2x128xf32>
    %195 = arith.addf %194, %193 : vector<2x128xf32>
    %196 = arith.divf %194, %195 : vector<2x128xf32>
    %197 = vector.extract_strided_slice %196 {offsets = [0, 0], sizes = [2, 32], strides = [1, 1]} : vector<2x128xf32> to vector<2x32xf32>
    %198 = vector.extract_strided_slice %196 {offsets = [0, 32], sizes = [2, 32], strides = [1, 1]} : vector<2x128xf32> to vector<2x32xf32>
    %199 = vector.extract_strided_slice %196 {offsets = [0, 96], sizes = [2, 32], strides = [1, 1]} : vector<2x128xf32> to vector<2x32xf32>
    %200 = vector.extract_strided_slice %191 {offsets = [0, 64], sizes = [2, 32], strides = [1, 1]} : vector<2x128xf32> to vector<2x32xf32>
    %201 = math.tanh %200 : vector<2x32xf32>
    %202 = arith.mulf %198, %165 : vector<2x32xf32>
    %203 = arith.mulf %197, %201 : vector<2x32xf32>
    %204 = arith.addf %202, %203 : vector<2x32xf32>
    %205 = math.tanh %204 : vector<2x32xf32>
    %206 = arith.mulf %199, %205 : vector<2x32xf32>
    %c6 = arith.constant 6 : index
    %c0_75 = arith.constant 0 : index
    %207 = vector.load %arg28[%c6, %c0_75] : memref<32x32xf32, #tpu.memory_space<vmem>>, vector<2x32xf32>
    tpu.vector_store %arg28[%c6, %c0_75], %206 {strides = array<i32>} : memref<32x32xf32, #tpu.memory_space<vmem>>, vector<2x32xf32>,
    %208 = vector.extract_strided_slice %46 {offsets = [8, 0], sizes = [2, 128], strides = [1, 1]} : vector<32x128xf32> to vector<2x128xf32>
    %cst_76 = arith.constant dense<0.000000e+00> : vector<2x128xf32>
    %209 = tpu.matmul %186, %47, %cst_76 {dimension_numbers = #tpu.dot_dimension_numbers<[1], [0], [0], [1], [0, 0, 1, 1], [], []>} : vector<2x32xf32>, vector<32x128xf32>, vector<2x128xf32> -> vector<2x128xf32>
    %210 = arith.addf %208, %209 : vector<2x128xf32>
    %211 = arith.negf %210 : vector<2x128xf32>
    %212 = math.exp %211 : vector<2x128xf32>
    %cst_77 = arith.constant 1.000000e+00 : f32
    %213 = vector.broadcast %cst_77 : f32 to vector<2x128xf32>
    %214 = arith.addf %213, %212 : vector<2x128xf32>
    %215 = arith.divf %213, %214 : vector<2x128xf32>
    %216 = vector.extract_strided_slice %215 {offsets = [0, 0], sizes = [2, 32], strides = [1, 1]} : vector<2x128xf32> to vector<2x32xf32>
    %217 = vector.extract_strided_slice %215 {offsets = [0, 32], sizes = [2, 32], strides = [1, 1]} : vector<2x128xf32> to vector<2x32xf32>
    %218 = vector.extract_strided_slice %215 {offsets = [0, 96], sizes = [2, 32], strides = [1, 1]} : vector<2x128xf32> to vector<2x32xf32>
    %219 = vector.extract_strided_slice %210 {offsets = [0, 64], sizes = [2, 32], strides = [1, 1]} : vector<2x128xf32> to vector<2x32xf32>
    %220 = math.tanh %219 : vector<2x32xf32>
    %221 = arith.mulf %217, %184 : vector<2x32xf32>
    %222 = arith.mulf %216, %220 : vector<2x32xf32>
    %223 = arith.addf %221, %222 : vector<2x32xf32>
    %224 = math.tanh %223 : vector<2x32xf32>
    %225 = arith.mulf %218, %224 : vector<2x32xf32>
    %cst_78 = arith.constant dense<0.000000e+00> : vector<2x128xf32>
    %226 = tpu.matmul %225, %48, %cst_78 {dimension_numbers = #tpu.dot_dimension_numbers<[1], [0], [0], [1], [0, 0, 1, 1], [], []>} : vector<2x32xf32>, vector<32x128xf32>, vector<2x128xf32> -> vector<2x128xf32>
    %cst_79 = arith.constant dense<0.000000e+00> : vector<2x128xf32>
    %227 = tpu.matmul %206, %49, %cst_79 {dimension_numbers = #tpu.dot_dimension_numbers<[1], [0], [0], [1], [0, 0, 1, 1], [], []>} : vector<2x32xf32>, vector<32x128xf32>, vector<2x128xf32> -> vector<2x128xf32>
    %228 = arith.addf %226, %227 : vector<2x128xf32>
    %229 = vector.broadcast %50 : vector<1x128xf32> to vector<2x128xf32>
    %230 = arith.addf %228, %229 : vector<2x128xf32>
    %231 = arith.negf %230 : vector<2x128xf32>
    %232 = math.exp %231 : vector<2x128xf32>
    %cst_80 = arith.constant 1.000000e+00 : f32
    %233 = vector.broadcast %cst_80 : f32 to vector<2x128xf32>
    %234 = arith.addf %233, %232 : vector<2x128xf32>
    %235 = arith.divf %233, %234 : vector<2x128xf32>
    %236 = vector.extract_strided_slice %235 {offsets = [0, 0], sizes = [2, 32], strides = [1, 1]} : vector<2x128xf32> to vector<2x32xf32>
    %237 = vector.extract_strided_slice %235 {offsets = [0, 32], sizes = [2, 32], strides = [1, 1]} : vector<2x128xf32> to vector<2x32xf32>
    %238 = vector.extract_strided_slice %235 {offsets = [0, 96], sizes = [2, 32], strides = [1, 1]} : vector<2x128xf32> to vector<2x32xf32>
    %239 = vector.extract_strided_slice %230 {offsets = [0, 64], sizes = [2, 32], strides = [1, 1]} : vector<2x128xf32> to vector<2x32xf32>
    %240 = math.tanh %239 : vector<2x32xf32>
    %241 = arith.mulf %237, %204 : vector<2x32xf32>
    %242 = arith.mulf %236, %240 : vector<2x32xf32>
    %243 = arith.addf %241, %242 : vector<2x32xf32>
    %244 = math.tanh %243 : vector<2x32xf32>
    %245 = arith.mulf %238, %244 : vector<2x32xf32>
    %c8 = arith.constant 8 : index
    %c0_81 = arith.constant 0 : index
    %246 = vector.load %arg28[%c8, %c0_81] : memref<32x32xf32, #tpu.memory_space<vmem>>, vector<2x32xf32>
    tpu.vector_store %arg28[%c8, %c0_81], %245 {strides = array<i32>} : memref<32x32xf32, #tpu.memory_space<vmem>>, vector<2x32xf32>,
    %247 = vector.extract_strided_slice %46 {offsets = [10, 0], sizes = [2, 128], strides = [1, 1]} : vector<32x128xf32> to vector<2x128xf32>
    %cst_82 = arith.constant dense<0.000000e+00> : vector<2x128xf32>
    %248 = tpu.matmul %225, %47, %cst_82 {dimension_numbers = #tpu.dot_dimension_numbers<[1], [0], [0], [1], [0, 0, 1, 1], [], []>} : vector<2x32xf32>, vector<32x128xf32>, vector<2x128xf32> -> vector<2x128xf32>
    %249 = arith.addf %247, %248 : vector<2x128xf32>
    %250 = arith.negf %249 : vector<2x128xf32>
    %251 = math.exp %250 : vector<2x128xf32>
    %cst_83 = arith.constant 1.000000e+00 : f32
    %252 = vector.broadcast %cst_83 : f32 to vector<2x128xf32>
    %253 = arith.addf %252, %251 : vector<2x128xf32>
    %254 = arith.divf %252, %253 : vector<2x128xf32>
    %255 = vector.extract_strided_slice %254 {offsets = [0, 0], sizes = [2, 32], strides = [1, 1]} : vector<2x128xf32> to vector<2x32xf32>
    %256 = vector.extract_strided_slice %254 {offsets = [0, 32], sizes = [2, 32], strides = [1, 1]} : vector<2x128xf32> to vector<2x32xf32>
    %257 = vector.extract_strided_slice %254 {offsets = [0, 96], sizes = [2, 32], strides = [1, 1]} : vector<2x128xf32> to vector<2x32xf32>
    %258 = vector.extract_strided_slice %249 {offsets = [0, 64], sizes = [2, 32], strides = [1, 1]} : vector<2x128xf32> to vector<2x32xf32>
    %259 = math.tanh %258 : vector<2x32xf32>
    %260 = arith.mulf %256, %223 : vector<2x32xf32>
    %261 = arith.mulf %255, %259 : vector<2x32xf32>
    %262 = arith.addf %260, %261 : vector<2x32xf32>
    %263 = math.tanh %262 : vector<2x32xf32>
    %264 = arith.mulf %257, %263 : vector<2x32xf32>
    %cst_84 = arith.constant dense<0.000000e+00> : vector<2x128xf32>
    %265 = tpu.matmul %264, %48, %cst_84 {dimension_numbers = #tpu.dot_dimension_numbers<[1], [0], [0], [1], [0, 0, 1, 1], [], []>} : vector<2x32xf32>, vector<32x128xf32>, vector<2x128xf32> -> vector<2x128xf32>
    %cst_85 = arith.constant dense<0.000000e+00> : vector<2x128xf32>
    %266 = tpu.matmul %245, %49, %cst_85 {dimension_numbers = #tpu.dot_dimension_numbers<[1], [0], [0], [1], [0, 0, 1, 1], [], []>} : vector<2x32xf32>, vector<32x128xf32>, vector<2x128xf32> -> vector<2x128xf32>
    %267 = arith.addf %265, %266 : vector<2x128xf32>
    %268 = vector.broadcast %50 : vector<1x128xf32> to vector<2x128xf32>
    %269 = arith.addf %267, %268 : vector<2x128xf32>
    %270 = arith.negf %269 : vector<2x128xf32>
    %271 = math.exp %270 : vector<2x128xf32>
    %cst_86 = arith.constant 1.000000e+00 : f32
    %272 = vector.broadcast %cst_86 : f32 to vector<2x128xf32>
    %273 = arith.addf %272, %271 : vector<2x128xf32>
    %274 = arith.divf %272, %273 : vector<2x128xf32>
    %275 = vector.extract_strided_slice %274 {offsets = [0, 0], sizes = [2, 32], strides = [1, 1]} : vector<2x128xf32> to vector<2x32xf32>
    %276 = vector.extract_strided_slice %274 {offsets = [0, 32], sizes = [2, 32], strides = [1, 1]} : vector<2x128xf32> to vector<2x32xf32>
    %277 = vector.extract_strided_slice %274 {offsets = [0, 96], sizes = [2, 32], strides = [1, 1]} : vector<2x128xf32> to vector<2x32xf32>
    %278 = vector.extract_strided_slice %269 {offsets = [0, 64], sizes = [2, 32], strides = [1, 1]} : vector<2x128xf32> to vector<2x32xf32>
    %279 = math.tanh %278 : vector<2x32xf32>
    %280 = arith.mulf %276, %243 : vector<2x32xf32>
    %281 = arith.mulf %275, %279 : vector<2x32xf32>
    %282 = arith.addf %280, %281 : vector<2x32xf32>
    %283 = math.tanh %282 : vector<2x32xf32>
    %284 = arith.mulf %277, %283 : vector<2x32xf32>
    %c10 = arith.constant 10 : index
    %c0_87 = arith.constant 0 : index
    %285 = vector.load %arg28[%c10, %c0_87] : memref<32x32xf32, #tpu.memory_space<vmem>>, vector<2x32xf32>
    tpu.vector_store %arg28[%c10, %c0_87], %284 {strides = array<i32>} : memref<32x32xf32, #tpu.memory_space<vmem>>, vector<2x32xf32>,
    %286 = vector.extract_strided_slice %46 {offsets = [12, 0], sizes = [2, 128], strides = [1, 1]} : vector<32x128xf32> to vector<2x128xf32>
    %cst_88 = arith.constant dense<0.000000e+00> : vector<2x128xf32>
    %287 = tpu.matmul %264, %47, %cst_88 {dimension_numbers = #tpu.dot_dimension_numbers<[1], [0], [0], [1], [0, 0, 1, 1], [], []>} : vector<2x32xf32>, vector<32x128xf32>, vector<2x128xf32> -> vector<2x128xf32>
    %288 = arith.addf %286, %287 : vector<2x128xf32>
    %289 = arith.negf %288 : vector<2x128xf32>
    %290 = math.exp %289 : vector<2x128xf32>
    %cst_89 = arith.constant 1.000000e+00 : f32
    %291 = vector.broadcast %cst_89 : f32 to vector<2x128xf32>
    %292 = arith.addf %291, %290 : vector<2x128xf32>
    %293 = arith.divf %291, %292 : vector<2x128xf32>
    %294 = vector.extract_strided_slice %293 {offsets = [0, 0], sizes = [2, 32], strides = [1, 1]} : vector<2x128xf32> to vector<2x32xf32>
    %295 = vector.extract_strided_slice %293 {offsets = [0, 32], sizes = [2, 32], strides = [1, 1]} : vector<2x128xf32> to vector<2x32xf32>
    %296 = vector.extract_strided_slice %293 {offsets = [0, 96], sizes = [2, 32], strides = [1, 1]} : vector<2x128xf32> to vector<2x32xf32>
    %297 = vector.extract_strided_slice %288 {offsets = [0, 64], sizes = [2, 32], strides = [1, 1]} : vector<2x128xf32> to vector<2x32xf32>
    %298 = math.tanh %297 : vector<2x32xf32>
    %299 = arith.mulf %295, %262 : vector<2x32xf32>
    %300 = arith.mulf %294, %298 : vector<2x32xf32>
    %301 = arith.addf %299, %300 : vector<2x32xf32>
    %302 = math.tanh %301 : vector<2x32xf32>
    %303 = arith.mulf %296, %302 : vector<2x32xf32>
    %cst_90 = arith.constant dense<0.000000e+00> : vector<2x128xf32>
    %304 = tpu.matmul %303, %48, %cst_90 {dimension_numbers = #tpu.dot_dimension_numbers<[1], [0], [0], [1], [0, 0, 1, 1], [], []>} : vector<2x32xf32>, vector<32x128xf32>, vector<2x128xf32> -> vector<2x128xf32>
    %cst_91 = arith.constant dense<0.000000e+00> : vector<2x128xf32>
    %305 = tpu.matmul %284, %49, %cst_91 {dimension_numbers = #tpu.dot_dimension_numbers<[1], [0], [0], [1], [0, 0, 1, 1], [], []>} : vector<2x32xf32>, vector<32x128xf32>, vector<2x128xf32> -> vector<2x128xf32>
    %306 = arith.addf %304, %305 : vector<2x128xf32>
    %307 = vector.broadcast %50 : vector<1x128xf32> to vector<2x128xf32>
    %308 = arith.addf %306, %307 : vector<2x128xf32>
    %309 = arith.negf %308 : vector<2x128xf32>
    %310 = math.exp %309 : vector<2x128xf32>
    %cst_92 = arith.constant 1.000000e+00 : f32
    %311 = vector.broadcast %cst_92 : f32 to vector<2x128xf32>
    %312 = arith.addf %311, %310 : vector<2x128xf32>
    %313 = arith.divf %311, %312 : vector<2x128xf32>
    %314 = vector.extract_strided_slice %313 {offsets = [0, 0], sizes = [2, 32], strides = [1, 1]} : vector<2x128xf32> to vector<2x32xf32>
    %315 = vector.extract_strided_slice %313 {offsets = [0, 32], sizes = [2, 32], strides = [1, 1]} : vector<2x128xf32> to vector<2x32xf32>
    %316 = vector.extract_strided_slice %313 {offsets = [0, 96], sizes = [2, 32], strides = [1, 1]} : vector<2x128xf32> to vector<2x32xf32>
    %317 = vector.extract_strided_slice %308 {offsets = [0, 64], sizes = [2, 32], strides = [1, 1]} : vector<2x128xf32> to vector<2x32xf32>
    %318 = math.tanh %317 : vector<2x32xf32>
    %319 = arith.mulf %315, %282 : vector<2x32xf32>
    %320 = arith.mulf %314, %318 : vector<2x32xf32>
    %321 = arith.addf %319, %320 : vector<2x32xf32>
    %322 = math.tanh %321 : vector<2x32xf32>
    %323 = arith.mulf %316, %322 : vector<2x32xf32>
    %c12 = arith.constant 12 : index
    %c0_93 = arith.constant 0 : index
    %324 = vector.load %arg28[%c12, %c0_93] : memref<32x32xf32, #tpu.memory_space<vmem>>, vector<2x32xf32>
    tpu.vector_store %arg28[%c12, %c0_93], %323 {strides = array<i32>} : memref<32x32xf32, #tpu.memory_space<vmem>>, vector<2x32xf32>,
    %325 = vector.extract_strided_slice %46 {offsets = [14, 0], sizes = [2, 128], strides = [1, 1]} : vector<32x128xf32> to vector<2x128xf32>
    %cst_94 = arith.constant dense<0.000000e+00> : vector<2x128xf32>
    %326 = tpu.matmul %303, %47, %cst_94 {dimension_numbers = #tpu.dot_dimension_numbers<[1], [0], [0], [1], [0, 0, 1, 1], [], []>} : vector<2x32xf32>, vector<32x128xf32>, vector<2x128xf32> -> vector<2x128xf32>
    %327 = arith.addf %325, %326 : vector<2x128xf32>
    %328 = arith.negf %327 : vector<2x128xf32>
    %329 = math.exp %328 : vector<2x128xf32>
    %cst_95 = arith.constant 1.000000e+00 : f32
    %330 = vector.broadcast %cst_95 : f32 to vector<2x128xf32>
    %331 = arith.addf %330, %329 : vector<2x128xf32>
    %332 = arith.divf %330, %331 : vector<2x128xf32>
    %333 = vector.extract_strided_slice %332 {offsets = [0, 0], sizes = [2, 32], strides = [1, 1]} : vector<2x128xf32> to vector<2x32xf32>
    %334 = vector.extract_strided_slice %332 {offsets = [0, 32], sizes = [2, 32], strides = [1, 1]} : vector<2x128xf32> to vector<2x32xf32>
    %335 = vector.extract_strided_slice %332 {offsets = [0, 96], sizes = [2, 32], strides = [1, 1]} : vector<2x128xf32> to vector<2x32xf32>
    %336 = vector.extract_strided_slice %327 {offsets = [0, 64], sizes = [2, 32], strides = [1, 1]} : vector<2x128xf32> to vector<2x32xf32>
    %337 = math.tanh %336 : vector<2x32xf32>
    %338 = arith.mulf %334, %301 : vector<2x32xf32>
    %339 = arith.mulf %333, %337 : vector<2x32xf32>
    %340 = arith.addf %338, %339 : vector<2x32xf32>
    %341 = math.tanh %340 : vector<2x32xf32>
    %342 = arith.mulf %335, %341 : vector<2x32xf32>
    %cst_96 = arith.constant dense<0.000000e+00> : vector<2x128xf32>
    %343 = tpu.matmul %342, %48, %cst_96 {dimension_numbers = #tpu.dot_dimension_numbers<[1], [0], [0], [1], [0, 0, 1, 1], [], []>} : vector<2x32xf32>, vector<32x128xf32>, vector<2x128xf32> -> vector<2x128xf32>
    %cst_97 = arith.constant dense<0.000000e+00> : vector<2x128xf32>
    %344 = tpu.matmul %323, %49, %cst_97 {dimension_numbers = #tpu.dot_dimension_numbers<[1], [0], [0], [1], [0, 0, 1, 1], [], []>} : vector<2x32xf32>, vector<32x128xf32>, vector<2x128xf32> -> vector<2x128xf32>
    %345 = arith.addf %343, %344 : vector<2x128xf32>
    %346 = vector.broadcast %50 : vector<1x128xf32> to vector<2x128xf32>
    %347 = arith.addf %345, %346 : vector<2x128xf32>
    %348 = arith.negf %347 : vector<2x128xf32>
    %349 = math.exp %348 : vector<2x128xf32>
    %cst_98 = arith.constant 1.000000e+00 : f32
    %350 = vector.broadcast %cst_98 : f32 to vector<2x128xf32>
    %351 = arith.addf %350, %349 : vector<2x128xf32>
    %352 = arith.divf %350, %351 : vector<2x128xf32>
    %353 = vector.extract_strided_slice %352 {offsets = [0, 0], sizes = [2, 32], strides = [1, 1]} : vector<2x128xf32> to vector<2x32xf32>
    %354 = vector.extract_strided_slice %352 {offsets = [0, 32], sizes = [2, 32], strides = [1, 1]} : vector<2x128xf32> to vector<2x32xf32>
    %355 = vector.extract_strided_slice %352 {offsets = [0, 96], sizes = [2, 32], strides = [1, 1]} : vector<2x128xf32> to vector<2x32xf32>
    %356 = vector.extract_strided_slice %347 {offsets = [0, 64], sizes = [2, 32], strides = [1, 1]} : vector<2x128xf32> to vector<2x32xf32>
    %357 = math.tanh %356 : vector<2x32xf32>
    %358 = arith.mulf %354, %321 : vector<2x32xf32>
    %359 = arith.mulf %353, %357 : vector<2x32xf32>
    %360 = arith.addf %358, %359 : vector<2x32xf32>
    %361 = math.tanh %360 : vector<2x32xf32>
    %362 = arith.mulf %355, %361 : vector<2x32xf32>
    %c14 = arith.constant 14 : index
    %c0_99 = arith.constant 0 : index
    %363 = vector.load %arg28[%c14, %c0_99] : memref<32x32xf32, #tpu.memory_space<vmem>>, vector<2x32xf32>
    tpu.vector_store %arg28[%c14, %c0_99], %362 {strides = array<i32>} : memref<32x32xf32, #tpu.memory_space<vmem>>, vector<2x32xf32>,
    %364 = vector.extract_strided_slice %46 {offsets = [16, 0], sizes = [2, 128], strides = [1, 1]} : vector<32x128xf32> to vector<2x128xf32>
    %cst_100 = arith.constant dense<0.000000e+00> : vector<2x128xf32>
    %365 = tpu.matmul %342, %47, %cst_100 {dimension_numbers = #tpu.dot_dimension_numbers<[1], [0], [0], [1], [0, 0, 1, 1], [], []>} : vector<2x32xf32>, vector<32x128xf32>, vector<2x128xf32> -> vector<2x128xf32>
    %366 = arith.addf %364, %365 : vector<2x128xf32>
    %367 = arith.negf %366 : vector<2x128xf32>
    %368 = math.exp %367 : vector<2x128xf32>
    %cst_101 = arith.constant 1.000000e+00 : f32
    %369 = vector.broadcast %cst_101 : f32 to vector<2x128xf32>
    %370 = arith.addf %369, %368 : vector<2x128xf32>
    %371 = arith.divf %369, %370 : vector<2x128xf32>
    %372 = vector.extract_strided_slice %371 {offsets = [0, 0], sizes = [2, 32], strides = [1, 1]} : vector<2x128xf32> to vector<2x32xf32>
    %373 = vector.extract_strided_slice %371 {offsets = [0, 32], sizes = [2, 32], strides = [1, 1]} : vector<2x128xf32> to vector<2x32xf32>
    %374 = vector.extract_strided_slice %371 {offsets = [0, 96], sizes = [2, 32], strides = [1, 1]} : vector<2x128xf32> to vector<2x32xf32>
    %375 = vector.extract_strided_slice %366 {offsets = [0, 64], sizes = [2, 32], strides = [1, 1]} : vector<2x128xf32> to vector<2x32xf32>
    %376 = math.tanh %375 : vector<2x32xf32>
    %377 = arith.mulf %373, %340 : vector<2x32xf32>
    %378 = arith.mulf %372, %376 : vector<2x32xf32>
    %379 = arith.addf %377, %378 : vector<2x32xf32>
    %380 = math.tanh %379 : vector<2x32xf32>
    %381 = arith.mulf %374, %380 : vector<2x32xf32>
    %cst_102 = arith.constant dense<0.000000e+00> : vector<2x128xf32>
    %382 = tpu.matmul %381, %48, %cst_102 {dimension_numbers = #tpu.dot_dimension_numbers<[1], [0], [0], [1], [0, 0, 1, 1], [], []>} : vector<2x32xf32>, vector<32x128xf32>, vector<2x128xf32> -> vector<2x128xf32>
    %cst_103 = arith.constant dense<0.000000e+00> : vector<2x128xf32>
    %383 = tpu.matmul %362, %49, %cst_103 {dimension_numbers = #tpu.dot_dimension_numbers<[1], [0], [0], [1], [0, 0, 1, 1], [], []>} : vector<2x32xf32>, vector<32x128xf32>, vector<2x128xf32> -> vector<2x128xf32>
    %384 = arith.addf %382, %383 : vector<2x128xf32>
    %385 = vector.broadcast %50 : vector<1x128xf32> to vector<2x128xf32>
    %386 = arith.addf %384, %385 : vector<2x128xf32>
    %387 = arith.negf %386 : vector<2x128xf32>
    %388 = math.exp %387 : vector<2x128xf32>
    %cst_104 = arith.constant 1.000000e+00 : f32
    %389 = vector.broadcast %cst_104 : f32 to vector<2x128xf32>
    %390 = arith.addf %389, %388 : vector<2x128xf32>
    %391 = arith.divf %389, %390 : vector<2x128xf32>
    %392 = vector.extract_strided_slice %391 {offsets = [0, 0], sizes = [2, 32], strides = [1, 1]} : vector<2x128xf32> to vector<2x32xf32>
    %393 = vector.extract_strided_slice %391 {offsets = [0, 32], sizes = [2, 32], strides = [1, 1]} : vector<2x128xf32> to vector<2x32xf32>
    %394 = vector.extract_strided_slice %391 {offsets = [0, 96], sizes = [2, 32], strides = [1, 1]} : vector<2x128xf32> to vector<2x32xf32>
    %395 = vector.extract_strided_slice %386 {offsets = [0, 64], sizes = [2, 32], strides = [1, 1]} : vector<2x128xf32> to vector<2x32xf32>
    %396 = math.tanh %395 : vector<2x32xf32>
    %397 = arith.mulf %393, %360 : vector<2x32xf32>
    %398 = arith.mulf %392, %396 : vector<2x32xf32>
    %399 = arith.addf %397, %398 : vector<2x32xf32>
    %400 = math.tanh %399 : vector<2x32xf32>
    %401 = arith.mulf %394, %400 : vector<2x32xf32>
    %c16 = arith.constant 16 : index
    %c0_105 = arith.constant 0 : index
    %402 = vector.load %arg28[%c16, %c0_105] : memref<32x32xf32, #tpu.memory_space<vmem>>, vector<2x32xf32>
    tpu.vector_store %arg28[%c16, %c0_105], %401 {strides = array<i32>} : memref<32x32xf32, #tpu.memory_space<vmem>>, vector<2x32xf32>,
    %403 = vector.extract_strided_slice %46 {offsets = [18, 0], sizes = [2, 128], strides = [1, 1]} : vector<32x128xf32> to vector<2x128xf32>
    %cst_106 = arith.constant dense<0.000000e+00> : vector<2x128xf32>
    %404 = tpu.matmul %381, %47, %cst_106 {dimension_numbers = #tpu.dot_dimension_numbers<[1], [0], [0], [1], [0, 0, 1, 1], [], []>} : vector<2x32xf32>, vector<32x128xf32>, vector<2x128xf32> -> vector<2x128xf32>
    %405 = arith.addf %403, %404 : vector<2x128xf32>
    %406 = arith.negf %405 : vector<2x128xf32>
    %407 = math.exp %406 : vector<2x128xf32>
    %cst_107 = arith.constant 1.000000e+00 : f32
    %408 = vector.broadcast %cst_107 : f32 to vector<2x128xf32>
    %409 = arith.addf %408, %407 : vector<2x128xf32>
    %410 = arith.divf %408, %409 : vector<2x128xf32>
    %411 = vector.extract_strided_slice %410 {offsets = [0, 0], sizes = [2, 32], strides = [1, 1]} : vector<2x128xf32> to vector<2x32xf32>
    %412 = vector.extract_strided_slice %410 {offsets = [0, 32], sizes = [2, 32], strides = [1, 1]} : vector<2x128xf32> to vector<2x32xf32>
    %413 = vector.extract_strided_slice %410 {offsets = [0, 96], sizes = [2, 32], strides = [1, 1]} : vector<2x128xf32> to vector<2x32xf32>
    %414 = vector.extract_strided_slice %405 {offsets = [0, 64], sizes = [2, 32], strides = [1, 1]} : vector<2x128xf32> to vector<2x32xf32>
    %415 = math.tanh %414 : vector<2x32xf32>
    %416 = arith.mulf %412, %379 : vector<2x32xf32>
    %417 = arith.mulf %411, %415 : vector<2x32xf32>
    %418 = arith.addf %416, %417 : vector<2x32xf32>
    %419 = math.tanh %418 : vector<2x32xf32>
    %420 = arith.mulf %413, %419 : vector<2x32xf32>
    %cst_108 = arith.constant dense<0.000000e+00> : vector<2x128xf32>
    %421 = tpu.matmul %420, %48, %cst_108 {dimension_numbers = #tpu.dot_dimension_numbers<[1], [0], [0], [1], [0, 0, 1, 1], [], []>} : vector<2x32xf32>, vector<32x128xf32>, vector<2x128xf32> -> vector<2x128xf32>
    %cst_109 = arith.constant dense<0.000000e+00> : vector<2x128xf32>
    %422 = tpu.matmul %401, %49, %cst_109 {dimension_numbers = #tpu.dot_dimension_numbers<[1], [0], [0], [1], [0, 0, 1, 1], [], []>} : vector<2x32xf32>, vector<32x128xf32>, vector<2x128xf32> -> vector<2x128xf32>
    %423 = arith.addf %421, %422 : vector<2x128xf32>
    %424 = vector.broadcast %50 : vector<1x128xf32> to vector<2x128xf32>
    %425 = arith.addf %423, %424 : vector<2x128xf32>
    %426 = arith.negf %425 : vector<2x128xf32>
    %427 = math.exp %426 : vector<2x128xf32>
    %cst_110 = arith.constant 1.000000e+00 : f32
    %428 = vector.broadcast %cst_110 : f32 to vector<2x128xf32>
    %429 = arith.addf %428, %427 : vector<2x128xf32>
    %430 = arith.divf %428, %429 : vector<2x128xf32>
    %431 = vector.extract_strided_slice %430 {offsets = [0, 0], sizes = [2, 32], strides = [1, 1]} : vector<2x128xf32> to vector<2x32xf32>
    %432 = vector.extract_strided_slice %430 {offsets = [0, 32], sizes = [2, 32], strides = [1, 1]} : vector<2x128xf32> to vector<2x32xf32>
    %433 = vector.extract_strided_slice %430 {offsets = [0, 96], sizes = [2, 32], strides = [1, 1]} : vector<2x128xf32> to vector<2x32xf32>
    %434 = vector.extract_strided_slice %425 {offsets = [0, 64], sizes = [2, 32], strides = [1, 1]} : vector<2x128xf32> to vector<2x32xf32>
    %435 = math.tanh %434 : vector<2x32xf32>
    %436 = arith.mulf %432, %399 : vector<2x32xf32>
    %437 = arith.mulf %431, %435 : vector<2x32xf32>
    %438 = arith.addf %436, %437 : vector<2x32xf32>
    %439 = math.tanh %438 : vector<2x32xf32>
    %440 = arith.mulf %433, %439 : vector<2x32xf32>
    %c18 = arith.constant 18 : index
    %c0_111 = arith.constant 0 : index
    %441 = vector.load %arg28[%c18, %c0_111] : memref<32x32xf32, #tpu.memory_space<vmem>>, vector<2x32xf32>
    tpu.vector_store %arg28[%c18, %c0_111], %440 {strides = array<i32>} : memref<32x32xf32, #tpu.memory_space<vmem>>, vector<2x32xf32>,
    %442 = vector.extract_strided_slice %46 {offsets = [20, 0], sizes = [2, 128], strides = [1, 1]} : vector<32x128xf32> to vector<2x128xf32>
    %cst_112 = arith.constant dense<0.000000e+00> : vector<2x128xf32>
    %443 = tpu.matmul %420, %47, %cst_112 {dimension_numbers = #tpu.dot_dimension_numbers<[1], [0], [0], [1], [0, 0, 1, 1], [], []>} : vector<2x32xf32>, vector<32x128xf32>, vector<2x128xf32> -> vector<2x128xf32>
    %444 = arith.addf %442, %443 : vector<2x128xf32>
    %445 = arith.negf %444 : vector<2x128xf32>
    %446 = math.exp %445 : vector<2x128xf32>
    %cst_113 = arith.constant 1.000000e+00 : f32
    %447 = vector.broadcast %cst_113 : f32 to vector<2x128xf32>
    %448 = arith.addf %447, %446 : vector<2x128xf32>
    %449 = arith.divf %447, %448 : vector<2x128xf32>
    %450 = vector.extract_strided_slice %449 {offsets = [0, 0], sizes = [2, 32], strides = [1, 1]} : vector<2x128xf32> to vector<2x32xf32>
    %451 = vector.extract_strided_slice %449 {offsets = [0, 32], sizes = [2, 32], strides = [1, 1]} : vector<2x128xf32> to vector<2x32xf32>
    %452 = vector.extract_strided_slice %449 {offsets = [0, 96], sizes = [2, 32], strides = [1, 1]} : vector<2x128xf32> to vector<2x32xf32>
    %453 = vector.extract_strided_slice %444 {offsets = [0, 64], sizes = [2, 32], strides = [1, 1]} : vector<2x128xf32> to vector<2x32xf32>
    %454 = math.tanh %453 : vector<2x32xf32>
    %455 = arith.mulf %451, %418 : vector<2x32xf32>
    %456 = arith.mulf %450, %454 : vector<2x32xf32>
    %457 = arith.addf %455, %456 : vector<2x32xf32>
    %458 = math.tanh %457 : vector<2x32xf32>
    %459 = arith.mulf %452, %458 : vector<2x32xf32>
    %cst_114 = arith.constant dense<0.000000e+00> : vector<2x128xf32>
    %460 = tpu.matmul %459, %48, %cst_114 {dimension_numbers = #tpu.dot_dimension_numbers<[1], [0], [0], [1], [0, 0, 1, 1], [], []>} : vector<2x32xf32>, vector<32x128xf32>, vector<2x128xf32> -> vector<2x128xf32>
    %cst_115 = arith.constant dense<0.000000e+00> : vector<2x128xf32>
    %461 = tpu.matmul %440, %49, %cst_115 {dimension_numbers = #tpu.dot_dimension_numbers<[1], [0], [0], [1], [0, 0, 1, 1], [], []>} : vector<2x32xf32>, vector<32x128xf32>, vector<2x128xf32> -> vector<2x128xf32>
    %462 = arith.addf %460, %461 : vector<2x128xf32>
    %463 = vector.broadcast %50 : vector<1x128xf32> to vector<2x128xf32>
    %464 = arith.addf %462, %463 : vector<2x128xf32>
    %465 = arith.negf %464 : vector<2x128xf32>
    %466 = math.exp %465 : vector<2x128xf32>
    %cst_116 = arith.constant 1.000000e+00 : f32
    %467 = vector.broadcast %cst_116 : f32 to vector<2x128xf32>
    %468 = arith.addf %467, %466 : vector<2x128xf32>
    %469 = arith.divf %467, %468 : vector<2x128xf32>
    %470 = vector.extract_strided_slice %469 {offsets = [0, 0], sizes = [2, 32], strides = [1, 1]} : vector<2x128xf32> to vector<2x32xf32>
    %471 = vector.extract_strided_slice %469 {offsets = [0, 32], sizes = [2, 32], strides = [1, 1]} : vector<2x128xf32> to vector<2x32xf32>
    %472 = vector.extract_strided_slice %469 {offsets = [0, 96], sizes = [2, 32], strides = [1, 1]} : vector<2x128xf32> to vector<2x32xf32>
    %473 = vector.extract_strided_slice %464 {offsets = [0, 64], sizes = [2, 32], strides = [1, 1]} : vector<2x128xf32> to vector<2x32xf32>
    %474 = math.tanh %473 : vector<2x32xf32>
    %475 = arith.mulf %471, %438 : vector<2x32xf32>
    %476 = arith.mulf %470, %474 : vector<2x32xf32>
    %477 = arith.addf %475, %476 : vector<2x32xf32>
    %478 = math.tanh %477 : vector<2x32xf32>
    %479 = arith.mulf %472, %478 : vector<2x32xf32>
    %c20 = arith.constant 20 : index
    %c0_117 = arith.constant 0 : index
    %480 = vector.load %arg28[%c20, %c0_117] : memref<32x32xf32, #tpu.memory_space<vmem>>, vector<2x32xf32>
    tpu.vector_store %arg28[%c20, %c0_117], %479 {strides = array<i32>} : memref<32x32xf32, #tpu.memory_space<vmem>>, vector<2x32xf32>,
    %481 = vector.extract_strided_slice %46 {offsets = [22, 0], sizes = [2, 128], strides = [1, 1]} : vector<32x128xf32> to vector<2x128xf32>
    %cst_118 = arith.constant dense<0.000000e+00> : vector<2x128xf32>
    %482 = tpu.matmul %459, %47, %cst_118 {dimension_numbers = #tpu.dot_dimension_numbers<[1], [0], [0], [1], [0, 0, 1, 1], [], []>} : vector<2x32xf32>, vector<32x128xf32>, vector<2x128xf32> -> vector<2x128xf32>
    %483 = arith.addf %481, %482 : vector<2x128xf32>
    %484 = arith.negf %483 : vector<2x128xf32>
    %485 = math.exp %484 : vector<2x128xf32>
    %cst_119 = arith.constant 1.000000e+00 : f32
    %486 = vector.broadcast %cst_119 : f32 to vector<2x128xf32>
    %487 = arith.addf %486, %485 : vector<2x128xf32>
    %488 = arith.divf %486, %487 : vector<2x128xf32>
    %489 = vector.extract_strided_slice %488 {offsets = [0, 0], sizes = [2, 32], strides = [1, 1]} : vector<2x128xf32> to vector<2x32xf32>
    %490 = vector.extract_strided_slice %488 {offsets = [0, 32], sizes = [2, 32], strides = [1, 1]} : vector<2x128xf32> to vector<2x32xf32>
    %491 = vector.extract_strided_slice %488 {offsets = [0, 96], sizes = [2, 32], strides = [1, 1]} : vector<2x128xf32> to vector<2x32xf32>
    %492 = vector.extract_strided_slice %483 {offsets = [0, 64], sizes = [2, 32], strides = [1, 1]} : vector<2x128xf32> to vector<2x32xf32>
    %493 = math.tanh %492 : vector<2x32xf32>
    %494 = arith.mulf %490, %457 : vector<2x32xf32>
    %495 = arith.mulf %489, %493 : vector<2x32xf32>
    %496 = arith.addf %494, %495 : vector<2x32xf32>
    %497 = math.tanh %496 : vector<2x32xf32>
    %498 = arith.mulf %491, %497 : vector<2x32xf32>
    %cst_120 = arith.constant dense<0.000000e+00> : vector<2x128xf32>
    %499 = tpu.matmul %498, %48, %cst_120 {dimension_numbers = #tpu.dot_dimension_numbers<[1], [0], [0], [1], [0, 0, 1, 1], [], []>} : vector<2x32xf32>, vector<32x128xf32>, vector<2x128xf32> -> vector<2x128xf32>
    %cst_121 = arith.constant dense<0.000000e+00> : vector<2x128xf32>
    %500 = tpu.matmul %479, %49, %cst_121 {dimension_numbers = #tpu.dot_dimension_numbers<[1], [0], [0], [1], [0, 0, 1, 1], [], []>} : vector<2x32xf32>, vector<32x128xf32>, vector<2x128xf32> -> vector<2x128xf32>
    %501 = arith.addf %499, %500 : vector<2x128xf32>
    %502 = vector.broadcast %50 : vector<1x128xf32> to vector<2x128xf32>
    %503 = arith.addf %501, %502 : vector<2x128xf32>
    %504 = arith.negf %503 : vector<2x128xf32>
    %505 = math.exp %504 : vector<2x128xf32>
    %cst_122 = arith.constant 1.000000e+00 : f32
    %506 = vector.broadcast %cst_122 : f32 to vector<2x128xf32>
    %507 = arith.addf %506, %505 : vector<2x128xf32>
    %508 = arith.divf %506, %507 : vector<2x128xf32>
    %509 = vector.extract_strided_slice %508 {offsets = [0, 0], sizes = [2, 32], strides = [1, 1]} : vector<2x128xf32> to vector<2x32xf32>
    %510 = vector.extract_strided_slice %508 {offsets = [0, 32], sizes = [2, 32], strides = [1, 1]} : vector<2x128xf32> to vector<2x32xf32>
    %511 = vector.extract_strided_slice %508 {offsets = [0, 96], sizes = [2, 32], strides = [1, 1]} : vector<2x128xf32> to vector<2x32xf32>
    %512 = vector.extract_strided_slice %503 {offsets = [0, 64], sizes = [2, 32], strides = [1, 1]} : vector<2x128xf32> to vector<2x32xf32>
    %513 = math.tanh %512 : vector<2x32xf32>
    %514 = arith.mulf %510, %477 : vector<2x32xf32>
    %515 = arith.mulf %509, %513 : vector<2x32xf32>
    %516 = arith.addf %514, %515 : vector<2x32xf32>
    %517 = math.tanh %516 : vector<2x32xf32>
    %518 = arith.mulf %511, %517 : vector<2x32xf32>
    %c22 = arith.constant 22 : index
    %c0_123 = arith.constant 0 : index
    %519 = vector.load %arg28[%c22, %c0_123] : memref<32x32xf32, #tpu.memory_space<vmem>>, vector<2x32xf32>
    tpu.vector_store %arg28[%c22, %c0_123], %518 {strides = array<i32>} : memref<32x32xf32, #tpu.memory_space<vmem>>, vector<2x32xf32>,
    %520 = vector.extract_strided_slice %46 {offsets = [24, 0], sizes = [2, 128], strides = [1, 1]} : vector<32x128xf32> to vector<2x128xf32>
    %cst_124 = arith.constant dense<0.000000e+00> : vector<2x128xf32>
    %521 = tpu.matmul %498, %47, %cst_124 {dimension_numbers = #tpu.dot_dimension_numbers<[1], [0], [0], [1], [0, 0, 1, 1], [], []>} : vector<2x32xf32>, vector<32x128xf32>, vector<2x128xf32> -> vector<2x128xf32>
    %522 = arith.addf %520, %521 : vector<2x128xf32>
    %523 = arith.negf %522 : vector<2x128xf32>
    %524 = math.exp %523 : vector<2x128xf32>
    %cst_125 = arith.constant 1.000000e+00 : f32
    %525 = vector.broadcast %cst_125 : f32 to vector<2x128xf32>
    %526 = arith.addf %525, %524 : vector<2x128xf32>
    %527 = arith.divf %525, %526 : vector<2x128xf32>
    %528 = vector.extract_strided_slice %527 {offsets = [0, 0], sizes = [2, 32], strides = [1, 1]} : vector<2x128xf32> to vector<2x32xf32>
    %529 = vector.extract_strided_slice %527 {offsets = [0, 32], sizes = [2, 32], strides = [1, 1]} : vector<2x128xf32> to vector<2x32xf32>
    %530 = vector.extract_strided_slice %527 {offsets = [0, 96], sizes = [2, 32], strides = [1, 1]} : vector<2x128xf32> to vector<2x32xf32>
    %531 = vector.extract_strided_slice %522 {offsets = [0, 64], sizes = [2, 32], strides = [1, 1]} : vector<2x128xf32> to vector<2x32xf32>
    %532 = math.tanh %531 : vector<2x32xf32>
    %533 = arith.mulf %529, %496 : vector<2x32xf32>
    %534 = arith.mulf %528, %532 : vector<2x32xf32>
    %535 = arith.addf %533, %534 : vector<2x32xf32>
    %536 = math.tanh %535 : vector<2x32xf32>
    %537 = arith.mulf %530, %536 : vector<2x32xf32>
    %cst_126 = arith.constant dense<0.000000e+00> : vector<2x128xf32>
    %538 = tpu.matmul %537, %48, %cst_126 {dimension_numbers = #tpu.dot_dimension_numbers<[1], [0], [0], [1], [0, 0, 1, 1], [], []>} : vector<2x32xf32>, vector<32x128xf32>, vector<2x128xf32> -> vector<2x128xf32>
    %cst_127 = arith.constant dense<0.000000e+00> : vector<2x128xf32>
    %539 = tpu.matmul %518, %49, %cst_127 {dimension_numbers = #tpu.dot_dimension_numbers<[1], [0], [0], [1], [0, 0, 1, 1], [], []>} : vector<2x32xf32>, vector<32x128xf32>, vector<2x128xf32> -> vector<2x128xf32>
    %540 = arith.addf %538, %539 : vector<2x128xf32>
    %541 = vector.broadcast %50 : vector<1x128xf32> to vector<2x128xf32>
    %542 = arith.addf %540, %541 : vector<2x128xf32>
    %543 = arith.negf %542 : vector<2x128xf32>
    %544 = math.exp %543 : vector<2x128xf32>
    %cst_128 = arith.constant 1.000000e+00 : f32
    %545 = vector.broadcast %cst_128 : f32 to vector<2x128xf32>
    %546 = arith.addf %545, %544 : vector<2x128xf32>
    %547 = arith.divf %545, %546 : vector<2x128xf32>
    %548 = vector.extract_strided_slice %547 {offsets = [0, 0], sizes = [2, 32], strides = [1, 1]} : vector<2x128xf32> to vector<2x32xf32>
    %549 = vector.extract_strided_slice %547 {offsets = [0, 32], sizes = [2, 32], strides = [1, 1]} : vector<2x128xf32> to vector<2x32xf32>
    %550 = vector.extract_strided_slice %547 {offsets = [0, 96], sizes = [2, 32], strides = [1, 1]} : vector<2x128xf32> to vector<2x32xf32>
    %551 = vector.extract_strided_slice %542 {offsets = [0, 64], sizes = [2, 32], strides = [1, 1]} : vector<2x128xf32> to vector<2x32xf32>
    %552 = math.tanh %551 : vector<2x32xf32>
    %553 = arith.mulf %549, %516 : vector<2x32xf32>
    %554 = arith.mulf %548, %552 : vector<2x32xf32>
    %555 = arith.addf %553, %554 : vector<2x32xf32>
    %556 = math.tanh %555 : vector<2x32xf32>
    %557 = arith.mulf %550, %556 : vector<2x32xf32>
    %c24 = arith.constant 24 : index
    %c0_129 = arith.constant 0 : index
    %558 = vector.load %arg28[%c24, %c0_129] : memref<32x32xf32, #tpu.memory_space<vmem>>, vector<2x32xf32>
    tpu.vector_store %arg28[%c24, %c0_129], %557 {strides = array<i32>} : memref<32x32xf32, #tpu.memory_space<vmem>>, vector<2x32xf32>,
    %559 = vector.extract_strided_slice %46 {offsets = [26, 0], sizes = [2, 128], strides = [1, 1]} : vector<32x128xf32> to vector<2x128xf32>
    %cst_130 = arith.constant dense<0.000000e+00> : vector<2x128xf32>
    %560 = tpu.matmul %537, %47, %cst_130 {dimension_numbers = #tpu.dot_dimension_numbers<[1], [0], [0], [1], [0, 0, 1, 1], [], []>} : vector<2x32xf32>, vector<32x128xf32>, vector<2x128xf32> -> vector<2x128xf32>
    %561 = arith.addf %559, %560 : vector<2x128xf32>
    %562 = arith.negf %561 : vector<2x128xf32>
    %563 = math.exp %562 : vector<2x128xf32>
    %cst_131 = arith.constant 1.000000e+00 : f32
    %564 = vector.broadcast %cst_131 : f32 to vector<2x128xf32>
    %565 = arith.addf %564, %563 : vector<2x128xf32>
    %566 = arith.divf %564, %565 : vector<2x128xf32>
    %567 = vector.extract_strided_slice %566 {offsets = [0, 0], sizes = [2, 32], strides = [1, 1]} : vector<2x128xf32> to vector<2x32xf32>
    %568 = vector.extract_strided_slice %566 {offsets = [0, 32], sizes = [2, 32], strides = [1, 1]} : vector<2x128xf32> to vector<2x32xf32>
    %569 = vector.extract_strided_slice %566 {offsets = [0, 96], sizes = [2, 32], strides = [1, 1]} : vector<2x128xf32> to vector<2x32xf32>
    %570 = vector.extract_strided_slice %561 {offsets = [0, 64], sizes = [2, 32], strides = [1, 1]} : vector<2x128xf32> to vector<2x32xf32>
    %571 = math.tanh %570 : vector<2x32xf32>
    %572 = arith.mulf %568, %535 : vector<2x32xf32>
    %573 = arith.mulf %567, %571 : vector<2x32xf32>
    %574 = arith.addf %572, %573 : vector<2x32xf32>
    %575 = math.tanh %574 : vector<2x32xf32>
    %576 = arith.mulf %569, %575 : vector<2x32xf32>
    %cst_132 = arith.constant dense<0.000000e+00> : vector<2x128xf32>
    %577 = tpu.matmul %576, %48, %cst_132 {dimension_numbers = #tpu.dot_dimension_numbers<[1], [0], [0], [1], [0, 0, 1, 1], [], []>} : vector<2x32xf32>, vector<32x128xf32>, vector<2x128xf32> -> vector<2x128xf32>
    %cst_133 = arith.constant dense<0.000000e+00> : vector<2x128xf32>
    %578 = tpu.matmul %557, %49, %cst_133 {dimension_numbers = #tpu.dot_dimension_numbers<[1], [0], [0], [1], [0, 0, 1, 1], [], []>} : vector<2x32xf32>, vector<32x128xf32>, vector<2x128xf32> -> vector<2x128xf32>
    %579 = arith.addf %577, %578 : vector<2x128xf32>
    %580 = vector.broadcast %50 : vector<1x128xf32> to vector<2x128xf32>
    %581 = arith.addf %579, %580 : vector<2x128xf32>
    %582 = arith.negf %581 : vector<2x128xf32>
    %583 = math.exp %582 : vector<2x128xf32>
    %cst_134 = arith.constant 1.000000e+00 : f32
    %584 = vector.broadcast %cst_134 : f32 to vector<2x128xf32>
    %585 = arith.addf %584, %583 : vector<2x128xf32>
    %586 = arith.divf %584, %585 : vector<2x128xf32>
    %587 = vector.extract_strided_slice %586 {offsets = [0, 0], sizes = [2, 32], strides = [1, 1]} : vector<2x128xf32> to vector<2x32xf32>
    %588 = vector.extract_strided_slice %586 {offsets = [0, 32], sizes = [2, 32], strides = [1, 1]} : vector<2x128xf32> to vector<2x32xf32>
    %589 = vector.extract_strided_slice %586 {offsets = [0, 96], sizes = [2, 32], strides = [1, 1]} : vector<2x128xf32> to vector<2x32xf32>
    %590 = vector.extract_strided_slice %581 {offsets = [0, 64], sizes = [2, 32], strides = [1, 1]} : vector<2x128xf32> to vector<2x32xf32>
    %591 = math.tanh %590 : vector<2x32xf32>
    %592 = arith.mulf %588, %555 : vector<2x32xf32>
    %593 = arith.mulf %587, %591 : vector<2x32xf32>
    %594 = arith.addf %592, %593 : vector<2x32xf32>
    %595 = math.tanh %594 : vector<2x32xf32>
    %596 = arith.mulf %589, %595 : vector<2x32xf32>
    %c26 = arith.constant 26 : index
    %c0_135 = arith.constant 0 : index
    %597 = vector.load %arg28[%c26, %c0_135] : memref<32x32xf32, #tpu.memory_space<vmem>>, vector<2x32xf32>
    tpu.vector_store %arg28[%c26, %c0_135], %596 {strides = array<i32>} : memref<32x32xf32, #tpu.memory_space<vmem>>, vector<2x32xf32>,
    %598 = vector.extract_strided_slice %46 {offsets = [28, 0], sizes = [2, 128], strides = [1, 1]} : vector<32x128xf32> to vector<2x128xf32>
    %cst_136 = arith.constant dense<0.000000e+00> : vector<2x128xf32>
    %599 = tpu.matmul %576, %47, %cst_136 {dimension_numbers = #tpu.dot_dimension_numbers<[1], [0], [0], [1], [0, 0, 1, 1], [], []>} : vector<2x32xf32>, vector<32x128xf32>, vector<2x128xf32> -> vector<2x128xf32>
    %600 = arith.addf %598, %599 : vector<2x128xf32>
    %601 = arith.negf %600 : vector<2x128xf32>
    %602 = math.exp %601 : vector<2x128xf32>
    %cst_137 = arith.constant 1.000000e+00 : f32
    %603 = vector.broadcast %cst_137 : f32 to vector<2x128xf32>
    %604 = arith.addf %603, %602 : vector<2x128xf32>
    %605 = arith.divf %603, %604 : vector<2x128xf32>
    %606 = vector.extract_strided_slice %605 {offsets = [0, 0], sizes = [2, 32], strides = [1, 1]} : vector<2x128xf32> to vector<2x32xf32>
    %607 = vector.extract_strided_slice %605 {offsets = [0, 32], sizes = [2, 32], strides = [1, 1]} : vector<2x128xf32> to vector<2x32xf32>
    %608 = vector.extract_strided_slice %605 {offsets = [0, 96], sizes = [2, 32], strides = [1, 1]} : vector<2x128xf32> to vector<2x32xf32>
    %609 = vector.extract_strided_slice %600 {offsets = [0, 64], sizes = [2, 32], strides = [1, 1]} : vector<2x128xf32> to vector<2x32xf32>
    %610 = math.tanh %609 : vector<2x32xf32>
    %611 = arith.mulf %607, %574 : vector<2x32xf32>
    %612 = arith.mulf %606, %610 : vector<2x32xf32>
    %613 = arith.addf %611, %612 : vector<2x32xf32>
    %614 = math.tanh %613 : vector<2x32xf32>
    %615 = arith.mulf %608, %614 : vector<2x32xf32>
    %cst_138 = arith.constant dense<0.000000e+00> : vector<2x128xf32>
    %616 = tpu.matmul %615, %48, %cst_138 {dimension_numbers = #tpu.dot_dimension_numbers<[1], [0], [0], [1], [0, 0, 1, 1], [], []>} : vector<2x32xf32>, vector<32x128xf32>, vector<2x128xf32> -> vector<2x128xf32>
    %cst_139 = arith.constant dense<0.000000e+00> : vector<2x128xf32>
    %617 = tpu.matmul %596, %49, %cst_139 {dimension_numbers = #tpu.dot_dimension_numbers<[1], [0], [0], [1], [0, 0, 1, 1], [], []>} : vector<2x32xf32>, vector<32x128xf32>, vector<2x128xf32> -> vector<2x128xf32>
    %618 = arith.addf %616, %617 : vector<2x128xf32>
    %619 = vector.broadcast %50 : vector<1x128xf32> to vector<2x128xf32>
    %620 = arith.addf %618, %619 : vector<2x128xf32>
    %621 = arith.negf %620 : vector<2x128xf32>
    %622 = math.exp %621 : vector<2x128xf32>
    %cst_140 = arith.constant 1.000000e+00 : f32
    %623 = vector.broadcast %cst_140 : f32 to vector<2x128xf32>
    %624 = arith.addf %623, %622 : vector<2x128xf32>
    %625 = arith.divf %623, %624 : vector<2x128xf32>
    %626 = vector.extract_strided_slice %625 {offsets = [0, 0], sizes = [2, 32], strides = [1, 1]} : vector<2x128xf32> to vector<2x32xf32>
    %627 = vector.extract_strided_slice %625 {offsets = [0, 32], sizes = [2, 32], strides = [1, 1]} : vector<2x128xf32> to vector<2x32xf32>
    %628 = vector.extract_strided_slice %625 {offsets = [0, 96], sizes = [2, 32], strides = [1, 1]} : vector<2x128xf32> to vector<2x32xf32>
    %629 = vector.extract_strided_slice %620 {offsets = [0, 64], sizes = [2, 32], strides = [1, 1]} : vector<2x128xf32> to vector<2x32xf32>
    %630 = math.tanh %629 : vector<2x32xf32>
    %631 = arith.mulf %627, %594 : vector<2x32xf32>
    %632 = arith.mulf %626, %630 : vector<2x32xf32>
    %633 = arith.addf %631, %632 : vector<2x32xf32>
    %634 = math.tanh %633 : vector<2x32xf32>
    %635 = arith.mulf %628, %634 : vector<2x32xf32>
    %c28 = arith.constant 28 : index
    %c0_141 = arith.constant 0 : index
    %636 = vector.load %arg28[%c28, %c0_141] : memref<32x32xf32, #tpu.memory_space<vmem>>, vector<2x32xf32>
    tpu.vector_store %arg28[%c28, %c0_141], %635 {strides = array<i32>} : memref<32x32xf32, #tpu.memory_space<vmem>>, vector<2x32xf32>,
    %637 = vector.extract_strided_slice %46 {offsets = [30, 0], sizes = [2, 128], strides = [1, 1]} : vector<32x128xf32> to vector<2x128xf32>
    %cst_142 = arith.constant dense<0.000000e+00> : vector<2x128xf32>
    %638 = tpu.matmul %615, %47, %cst_142 {dimension_numbers = #tpu.dot_dimension_numbers<[1], [0], [0], [1], [0, 0, 1, 1], [], []>} : vector<2x32xf32>, vector<32x128xf32>, vector<2x128xf32> -> vector<2x128xf32>
    %639 = arith.addf %637, %638 : vector<2x128xf32>
    %640 = arith.negf %639 : vector<2x128xf32>
    %641 = math.exp %640 : vector<2x128xf32>
    %cst_143 = arith.constant 1.000000e+00 : f32
    %642 = vector.broadcast %cst_143 : f32 to vector<2x128xf32>
    %643 = arith.addf %642, %641 : vector<2x128xf32>
    %644 = arith.divf %642, %643 : vector<2x128xf32>
    %645 = vector.extract_strided_slice %644 {offsets = [0, 0], sizes = [2, 32], strides = [1, 1]} : vector<2x128xf32> to vector<2x32xf32>
    %646 = vector.extract_strided_slice %644 {offsets = [0, 32], sizes = [2, 32], strides = [1, 1]} : vector<2x128xf32> to vector<2x32xf32>
    %647 = vector.extract_strided_slice %644 {offsets = [0, 96], sizes = [2, 32], strides = [1, 1]} : vector<2x128xf32> to vector<2x32xf32>
    %648 = vector.extract_strided_slice %639 {offsets = [0, 64], sizes = [2, 32], strides = [1, 1]} : vector<2x128xf32> to vector<2x32xf32>
    %649 = math.tanh %648 : vector<2x32xf32>
    %650 = arith.mulf %646, %613 : vector<2x32xf32>
    %651 = arith.mulf %645, %649 : vector<2x32xf32>
    %652 = arith.addf %650, %651 : vector<2x32xf32>
    %653 = math.tanh %652 : vector<2x32xf32>
    %654 = arith.mulf %647, %653 : vector<2x32xf32>
    %cst_144 = arith.constant dense<0.000000e+00> : vector<2x128xf32>
    %655 = tpu.matmul %654, %48, %cst_144 {dimension_numbers = #tpu.dot_dimension_numbers<[1], [0], [0], [1], [0, 0, 1, 1], [], []>} : vector<2x32xf32>, vector<32x128xf32>, vector<2x128xf32> -> vector<2x128xf32>
    %cst_145 = arith.constant dense<0.000000e+00> : vector<2x128xf32>
    %656 = tpu.matmul %635, %49, %cst_145 {dimension_numbers = #tpu.dot_dimension_numbers<[1], [0], [0], [1], [0, 0, 1, 1], [], []>} : vector<2x32xf32>, vector<32x128xf32>, vector<2x128xf32> -> vector<2x128xf32>
    %657 = arith.addf %655, %656 : vector<2x128xf32>
    %658 = vector.broadcast %50 : vector<1x128xf32> to vector<2x128xf32>
    %659 = arith.addf %657, %658 : vector<2x128xf32>
    %660 = arith.negf %659 : vector<2x128xf32>
    %661 = math.exp %660 : vector<2x128xf32>
    %cst_146 = arith.constant 1.000000e+00 : f32
    %662 = vector.broadcast %cst_146 : f32 to vector<2x128xf32>
    %663 = arith.addf %662, %661 : vector<2x128xf32>
    %664 = arith.divf %662, %663 : vector<2x128xf32>
    %665 = vector.extract_strided_slice %664 {offsets = [0, 0], sizes = [2, 32], strides = [1, 1]} : vector<2x128xf32> to vector<2x32xf32>
    %666 = vector.extract_strided_slice %664 {offsets = [0, 32], sizes = [2, 32], strides = [1, 1]} : vector<2x128xf32> to vector<2x32xf32>
    %667 = vector.extract_strided_slice %664 {offsets = [0, 96], sizes = [2, 32], strides = [1, 1]} : vector<2x128xf32> to vector<2x32xf32>
    %668 = vector.extract_strided_slice %659 {offsets = [0, 64], sizes = [2, 32], strides = [1, 1]} : vector<2x128xf32> to vector<2x32xf32>
    %669 = math.tanh %668 : vector<2x32xf32>
    %670 = arith.mulf %666, %633 : vector<2x32xf32>
    %671 = arith.mulf %665, %669 : vector<2x32xf32>
    %672 = arith.addf %670, %671 : vector<2x32xf32>
    %673 = math.tanh %672 : vector<2x32xf32>
    %674 = arith.mulf %667, %673 : vector<2x32xf32>
    %c30 = arith.constant 30 : index
    %c0_147 = arith.constant 0 : index
    %675 = vector.load %arg28[%c30, %c0_147] : memref<32x32xf32, #tpu.memory_space<vmem>>, vector<2x32xf32>
    tpu.vector_store %arg28[%c30, %c0_147], %674 {strides = array<i32>} : memref<32x32xf32, #tpu.memory_space<vmem>>, vector<2x32xf32>,
    %c0_148 = arith.constant 0 : index
    %c0_149 = arith.constant 0 : index
    %676 = vector.load %arg28[%c0_148, %c0_149] : memref<32x32xf32, #tpu.memory_space<vmem>>, vector<32x32xf32>
    %c0_150 = arith.constant 0 : index
    %c0_151 = arith.constant 0 : index
    %677 = vector.load %arg3[%c0_150, %c0_151] : memref<32x32xf32, #tpu.memory_space<vmem>>, vector<32x32xf32>
    %c0_152 = arith.constant 0 : index
    %c0_153 = arith.constant 0 : index
    %c0_154 = arith.constant 0 : index
    %678 = vector.load %arg19[%c0_152, %c0_153, %c0_154] : memref<3x32x64xf32, #tpu.memory_space<vmem>>, vector<1x32x64xf32>
    %679 = vector.shape_cast %678 : vector<1x32x64xf32> to vector<32x64xf32>
    %cst_155 = arith.constant dense<0.000000e+00> : vector<32x64xf32>
    %680 = tpu.matmul %676, %679, %cst_155 {dimension_numbers = #tpu.dot_dimension_numbers<[1], [0], [0], [1], [0, 0, 1, 1], [], []>} : vector<32x32xf32>, vector<32x64xf32>, vector<32x64xf32> -> vector<32x64xf32>
    %cst_156 = arith.constant dense<0.000000e+00> : vector<32x64xf32>
    %681 = tpu.matmul %677, %680, %cst_156 {dimension_numbers = #tpu.dot_dimension_numbers<[1], [0], [0], [1], [0, 0, 1, 1], [], []>} : vector<32x32xf32>, vector<32x64xf32>, vector<32x64xf32> -> vector<32x64xf32>
    %c1_157 = arith.constant 1 : index
    %c0_158 = arith.constant 0 : index
    %c0_159 = arith.constant 0 : index
    %682 = vector.load %arg19[%c1_157, %c0_158, %c0_159] : memref<3x32x64xf32, #tpu.memory_space<vmem>>, vector<1x32x64xf32>
    %683 = vector.shape_cast %682 : vector<1x32x64xf32> to vector<32x64xf32>
    %cst_160 = arith.constant dense<0.000000e+00> : vector<32x64xf32>
    %684 = tpu.matmul %676, %683, %cst_160 {dimension_numbers = #tpu.dot_dimension_numbers<[1], [0], [0], [1], [0, 0, 1, 1], [], []>} : vector<32x32xf32>, vector<32x64xf32>, vector<32x64xf32> -> vector<32x64xf32>
    %685 = arith.addf %681, %684 : vector<32x64xf32>
    %c0_161 = arith.constant 0 : index
    %c0_162 = arith.constant 0 : index
    %686 = vector.load %arg4[%c0_161, %c0_162] : memref<32x32xf32, #tpu.memory_space<vmem>>, vector<32x32xf32>
    %c2_163 = arith.constant 2 : index
    %c0_164 = arith.constant 0 : index
    %c0_165 = arith.constant 0 : index
    %687 = vector.load %arg19[%c2_163, %c0_164, %c0_165] : memref<3x32x64xf32, #tpu.memory_space<vmem>>, vector<1x32x64xf32>
    %688 = vector.shape_cast %687 : vector<1x32x64xf32> to vector<32x64xf32>
    %cst_166 = arith.constant dense<0.000000e+00> : vector<32x64xf32>
    %689 = tpu.matmul %676, %688, %cst_166 {dimension_numbers = #tpu.dot_dimension_numbers<[1], [0], [0], [1], [0, 0, 1, 1], [], []>} : vector<32x32xf32>, vector<32x64xf32>, vector<32x64xf32> -> vector<32x64xf32>
    %cst_167 = arith.constant dense<0.000000e+00> : vector<32x64xf32>
    %690 = tpu.matmul %686, %689, %cst_167 {dimension_numbers = #tpu.dot_dimension_numbers<[1], [0], [0], [1], [0, 0, 1, 1], [], []>} : vector<32x32xf32>, vector<32x64xf32>, vector<32x64xf32> -> vector<32x64xf32>
    %691 = arith.addf %685, %690 : vector<32x64xf32>
    %c0_168 = arith.constant 0 : index
    %c0_169 = arith.constant 0 : index
    %692 = vector.load %arg20[%c0_168, %c0_169] : memref<1x64xf32, #tpu.memory_space<vmem>>, vector<1x64xf32>
    %693 = vector.broadcast %692 : vector<1x64xf32> to vector<32x64xf32>
    %694 = arith.addf %691, %693 : vector<32x64xf32>
    %cst_170 = arith.constant 0.000000e+00 : f32
    %695 = vector.broadcast %cst_170 : f32 to vector<32x64xf32>
    %696 = arith.maximumf %694, %695 : vector<32x64xf32>
    %c0_171 = arith.constant 0 : index
    %c0_172 = arith.constant 0 : index
    %697 = vector.load %arg21[%c0_171, %c0_172] : memref<1x64xf32, #tpu.memory_space<vmem>>, vector<1x64xf32>
    %698 = vector.broadcast %697 : vector<1x64xf32> to vector<32x64xf32>
    %699 = arith.mulf %696, %698 : vector<32x64xf32>
    %c0_173 = arith.constant 0 : index
    %c0_174 = arith.constant 0 : index
    %700 = vector.load %arg22[%c0_173, %c0_174] : memref<1x64xf32, #tpu.memory_space<vmem>>, vector<1x64xf32>
    %701 = vector.broadcast %700 : vector<1x64xf32> to vector<32x64xf32>
    %702 = arith.addf %699, %701 : vector<32x64xf32>
    %cst_175 = arith.constant 0.000000e+00 : f32
    %703 = vector.broadcast %cst_175 : f32 to vector<32x64xf32>
    %704 = arith.maximumf %702, %703 : vector<32x64xf32>
    %cst_176 = arith.constant 0.000000e+00 : f32
    %705 = vector.broadcast %cst_176 : f32 to vector<2x256xf32>
    %c0_177 = arith.constant 0 : index
    %c0_178 = arith.constant 0 : index
    %706 = vector.load %arg24[%c0_177, %c0_178] : memref<1x256xf32, #tpu.memory_space<vmem>>, vector<1x256xf32>
    %707 = vector.broadcast %706 : vector<1x256xf32> to vector<2x256xf32>
    %708 = arith.addf %705, %707 : vector<2x256xf32>
    %709 = vector.extract_strided_slice %704 {offsets = [0, 0], sizes = [2, 64], strides = [1, 1]} : vector<32x64xf32> to vector<2x64xf32>
    %c0_179 = arith.constant 0 : index
    %c0_180 = arith.constant 0 : index
    %710 = vector.load %arg23[%c0_179, %c0_180] : memref<1024x256xf32, #tpu.memory_space<vmem>>, vector<64x256xf32>
    %cst_181 = arith.constant dense<0.000000e+00> : vector<2x256xf32>
    %711 = tpu.matmul %709, %710, %cst_181 {dimension_numbers = #tpu.dot_dimension_numbers<[1], [0], [0], [1], [0, 0, 1, 1], [], []>} : vector<2x64xf32>, vector<64x256xf32>, vector<2x256xf32> -> vector<2x256xf32>
    %712 = arith.addf %708, %711 : vector<2x256xf32>
    %713 = vector.extract_strided_slice %704 {offsets = [2, 0], sizes = [2, 64], strides = [1, 1]} : vector<32x64xf32> to vector<2x64xf32>
    %c64 = arith.constant 64 : index
    %c0_182 = arith.constant 0 : index
    %714 = vector.load %arg23[%c64, %c0_182] : memref<1024x256xf32, #tpu.memory_space<vmem>>, vector<64x256xf32>
    %cst_183 = arith.constant dense<0.000000e+00> : vector<2x256xf32>
    %715 = tpu.matmul %713, %714, %cst_183 {dimension_numbers = #tpu.dot_dimension_numbers<[1], [0], [0], [1], [0, 0, 1, 1], [], []>} : vector<2x64xf32>, vector<64x256xf32>, vector<2x256xf32> -> vector<2x256xf32>
    %716 = arith.addf %712, %715 : vector<2x256xf32>
    %717 = vector.extract_strided_slice %704 {offsets = [4, 0], sizes = [2, 64], strides = [1, 1]} : vector<32x64xf32> to vector<2x64xf32>
    %c128 = arith.constant 128 : index
    %c0_184 = arith.constant 0 : index
    %718 = vector.load %arg23[%c128, %c0_184] : memref<1024x256xf32, #tpu.memory_space<vmem>>, vector<64x256xf32>
    %cst_185 = arith.constant dense<0.000000e+00> : vector<2x256xf32>
    %719 = tpu.matmul %717, %718, %cst_185 {dimension_numbers = #tpu.dot_dimension_numbers<[1], [0], [0], [1], [0, 0, 1, 1], [], []>} : vector<2x64xf32>, vector<64x256xf32>, vector<2x256xf32> -> vector<2x256xf32>
    %720 = arith.addf %716, %719 : vector<2x256xf32>
    %721 = vector.extract_strided_slice %704 {offsets = [6, 0], sizes = [2, 64], strides = [1, 1]} : vector<32x64xf32> to vector<2x64xf32>
    %c192 = arith.constant 192 : index
    %c0_186 = arith.constant 0 : index
    %722 = vector.load %arg23[%c192, %c0_186] : memref<1024x256xf32, #tpu.memory_space<vmem>>, vector<64x256xf32>
    %cst_187 = arith.constant dense<0.000000e+00> : vector<2x256xf32>
    %723 = tpu.matmul %721, %722, %cst_187 {dimension_numbers = #tpu.dot_dimension_numbers<[1], [0], [0], [1], [0, 0, 1, 1], [], []>} : vector<2x64xf32>, vector<64x256xf32>, vector<2x256xf32> -> vector<2x256xf32>
    %724 = arith.addf %720, %723 : vector<2x256xf32>
    %725 = vector.extract_strided_slice %704 {offsets = [8, 0], sizes = [2, 64], strides = [1, 1]} : vector<32x64xf32> to vector<2x64xf32>
    %c256 = arith.constant 256 : index
    %c0_188 = arith.constant 0 : index
    %726 = vector.load %arg23[%c256, %c0_188] : memref<1024x256xf32, #tpu.memory_space<vmem>>, vector<64x256xf32>
    %cst_189 = arith.constant dense<0.000000e+00> : vector<2x256xf32>
    %727 = tpu.matmul %725, %726, %cst_189 {dimension_numbers = #tpu.dot_dimension_numbers<[1], [0], [0], [1], [0, 0, 1, 1], [], []>} : vector<2x64xf32>, vector<64x256xf32>, vector<2x256xf32> -> vector<2x256xf32>
    %728 = arith.addf %724, %727 : vector<2x256xf32>
    %729 = vector.extract_strided_slice %704 {offsets = [10, 0], sizes = [2, 64], strides = [1, 1]} : vector<32x64xf32> to vector<2x64xf32>
    %c320 = arith.constant 320 : index
    %c0_190 = arith.constant 0 : index
    %730 = vector.load %arg23[%c320, %c0_190] : memref<1024x256xf32, #tpu.memory_space<vmem>>, vector<64x256xf32>
    %cst_191 = arith.constant dense<0.000000e+00> : vector<2x256xf32>
    %731 = tpu.matmul %729, %730, %cst_191 {dimension_numbers = #tpu.dot_dimension_numbers<[1], [0], [0], [1], [0, 0, 1, 1], [], []>} : vector<2x64xf32>, vector<64x256xf32>, vector<2x256xf32> -> vector<2x256xf32>
    %732 = arith.addf %728, %731 : vector<2x256xf32>
    %733 = vector.extract_strided_slice %704 {offsets = [12, 0], sizes = [2, 64], strides = [1, 1]} : vector<32x64xf32> to vector<2x64xf32>
    %c384 = arith.constant 384 : index
    %c0_192 = arith.constant 0 : index
    %734 = vector.load %arg23[%c384, %c0_192] : memref<1024x256xf32, #tpu.memory_space<vmem>>, vector<64x256xf32>
    %cst_193 = arith.constant dense<0.000000e+00> : vector<2x256xf32>
    %735 = tpu.matmul %733, %734, %cst_193 {dimension_numbers = #tpu.dot_dimension_numbers<[1], [0], [0], [1], [0, 0, 1, 1], [], []>} : vector<2x64xf32>, vector<64x256xf32>, vector<2x256xf32> -> vector<2x256xf32>
    %736 = arith.addf %732, %735 : vector<2x256xf32>
    %737 = vector.extract_strided_slice %704 {offsets = [14, 0], sizes = [2, 64], strides = [1, 1]} : vector<32x64xf32> to vector<2x64xf32>
    %c448 = arith.constant 448 : index
    %c0_194 = arith.constant 0 : index
    %738 = vector.load %arg23[%c448, %c0_194] : memref<1024x256xf32, #tpu.memory_space<vmem>>, vector<64x256xf32>
    %cst_195 = arith.constant dense<0.000000e+00> : vector<2x256xf32>
    %739 = tpu.matmul %737, %738, %cst_195 {dimension_numbers = #tpu.dot_dimension_numbers<[1], [0], [0], [1], [0, 0, 1, 1], [], []>} : vector<2x64xf32>, vector<64x256xf32>, vector<2x256xf32> -> vector<2x256xf32>
    %740 = arith.addf %736, %739 : vector<2x256xf32>
    %741 = vector.extract_strided_slice %704 {offsets = [16, 0], sizes = [2, 64], strides = [1, 1]} : vector<32x64xf32> to vector<2x64xf32>
    %c512 = arith.constant 512 : index
    %c0_196 = arith.constant 0 : index
    %742 = vector.load %arg23[%c512, %c0_196] : memref<1024x256xf32, #tpu.memory_space<vmem>>, vector<64x256xf32>
    %cst_197 = arith.constant dense<0.000000e+00> : vector<2x256xf32>
    %743 = tpu.matmul %741, %742, %cst_197 {dimension_numbers = #tpu.dot_dimension_numbers<[1], [0], [0], [1], [0, 0, 1, 1], [], []>} : vector<2x64xf32>, vector<64x256xf32>, vector<2x256xf32> -> vector<2x256xf32>
    %744 = arith.addf %740, %743 : vector<2x256xf32>
    %745 = vector.extract_strided_slice %704 {offsets = [18, 0], sizes = [2, 64], strides = [1, 1]} : vector<32x64xf32> to vector<2x64xf32>
    %c576 = arith.constant 576 : index
    %c0_198 = arith.constant 0 : index
    %746 = vector.load %arg23[%c576, %c0_198] : memref<1024x256xf32, #tpu.memory_space<vmem>>, vector<64x256xf32>
    %cst_199 = arith.constant dense<0.000000e+00> : vector<2x256xf32>
    %747 = tpu.matmul %745, %746, %cst_199 {dimension_numbers = #tpu.dot_dimension_numbers<[1], [0], [0], [1], [0, 0, 1, 1], [], []>} : vector<2x64xf32>, vector<64x256xf32>, vector<2x256xf32> -> vector<2x256xf32>
    %748 = arith.addf %744, %747 : vector<2x256xf32>
    %749 = vector.extract_strided_slice %704 {offsets = [20, 0], sizes = [2, 64], strides = [1, 1]} : vector<32x64xf32> to vector<2x64xf32>
    %c640 = arith.constant 640 : index
    %c0_200 = arith.constant 0 : index
    %750 = vector.load %arg23[%c640, %c0_200] : memref<1024x256xf32, #tpu.memory_space<vmem>>, vector<64x256xf32>
    %cst_201 = arith.constant dense<0.000000e+00> : vector<2x256xf32>
    %751 = tpu.matmul %749, %750, %cst_201 {dimension_numbers = #tpu.dot_dimension_numbers<[1], [0], [0], [1], [0, 0, 1, 1], [], []>} : vector<2x64xf32>, vector<64x256xf32>, vector<2x256xf32> -> vector<2x256xf32>
    %752 = arith.addf %748, %751 : vector<2x256xf32>
    %753 = vector.extract_strided_slice %704 {offsets = [22, 0], sizes = [2, 64], strides = [1, 1]} : vector<32x64xf32> to vector<2x64xf32>
    %c704 = arith.constant 704 : index
    %c0_202 = arith.constant 0 : index
    %754 = vector.load %arg23[%c704, %c0_202] : memref<1024x256xf32, #tpu.memory_space<vmem>>, vector<64x256xf32>
    %cst_203 = arith.constant dense<0.000000e+00> : vector<2x256xf32>
    %755 = tpu.matmul %753, %754, %cst_203 {dimension_numbers = #tpu.dot_dimension_numbers<[1], [0], [0], [1], [0, 0, 1, 1], [], []>} : vector<2x64xf32>, vector<64x256xf32>, vector<2x256xf32> -> vector<2x256xf32>
    %756 = arith.addf %752, %755 : vector<2x256xf32>
    %757 = vector.extract_strided_slice %704 {offsets = [24, 0], sizes = [2, 64], strides = [1, 1]} : vector<32x64xf32> to vector<2x64xf32>
    %c768 = arith.constant 768 : index
    %c0_204 = arith.constant 0 : index
    %758 = vector.load %arg23[%c768, %c0_204] : memref<1024x256xf32, #tpu.memory_space<vmem>>, vector<64x256xf32>
    %cst_205 = arith.constant dense<0.000000e+00> : vector<2x256xf32>
    %759 = tpu.matmul %757, %758, %cst_205 {dimension_numbers = #tpu.dot_dimension_numbers<[1], [0], [0], [1], [0, 0, 1, 1], [], []>} : vector<2x64xf32>, vector<64x256xf32>, vector<2x256xf32> -> vector<2x256xf32>
    %760 = arith.addf %756, %759 : vector<2x256xf32>
    %761 = vector.extract_strided_slice %704 {offsets = [26, 0], sizes = [2, 64], strides = [1, 1]} : vector<32x64xf32> to vector<2x64xf32>
    %c832 = arith.constant 832 : index
    %c0_206 = arith.constant 0 : index
    %762 = vector.load %arg23[%c832, %c0_206] : memref<1024x256xf32, #tpu.memory_space<vmem>>, vector<64x256xf32>
    %cst_207 = arith.constant dense<0.000000e+00> : vector<2x256xf32>
    %763 = tpu.matmul %761, %762, %cst_207 {dimension_numbers = #tpu.dot_dimension_numbers<[1], [0], [0], [1], [0, 0, 1, 1], [], []>} : vector<2x64xf32>, vector<64x256xf32>, vector<2x256xf32> -> vector<2x256xf32>
    %764 = arith.addf %760, %763 : vector<2x256xf32>
    %765 = vector.extract_strided_slice %704 {offsets = [28, 0], sizes = [2, 64], strides = [1, 1]} : vector<32x64xf32> to vector<2x64xf32>
    %c896 = arith.constant 896 : index
    %c0_208 = arith.constant 0 : index
    %766 = vector.load %arg23[%c896, %c0_208] : memref<1024x256xf32, #tpu.memory_space<vmem>>, vector<64x256xf32>
    %cst_209 = arith.constant dense<0.000000e+00> : vector<2x256xf32>
    %767 = tpu.matmul %765, %766, %cst_209 {dimension_numbers = #tpu.dot_dimension_numbers<[1], [0], [0], [1], [0, 0, 1, 1], [], []>} : vector<2x64xf32>, vector<64x256xf32>, vector<2x256xf32> -> vector<2x256xf32>
    %768 = arith.addf %764, %767 : vector<2x256xf32>
    %769 = vector.extract_strided_slice %704 {offsets = [30, 0], sizes = [2, 64], strides = [1, 1]} : vector<32x64xf32> to vector<2x64xf32>
    %c960 = arith.constant 960 : index
    %c0_210 = arith.constant 0 : index
    %770 = vector.load %arg23[%c960, %c0_210] : memref<1024x256xf32, #tpu.memory_space<vmem>>, vector<64x256xf32>
    %cst_211 = arith.constant dense<0.000000e+00> : vector<2x256xf32>
    %771 = tpu.matmul %769, %770, %cst_211 {dimension_numbers = #tpu.dot_dimension_numbers<[1], [0], [0], [1], [0, 0, 1, 1], [], []>} : vector<2x64xf32>, vector<64x256xf32>, vector<2x256xf32> -> vector<2x256xf32>
    %772 = arith.addf %768, %771 : vector<2x256xf32>
    %cst_212 = arith.constant 0.000000e+00 : f32
    %773 = vector.broadcast %cst_212 : f32 to vector<2x256xf32>
    %774 = arith.maximumf %772, %773 : vector<2x256xf32>
    %c0_213 = arith.constant 0 : index
    %c0_214 = arith.constant 0 : index
    %775 = vector.load %arg25[%c0_213, %c0_214] : memref<256x4xf32, #tpu.memory_space<vmem>>, vector<256x4xf32>
    %cst_215 = arith.constant dense<0.000000e+00> : vector<2x4xf32>
    %776 = tpu.matmul %774, %775, %cst_215 {dimension_numbers = #tpu.dot_dimension_numbers<[1], [0], [0], [1], [0, 0, 1, 1], [], []>} : vector<2x256xf32>, vector<256x4xf32>, vector<2x4xf32> -> vector<2x4xf32>
    %c0_216 = arith.constant 0 : index
    %c0_217 = arith.constant 0 : index
    %777 = vector.load %arg26[%c0_216, %c0_217] : memref<1x4xf32, #tpu.memory_space<vmem>>, vector<1x4xf32>
    %778 = vector.broadcast %777 : vector<1x4xf32> to vector<2x4xf32>
    %779 = arith.addf %776, %778 : vector<2x4xf32>
    %cst_218 = arith.constant dense<0xFF800000> : vector<2xf32>
    %780 = vector.multi_reduction <maximumf>, %779, %cst_218 [1] : vector<2x4xf32> to vector<2xf32>
    %781 = vector.shape_cast %780 : vector<2xf32> to vector<2x1xf32>
    %782 = vector.broadcast %781 : vector<2x1xf32> to vector<2x4xf32>
    %783 = arith.subf %779, %782 : vector<2x4xf32>
    %784 = math.exp %783 : vector<2x4xf32>
    %cst_219 = arith.constant dense<0.000000e+00> : vector<2xf32>
    %785 = vector.multi_reduction <add>, %784, %cst_219 [1] : vector<2x4xf32> to vector<2xf32>
    %786 = vector.shape_cast %785 : vector<2xf32> to vector<2x1xf32>
    %787 = tpu.reciprocal %786 {approx = true} : vector<2x1xf32> -> vector<2x1xf32>
    %788 = vector.broadcast %787 : vector<2x1xf32> to vector<2x4xf32>
    %789 = arith.mulf %784, %788 : vector<2x4xf32>
    %c0_220 = arith.constant 0 : index
    %c0_221 = arith.constant 0 : index
    %790 = vector.load %arg27[%c0_220, %c0_221] : memref<2x4xf32, #tpu.memory_space<vmem>>, vector<2x4xf32>
    tpu.vector_store %arg27[%c0_220, %c0_221], %789 {strides = array<i32>} : memref<2x4xf32, #tpu.memory_space<vmem>>, vector<2x4xf32>,
    return
  }
}

</mosaic_0001>

<bundles_post_ra>
// kernel: concatenated_nn_forward.1
= control target key start
LH: loop header
LB: loop body
LE: loop exit
PB: predicated region body
PF: predicated region fallthrough
CT: control target
= control target key end

     0   :  { %s11953_s0 = inlined_call_operand.vmem [shape: f32[2,38], index: 0, kind: input, shape index: {}]   ;;  %s11954_s1 = inlined_call_operand.vmem [shape: f32[16,16], index: 1, kind: input, shape index: {}]   ;;  %s11955_s2 = inlined_call_operand.vmem [shape: f32[16,16], index: 2, kind: input, shape index: {}]   ;;  %s11956_s3 = inlined_call_operand.vmem [shape: f32[32,32], index: 3, kind: input, shape index: {}]   ;;  %s11957_s4 = inlined_call_operand.vmem [shape: f32[32,32], index: 4, kind: input, shape index: {}]   ;;  %s11958_s5 = inlined_call_operand.vmem [shape: f32[38,16], index: 5, kind: input, shape index: {}]   ;;  %s11959_s6 = inlined_call_operand.vmem [shape: f32[1,16], index: 6, kind: input, shape index: {}]   ;;  %s11960_s7 = inlined_call_operand.vmem [shape: f32[16,6], index: 7, kind: input, shape index: {}]   ;;  %s11961_s8 = inlined_call_operand.vmem [shape: f32[16,1], index: 8, kind: input, shape index: {}]   ;;  %s11962_s9 = inlined_call_operand.vmem [shape: f32[3,32,16], index: 9, kind: input, shape index: {}]   ;;  %s11963_s10 = inlined_call_operand.vmem [shape: f32[32,1], index: 10, kind: input, shape index: {}]   ;;  %s11964_s11 = inlined_call_operand.vmem [shape: f32[32,1], index: 11, kind: input, shape index: {}]   ;;  %s11965_s12 = inlined_call_operand.vmem [shape: f32[32,1], index: 12, kind: input, shape index: {}]   ;;  %s11966_s13 = inlined_call_operand.hbm [shape: f32[16,128], index: 13, kind: input, shape index: {}]   ;;  %s11967_s14 = inlined_call_operand.vmem [shape: f32[32,128], index: 14, kind: input, shape index: {}]   ;;  %s11968_s15 = inlined_call_operand.hbm [shape: f32[1,128], index: 15, kind: input, shape index: {}]   ;;  %s11969_s16 = inlined_call_operand.vmem [shape: f32[32,128], index: 16, kind: input, shape index: {}]   ;;  %s11970_s17 = inlined_call_operand.vmem [shape: f32[32,128], index: 17, kind: input, shape index: {}]   ;;  %s11971_s18 = inlined_call_operand.hbm [shape: f32[1,128], index: 18, kind: input, shape index: {}]   ;;  %s11972_s19 = inlined_call_operand.vmem [shape: f32[3,32,64], index: 19, kind: input, shape index: {}]   ;;  %s11973_s20 = inlined_call_operand.hbm [shape: f32[1,64], index: 20, kind: input, shape index: {}]   ;;  %s11974_s21 = inlined_call_operand.hbm [shape: f32[1,64], index: 21, kind: input, shape index: {}]   ;;  %s11975_s22 = inlined_call_operand.hbm [shape: f32[1,64], index: 22, kind: input, shape index: {}]   ;;  %s11976_s23 = inlined_call_operand.vmem [shape: f32[1024,256], index: 23, kind: input, shape index: {}]   ;;  %s11977_s24 = inlined_call_operand.hbm [shape: f32[1,256], index: 24, kind: input, shape index: {}]   ;;  %s11978_s25 = inlined_call_operand.vmem [shape: f32[256,4], index: 25, kind: input, shape index: {}]   ;;  %s11979_s26 = inlined_call_operand.hbm [shape: f32[1,4], index: 26, kind: input, shape index: {}]   ;;  %s11980_s27 = inlined_call_operand.hbm [shape: f32[2,4], index: 27, kind: output, shape index: {}]  }
   0x1   :  { %11991 = sst [smem:[#allocation24_spill]] %s11953_s0 }
   0x2   :  { %11992 = sst [smem:[#allocation25_spill]] %s11954_s1 }
   0x3   :  { %11993 = sst [smem:[#allocation26_spill]] %s11955_s2 }
   0x4   :  { %11994 = sst [smem:[#allocation27_spill]] %s11956_s3 }
   0x5   :  { %11995 = sst [smem:[#allocation28_spill]] %s11957_s4 }
   0x6   :  { %11996 = sst [smem:[#allocation29_spill]] %s11958_s5 }
   0x7   :  { %11997 = sst [smem:[#allocation30_spill]] %s11959_s6 }
   0x8   :  { %11998 = sst [smem:[#allocation31_spill]] %s11960_s7 }
   0x9   :  { %11999 = sst [smem:[#allocation32_spill]] %s11961_s8 }
   0xa   :  { %12000 = sst [smem:[#allocation33_spill]] %s11962_s9 }
   0xb   :  { %12001 = sst [smem:[#allocation34_spill]] %s11963_s10 }
   0xc   :  { %12002 = sst [smem:[#allocation35_spill]] %s11964_s11 }
   0xd   :  { %32 = vsyncpa [#allocation4], 0 }
   0xe   :  { %33 = vsyncpa [#allocation7], 0 }
   0xf   :  { %34 = vsyncpa [#allocation10], 0 }
  0x10   :  { %35 = vsyncpa [#allocation13], 0 }
  0x11   :  { %36 = vsyncpa [#allocation16], 0 }
  0x12   :  { %37 = vsyncpa [#allocation5], 0  ;;  %s9526_s7 = smov [#allocation6]   ;;  %s9527_s8 = smov [#allocation9]  }
  0x13   :  { %s84_s4 = sshll.u32 %s9526_s7, 4  ;;  %s110_s30 = sshll.u32 %s9527_s8, 4  ;;  %s85_s4 = int_to_ptr.vmem [resolvable:$true] %s84_s4  ;;  %s111_s30 = int_to_ptr.vmem [resolvable:$true] %s110_s30 }
  0x14   :  { %s9342_s9 = scalar_lea.vmem %s85_s4, 16  ;;  %s9346_s5 = scalar_lea.vmem %s85_s4, 32 }
  0x15   :  { %p9343_p0 = scmp.ne.s32.totalorder %s85_s4, %s9342_s9  ;;  %p9347_p1 = scmp.lt.s32.totalorder %s85_s4, %s85_s4 }
  0x16   :  { %p9348_p2 = scmp.lt.s32.totalorder %s9346_s5, %s9342_s9 }
  0x18   :  { %p9349_p3 = por %p9348_p2, %p9347_p1 }
  0x1a   :  { %p9350_p4 = pnand %p9349_p3, %p9343_p0 }
  0x1c   :  { %9353 = shalt.err (!%p9350_p4)
}
  0x1d   :  { %87 = dma.hbm_to_vmem [thread:$0]  %s11968_s15, 16, %s85_s4, [#allocation7]  }
  0x1e   :  { %s9362_s10 = scalar_lea.vmem %s111_s30, 16  ;;  %s9366_s29 = scalar_lea.vmem %s111_s30, 32 }
  0x1f   :  { %p9363_p5 = scmp.ne.s32.totalorder %s111_s30, %s9362_s10  ;;  %p9367_p6 = scmp.lt.s32.totalorder %s111_s30, %s111_s30 }
  0x20   :  { %p9368_p7 = scmp.lt.s32.totalorder %s9366_s29, %s9362_s10 }
  0x22   :  { %p9369_p8 = por %p9368_p7, %p9367_p6 }
  0x24   :  { %p9370_p9 = pnand %p9369_p8, %p9363_p5 }
  0x26   :  { %9373 = shalt.err (!%p9370_p9)
}
  0x27   :  { %113 = dma.hbm_to_vmem [thread:$0]  %s11973_s20, 16, %s111_s30, [#allocation10]  }
  0x28   :  { %s9528_s11 = smov [#allocation12]   ;;  %s9529_s3 = smov [#allocation3]  }
  0x29   :  { %s130_s2 = sshll.u32 %s9528_s11, 4  ;;  %s69_s7 = sshll.u32 %s9529_s3, 4  ;;  %s131_s2 = int_to_ptr.vmem [resolvable:$true] %s130_s2  ;;  %s70_s7 = int_to_ptr.vmem [resolvable:$true] %s69_s7 }
  0x2a   :  { %s9382_s8 = scalar_lea.vmem %s131_s2, 16  ;;  %s9386_s15 = scalar_lea.vmem %s131_s2, 32 }
  0x2b   :  { %p9383_p10 = scmp.ne.s32.totalorder %s131_s2, %s9382_s8  ;;  %p9387_p11 = scmp.lt.s32.totalorder %s131_s2, %s131_s2 }
  0x2c   :  { %p9388_p12 = scmp.lt.s32.totalorder %s9386_s15, %s9382_s8 }
  0x2e   :  { %p9389_p13 = por %p9388_p12, %p9387_p11 }
  0x30   :  { %p9390_p0 = pnand %p9389_p13, %p9383_p10 }
  0x32   :  { %9393 = shalt.err (!%p9390_p0)
}
  0x33   :  { %133 = dma.hbm_to_vmem [thread:$0]  %s11975_s22, 16, %s131_s2, [#allocation13]  }
  0x34   :  { %s9402_s5 = scalar_lea.vmem %s70_s7, 256  ;;  %p9407_p2 = scmp.lt.s32.totalorder %s70_s7, %s70_s7 }
  0x35   :  { %p9403_p1 = scmp.ne.s32.totalorder %s70_s7, %s9402_s5  ;;  %p9408_p3 = scmp.lt.s32.totalorder %s9402_s5, %s9402_s5 }
  0x37   :  { %p9409_p4 = por %p9408_p3, %p9407_p2 }
  0x39   :  { %p9410_p5 = pnand %p9409_p4, %p9403_p1 }
  0x3b   :  { %9413 = shalt.err (!%p9410_p5)
}
  0x3c   :  { %s9530_s20 = smov 128   ;;  %s9531_s30 = smov 8  }
  0x3d   :  { %75 = dma.hbm_to_vmem [thread:$0]  %s11966_s13, 256, %s70_s7, [#allocation4], %s9530_s20, %s9530_s20, %s9531_s30  }
  0x3e   :  { %s9532_s10 = smov [#allocation8]   ;;  %s9533_s1 = smov [#allocation11]  }
  0x3f   :  { %s98_s29 = sshll.u32 %s9532_s10, 4  ;;  %s120_s6 = sshll.u32 %s9533_s1, 4  ;;  %s99_s29 = int_to_ptr.vmem [resolvable:$true] %s98_s29  ;;  %s121_s6 = int_to_ptr.vmem [resolvable:$true] %s120_s6 }
  0x40   :  { %s9422_s22 = scalar_lea.vmem %s99_s29, 16  ;;  %s9426_s11 = scalar_lea.vmem %s99_s29, 32 }
  0x41   :  { %p9423_p6 = scmp.ne.s32.totalorder %s99_s29, %s9422_s22  ;;  %p9427_p7 = scmp.lt.s32.totalorder %s99_s29, %s99_s29 }
  0x42   :  { %p9428_p8 = scmp.lt.s32.totalorder %s9426_s11, %s9422_s22 }
  0x44   :  { %p9429_p9 = por %p9428_p8, %p9427_p7 }
  0x46   :  { %p9430_p10 = pnand %p9429_p9, %p9423_p6 }
  0x48   :  { %9433 = shalt.err (!%p9430_p10)
}
  0x49   :  { %101 = dma.hbm_to_vmem [thread:$0]  %s11971_s18, 16, %s99_s29, [#allocation7]  }
  0x4a   :  { %s9442_s8 = scalar_lea.vmem %s121_s6, 16  ;;  %s9446_s13 = scalar_lea.vmem %s121_s6, 32 }
  0x4b   :  { %p9443_p11 = scmp.ne.s32.totalorder %s121_s6, %s9442_s8  ;;  %p9447_p12 = scmp.lt.s32.totalorder %s121_s6, %s121_s6 }
  0x4c   :  { %p9448_p13 = scmp.lt.s32.totalorder %s9446_s13, %s9442_s8 }
  0x4e   :  { %p9449_p0 = por %p9448_p13, %p9447_p12 }
  0x50   :  { %p9450_p1 = pnand %p9449_p0, %p9443_p11 }
  0x52   :  { %9453 = shalt.err (!%p9450_p1)
}
  0x53   :  { %123 = dma.hbm_to_vmem [thread:$0]  %s11974_s21, 16, %s121_s6, [#allocation10]  }
  0x54   :  { %s9534_s4 = smov [#allocation14]   ;;  %s9535_s5 = smov [#allocation15]  }
  0x55   :  { %s142_s9 = sshll.u32 %s9534_s4, 4  ;;  %s154_s20 = sshll.u32 %s9535_s5, 4  ;;  %s143_s9 = int_to_ptr.vmem [resolvable:$true] %s142_s9  ;;  %s155_s20 = int_to_ptr.vmem [resolvable:$true] %s154_s20 }
  0x56   :  { %s9462_s30 = scalar_lea.vmem %s143_s9, 32  ;;  %p9467_p3 = scmp.lt.s32.totalorder %s143_s9, %s143_s9 }
  0x57   :  { %p9463_p2 = scmp.ne.s32.totalorder %s143_s9, %s9462_s30  ;;  %p9468_p4 = scmp.lt.s32.totalorder %s9462_s30, %s9462_s30 }
  0x59   :  { %p9469_p5 = por %p9468_p4, %p9467_p3 }
  0x5b   :  { %p9470_p6 = pnand %p9469_p5, %p9463_p2 }
  0x5d   :  { %9473 = shalt.err (!%p9470_p6)
}
  0x5e   :  { %145 = dma.hbm_to_vmem [thread:$0]  %s11977_s24, 32, %s143_s9, [#allocation13]  }
  0x5f   :  { %s9482_s0 = scalar_lea.vmem %s155_s20, 16  ;;  %s9486_s21 = scalar_lea.vmem %s155_s20, 32 }
  0x60   :  { %p9483_p7 = scmp.ne.s32.totalorder %s155_s20, %s9482_s0  ;;  %p9487_p8 = scmp.lt.s32.totalorder %s155_s20, %s155_s20 }
  0x61   :  { %p9488_p9 = scmp.lt.s32.totalorder %s9486_s21, %s9482_s0 }
  0x63   :  { %p9489_p10 = por %p9488_p9, %p9487_p8 }
  0x65   :  { %p9490_p11 = pnand %p9489_p10, %p9483_p7 }
  0x67   :  { %9493 = shalt.err (!%p9490_p11)
}
  0x68   :  { %157 = dma.hbm_to_vmem [thread:$0]  %s11979_s26, 16, %s155_s20, [#allocation16]  }
  0x69   :  { %9514 = dma.done.wait [#allocation4], 256  }
  0x6a   :  { %9515 = vsyncadd [#allocation4], 4294967040 }
  0x6b   :  { %9516 = dma.done.wait [#allocation7], 32  }
  0x6c   :  { %9517 = vsyncadd [#allocation7], 4294967264 }
  0x6d   :  { %9518 = dma.done.wait [#allocation10], 32  }
  0x6e   :  { %9519 = vsyncadd [#allocation10], 4294967264 }
  0x6f   :  { %9520 = dma.done.wait [#allocation13], 48  }
  0x70   :  { %9521 = vsyncadd [#allocation13], 4294967248 }
  0x71   :  { %9522 = dma.done.wait [#allocation16], 16  }
  0x72   :  { %9523 = vsyncadd [#allocation16], 4294967280  ;;  %v9536_v0 = vmov 0.0   ;;  %vm9537_vm0 = vmmov 0   ;;  %vm199_vm1 = vcmask 1045504   ;;  %s12003_s1 = sld [smem:[#allocation29_spill]] }
  0x73   :  { %8345 = vmatprep.subr.mxu0 %v9536_v0  ;;  %8355 = vmatprep.mubr.msk.f32.mxu0 %vm9537_vm0, %v9536_v0  ;;  %s12004_s9 = sld [smem:[#allocation24_spill]]  ;;  %vm195_vm2 = vcmask 310272   ;;  %vm277_vm3 = vcmask 130048   ;;  %vm444_vm4 = vcmask 48128   ;;  %v9538_v17 = vmov 0   ;;  %v1056_v20 = vld [vmem:[%s11965_s12] sm:$0xff] }
  0x74   :  { %8358 = vmatprep.subr.mxu1 %v9536_v0  ;;  %8362 = vmatprep.mubr.msk.f32.mxu1 %vm9537_vm0, %v9536_v0  ;;  %s12005_s30 = sld [smem:[#allocation25_spill]]  ;;  %vm426_vm5 = vcmask 1041408   ;;  %vm428_vm6 = vcmask 1043456   ;;  %v1057_v46 = vld [vmem:[%s11965_s12 + $0x8] sm:$0xff]  ;;  %v9851_v62 = vld [vmem:[%s11967_s14 + $0x18] sm:$0xff]  ;;  %s9539_s28 = smov 64  }
  0x75   :  { %s12006_s10 = sld [smem:[#allocation30_spill]]  ;;  %9045 = vset.pattern.permute.xlu0 %v9538_v17  ;;  %9046 = vset.pattern.permute.xlu1 %v9538_v17  ;;  %v1085_v63 = vld [vmem:[#allocation3 + $0x8] sm:$0xff]  ;;  %s9540_s0 = smov 32   ;;  %vm1203_vm7 = vcmask 261120   ;;  %vm1482_vm8 = vcmask 254976   ;;  %vm6219_vm9 = vcmask 523264  }
  0x76   :  { %s12007_s26 = sld [smem:[#allocation26_spill]]  ;;  %vm7787_vm10 = vcmask 25600  }
  0x77   :  { %s12008_s2 = sld [smem:[#allocation31_spill]] }
  0x78   :  { %v187_v1 = vld [vmem:[%s12003_s1 + $0x20] sm:$0x3f]  ;;  %v186_v2 = vld [vmem:[%s12003_s1 + $0x18] sm:$0xff]  ;;  %v185_v3 = vld [vmem:[%s12003_s1 + $0x10] sm:$0xff]  ;;  %s12009_s13 = sld [smem:[#allocation32_spill]] }
  0x79   :  { %8346 = vmatpush3.msk.msra.mxu0 %vm199_vm1, %v187_v1  ;;  %v184_v4 = vld [vmem:[%s12003_s1 + $0x8] sm:$0xff]  ;;  %v183_v5 = vld [vmem:[%s12003_s1] sm:$0xff]  ;;  %s12010_s5 = sld [smem:[#allocation35_spill]] }
  0x7a   :  { %8347 = vmatprep.subr.mxu0 %v9536_v0  ;;  %v182_v6 = vld [vmem:[%s12004_s9] sm:$0x3]  ;;  %v274_v7 = vld [vmem:[%s12005_s30 + $0x8] sm:$0xff] }
  0x7b   :  { %8348 = vmatpush3.msra.mxu0 %v186_v2  ;;  %8359 = vmatpush3.msra.mxu1 %v274_v7  ;;  %v273_v8 = vld [vmem:[%s12005_s30] sm:$0xff]  ;;  %v9858_v2 = vld [vmem:[%s11967_s14 + $0x10] sm:$0xff] }
  0x7c   :  { %8349 = vmatprep.subr.mxu0 %v9536_v0  ;;  %8360 = vmatprep.subr.mxu1 %v9536_v0  ;;  %v7819_v9 = vld [vmem:[%s12006_s10] ss:$0 sm:$0xff]  ;;  %v276_v12 = vld [vmem:[%s12007_s26 + $0x8] sm:$0xff]  ;;  %s12011_s10 = sld [smem:[#allocation33_spill]] }
  0x7d   :  { %8350 = vmatpush3.msra.mxu0 %v185_v3  ;;  %8361 = vmatpush3.msra.mxu1 %v273_v8  ;;  %v275_v14 = vld [vmem:[%s12007_s26] sm:$0xff]  ;;  %v431_v29 = vld [vmem:[%s12008_s2 + $0x8] sm:$0xff] }
  0x7e   :  { %8351 = vmatprep.subr.mxu0 %v9536_v0  ;;  %8365 = vmatprep.subr.mxu1 %v9536_v0  ;;  %v430_v15 = vld [vmem:[%s12008_s2] sm:$0xff]  ;;  %v433_v18 = vld [vmem:[%s12009_s13 + $0x8] sm:$0xff] }
  0x7f   :  { %8352 = vmatpush3.msra.mxu0 %v184_v4  ;;  %v432_v16 = vld [vmem:[%s12009_s13] sm:$0xff]  ;;  %s12012_s13 = sld [smem:[#allocation34_spill]]  ;;  %v1029_v45 = vld [vmem:[%s12010_s5 + $0x8] sm:$0xff] }
  0x80   :  { %8353 = vmatprep.subr.mxu0 %v9536_v0  ;;  %436 = vperm.xlu0 %9045, %v432_v16   ;;  %v1028_v19 = vld [vmem:[%s12010_s5] sm:$0xff]  ;;  %v9865_v3 = vld [vmem:[%s11967_s14 + $0x8] sm:$0xff] }
  0x81   :  { %8354 = vmatpush3.msra.mxu0 %v183_v5  ;;  %v1084_v1 = vld [vmem:[#allocation3] sm:$0xff] }
  0x82   :  { %8356 = vmatmul.mubr.msk.f32.vlgmr.msra.gmra.mxu0 %vm195_vm2, %v182_v6  ;;  %v7829_v38 = vld [vmem:[%s12011_s10 + $0x20] sm:$0xff]  ;;  %v7830_v39 = vld [vmem:[%s12011_s10 + $0x28] sm:$0xff]  ;;  %v7831_v40 = vld [vmem:[%s12011_s10 + $0x30] sm:$0xff] }
  0x83   :  { %v7832_v41 = vld [vmem:[%s12011_s10 + $0x38] sm:$0xff]  ;;  %v531_v42 = vld [vmem:[%s12011_s10] sm:$0xff]  ;;  %v532_v49 = vld [vmem:[%s12011_s10 + $0x8] sm:$0xff] }
  0x84   :  { %441 = vperm.xlu0 %9045, %v433_v18   ;;  %8398 = vmatprep.mubr.msk.f32.mxu0 %vm277_vm3, %v531_v42  ;;  %v533_v50 = vld [vmem:[%s12011_s10 + $0x10] sm:$0xff]  ;;  %v534_v53 = vld [vmem:[%s12011_s10 + $0x18] sm:$0xff]  ;;  %v7841_v54 = vld [vmem:[%s12011_s10 + $0x40] sm:$0xff] }
  0x85   :  { %v996_v43 = vld [vmem:[%s12012_s13] sm:$0xff]  ;;  %v997_v44 = vld [vmem:[%s12012_s13 + $0x8] sm:$0xff]  ;;  %v7843_v60 = vld [vmem:[%s12011_s10 + $0x50] sm:$0xff] }
  0x86   :  { %1002 = vperm.xlu1 %9046, %v996_v43   ;;  %v7842_v59 = vld [vmem:[%s12011_s10 + $0x48] sm:$0xff]  ;;  %v7844_v61 = vld [vmem:[%s12011_s10 + $0x58] sm:$0xff]  ;;  %v9871_v4 = vld [vmem:[%s11967_s14] sm:$0xff] }
  0x88   :  { %1034 = vperm.xlu0 %9045, %v1028_v19  }
  0x8a   :  { %1007 = vperm.xlu1 %9046, %v997_v44  }
  0x8c   :  { %1062 = vperm.xlu0 %9045, %v1056_v20  }
  0x8e   :  { %1039 = vperm.xlu1 %9046, %v1029_v45  }
  0x92   :  { %1067 = vperm.xlu1 %9046, %v1057_v46  }
  0xfb   :  { %v437_v30 = vpop.permute.xlu0 %436 }
  0xff   :  { %v442_v31 = vpop.permute.xlu0 %441 }
 0x103   :  { %v1035_v19 = vpop.permute.xlu0 %1034 }
 0x142   :  { %v269_v10 = vpop.f32.mrf.mxu0 }
 0x143   :  { %v270_v11 = vadd.f32 %v7819_v9, %v269_v10 }
 0x144   :  { %v8357_v13 = vpop.f32.mrf.mxu0 }
 0x145   :  { %8363 = vmatmul.mubr.msk.f32.vlgmr.msra.gmra.mxu1 %vm277_vm3, %v270_v11  ;;  %v421_v23 = vrot.slane %v270_v11, 6 }
 0x146   :  { %8366 = vmatpush3.msra.mxu1 %v276_v12  ;;  %8369 = vmatprep.mubr.msk.f32.mxu1 %vm9537_vm0, %v9536_v0 }
 0x147   :  { %8367 = vmatprep.subr.mxu1 %v9536_v0 }
 0x148   :  { %8368 = vmatpush3.msra.mxu1 %v275_v14 }
 0x149   :  { %8370 = vmatmul.mubr.msk.f32.vlgmr.msra.gmra.mxu1 %vm277_vm3, %v270_v11 }
 0x14a   :  { %8374 = vmatprep.mubr.msk.f32.mxu1 %vm444_vm4, %v430_v15 }
 0x205   :  { %v347_v21 = vpop.f32.mrf.mxu1 }
 0x206   :  { %v427_v26 = vsel %vm426_vm5, %v347_v21, %v421_v23 }
 0x207   :  { %v8364_v22 = vpop.f32.mrf.mxu1 }
 0x209   :  { %v417_v24 = vpop.f32.mrf.mxu1 }
 0x20a   :  { %v424_v25 = vrot.slane %v417_v24, 4 }
 0x20b   :  { %v8371_v27 = vpop.f32.mrf.mxu1 }
 0x20c   :  { %v429_v28 = vsel %vm428_vm6, %v427_v26, %v424_v25 }
 0x20d   :  { %8372 = vmatprep.subr.msk.mxu1 %vm199_vm1, %v429_v28 }
 0x20e   :  { %8373 = vmatpush3.msk.msra.mxu1 %vm199_vm1, %v429_v28  ;;  %v1063_v28 = vpop.permute.xlu0 %1062 }
 0x20f   :  { %8375 = vmatmul.mubr.msk.f32.vlgmr.msra.gmra.mxu1 %vm444_vm4, %v431_v29  ;;  %8377 = vmatprep.subr.mxu1 %v274_v7 }
 0x210   :  { %8378 = vmatpush3.msra.mxu1 %v274_v7  ;;  %v1003_v7 = vpop.permute.xlu1 %1002 }
 0x211   :  { %8379 = vmatprep.subr.mxu1 %v273_v8 }
 0x212   :  { %8380 = vmatpush3.msra.mxu1 %v273_v8 }
 0x214   :  { %v1008_v11 = vpop.permute.xlu1 %1007 }
 0x218   :  { %v1040_v21 = vpop.permute.xlu1 %1039 }
 0x2cf   :  { %v8376_v32 = vpop.f32.mrf.mxu1 }
 0x2d0   :  { %v526_v33 = vadd.f32 %v8376_v32, %v442_v31 }
 0x2d1   :  { %v520_v34 = vpop.f32.mrf.mxu1 }
 0x2d2   :  { %v530_v35 = vmax.f32 %v526_v33, 0.0  ;;  %v521_v36 = vadd.f32 %v520_v34, %v437_v30  ;;  %v1068_v30 = vpop.permute.xlu1 %1067 }
 0x2d4   :  { %v529_v37 = vmax.f32 %v521_v36, 0.0  ;;  %8384 = vmatprep.subr.mxu1 %v530_v35  ;;  %v9886_v36 = vld [vmem:[#allocation6] ss:$0 sm:$0xff] }
 0x2d6   :  { %8381 = vmatprep.mubr.msk.f32.mxu1 %vm277_vm3, %v529_v37 }
 0x2d7   :  { %8382 = vmatmul.mubr.msk.f32.vlgmr.msra.gmra.mxu1 %vm277_vm3, %v530_v35 }
 0x2d8   :  { %8385 = vmatpush3.msra.mxu1 %v530_v35  ;;  %8388 = vmatprep.mubr.msk.f32.mxu1 %vm277_vm3, %v7829_v38 }
 0x2d9   :  { %8386 = vmatprep.subr.mxu1 %v529_v37 }
 0x2da   :  { %8387 = vmatpush3.msra.mxu1 %v529_v37 }
 0x2db   :  { %8389 = vmatmul.mubr.msk.f32.vlgmr.msra.gmra.mxu1 %vm277_vm3, %v7830_v39  ;;  %8404 = vmatprep.subr.mxu1 %v276_v12 }
 0x2dc   :  { %8391 = vmatprep.mubr.msk.f32.mxu1 %vm277_vm3, %v7831_v40  ;;  %8405 = vmatpush3.msra.mxu1 %v276_v12 }
 0x2dd   :  { %8406 = vmatprep.subr.mxu1 %v275_v14 }
 0x2de   :  { %8407 = vmatpush3.msra.mxu1 %v275_v14 }
 0x2df   :  { %8392 = vmatmul.mubr.msk.f32.gmra.mxu1 %vm277_vm3, %v7832_v41  ;;  %8421 = vmatprep.subr.mxu1 %v1085_v63 }
 0x2e0   :  { %8408 = vmatprep.mubr.msk.f32.mxu1 %vm277_vm3, %v529_v37 }
 0x2e3   :  { %8409 = vmatmul.mubr.msk.f32.vlgmr.msra.gmra.mxu1 %vm277_vm3, %v530_v35 }
 0x2e4   :  { %8422 = vmatpush3.msra.mxu1 %v1085_v63 }
 0x2e5   :  { %8423 = vmatprep.subr.mxu1 %v1084_v1 }
 0x2e6   :  { %8424 = vmatpush3.msra.mxu1 %v1084_v1 }
 0x2e7   :  { %8442 = vmatprep.subr.mxu1 %v9536_v0 }
 0x397   :  { %v8383_v47 = vpop.f32.mrf.mxu1 }
 0x398   :  { %8394 = vmatprep.subr.mxu0 %v8383_v47 }
 0x399   :  { %v607_v48 = vpop.f32.mrf.mxu1  ;;  %8395 = vmatpush3.msra.mxu0 %v8383_v47  ;;  %v998_v47 = vld [vmem:[%s12012_s13 + $0x10] sm:$0xff] }
 0x39a   :  { %8396 = vmatprep.subr.mxu0 %v607_v48 }
 0x39b   :  { %v8390_v51 = vpop.f32.mrf.mxu1  ;;  %8397 = vmatpush3.msra.mxu0 %v607_v48  ;;  %v1030_v48 = vld [vmem:[%s12010_s5 + $0x10] sm:$0xff] }
 0x39c   :  { %8399 = vmatmul.mubr.msk.f32.vlgmr.msra.gmra.mxu0 %vm277_vm3, %v532_v49  ;;  %v1058_v49 = vld [vmem:[%s11965_s12 + $0x10] sm:$0xff] }
 0x39d   :  { %v699_v52 = vpop.f32.mrf.mxu1  ;;  %8401 = vmatprep.mubr.msk.f32.mxu0 %vm277_vm3, %v533_v50 }
 0x39f   :  { %v8393_v55 = vpop.f32.mrf.mxu1 }
 0x3a0   :  { %8402 = vmatmul.mubr.msk.f32.gmra.mxu0 %vm277_vm3, %v534_v53 }
 0x3a1   :  { %v9830_v56 = vpop.f32.mrf.mxu1  ;;  %8415 = vmatprep.mubr.msk.f32.mxu0 %vm277_vm3, %v7841_v54 }
 0x3a3   :  { %v8410_v57 = vpop.f32.mrf.mxu1 }
 0x3a4   :  { %8411 = vmatprep.subr.mxu0 %v8410_v57 }
 0x3a5   :  { %v886_v58 = vpop.f32.mrf.mxu1  ;;  %8412 = vmatpush3.msra.mxu0 %v8410_v57 }
 0x3a6   :  { %8413 = vmatprep.subr.mxu0 %v886_v58 }
 0x3a7   :  { %8414 = vmatpush3.msra.mxu0 %v886_v58 }
 0x3a8   :  { %8416 = vmatmul.mubr.msk.f32.vlgmr.msra.gmra.mxu0 %vm277_vm3, %v7842_v59  ;;  %8431 = vmatprep.subr.mxu0 %v9536_v0 }
 0x3a9   :  { %8418 = vmatprep.mubr.msk.f32.mxu0 %vm277_vm3, %v7843_v60  ;;  %8432 = vmatpush3.msra.mxu0 %v9851_v62 }
 0x3aa   :  { %8433 = vmatprep.subr.mxu0 %v9536_v0 }
 0x3ab   :  { %8434 = vmatpush3.msra.mxu0 %v9858_v2 }
 0x3ac   :  { %8419 = vmatmul.mubr.msk.f32.gmra.mxu0 %vm277_vm3, %v7844_v61  ;;  %8435 = vmatprep.subr.mxu0 %v9536_v0  ;;  %v999_v61 = vld [vmem:[%s12012_s13 + $0x18] sm:$0xff]  ;;  %s12014_s13 = sld [smem:[#allocation28_spill]] }
 0x3ad   :  { %8439 = vmatprep.mubr.msk.f32.mxu0 %vm9537_vm0, %v9536_v0  ;;  %8436 = vmatpush3.msra.mxu0 %v9865_v3 }
 0x3ae   :  { %8437 = vmatprep.subr.mxu0 %v9536_v0 }
 0x3af   :  { %8438 = vmatpush3.msra.mxu0 %v9871_v4 }
 0x3b0   :  { %8440 = vmatmul.mubr.f32.vlgmr.msra.gmra.mxu0 %v9536_v0  ;;  %8453 = vmatprep.subr.mxu0 %v9536_v0 }
 0x3b1   :  { %8461 = vmatprep.mubr.msk.f32.mxu0 %vm9537_vm0, %v9536_v0 }
 0x45c   :  { %v8400_v5 = vpop.f32.mrf.mxu0 }
 0x45d   :  { %v802_v10 = vadd.f32 %v8400_v5, %v8390_v51 }
 0x45e   :  { %v796_v6 = vpop.f32.mrf.mxu0 }
 0x45f   :  { %v797_v13 = vadd.f32 %v796_v6, %v699_v52  ;;  %v1059_v6 = vld [vmem:[%s11965_s12 + $0x18] sm:$0xff] }
 0x460   :  { %v8403_v8 = vpop.f32.mrf.mxu0 }
 0x461   :  { %v812_v16 = vadd.f32 %v8403_v8, %v8393_v55  ;;  %v9926_v8 = vld [vmem:[%s11970_s17 + $0x10] sm:$0xff] }
 0x462   :  { %v806_v9 = vpop.f32.mrf.mxu0 }
 0x463   :  { %v807_v53 = vadd.f32 %v806_v9, %v9830_v56  ;;  %v1031_v56 = vld [vmem:[%s12010_s5 + $0x18] sm:$0xff]  ;;  %v9933_v9 = vld [vmem:[%s11970_s17 + $0x8] sm:$0xff] }
 0x468   :  { %v8417_v12 = vpop.f32.mrf.mxu0 }
 0x469   :  { %v993_v14 = vadd.f32 %v8417_v12, %v802_v10  ;;  %v9940_v10 = vld [vmem:[%s11970_s17] sm:$0xff]  ;;  %v9954_v12 = vld [vmem:[%s11969_s16 + $0x10] sm:$0xff] }
 0x46a   :  { %v973_v15 = vpop.f32.mrf.mxu0 }
 0x46b   :  { %v1021_v17 = vadd.f32 %v1008_v11, %v993_v14  ;;  %v992_v18 = vadd.f32 %v973_v15, %v797_v13  ;;  %v9945_v11 = vld [vmem:[%s11969_s16 + $0x18] sm:$0xff]  ;;  %v9963_v13 = vld [vmem:[%s11969_s16 + $0x8] sm:$0xff]  ;;  %v9970_v14 = vld [vmem:[%s11969_s16] sm:$0xff] }
 0x46c   :  { %v8420_v20 = vpop.f32.mrf.mxu0  ;;  %8454 = vmatpush3.msra.mxu0 %v9945_v11 }
 0x46d   :  { %v1025_v22 = vmax.f32 %v1021_v17, 0.0  ;;  %v1020_v23 = vadd.f32 %v1003_v7, %v992_v18  ;;  %v9880_v24 = vadd.f32 %v8420_v20, %v812_v16  ;;  %v9921_v7 = vld [vmem:[%s11970_s17 + $0x18] sm:$0xff]  ;;  %8455 = vmatprep.subr.mxu0 %v9536_v0 }
 0x46e   :  { %v983_v32 = vpop.f32.mrf.mxu0  ;;  %8456 = vmatpush3.msra.mxu0 %v9954_v12 }
 0x46f   :  { %v1024_v25 = vmax.f32 %v1020_v23, 0.0  ;;  %v1053_v26 = vmul.f32 %v1040_v21, %v1025_v22  ;;  %v994_v54 = vadd.f32 %v983_v32, %v807_v53  ;;  %8457 = vmatprep.subr.mxu0 %v9536_v0 }
 0x470   :  { %v1273_v33 = vpop.f32.mrf.mxu0  ;;  %8458 = vmatpush3.msra.mxu0 %v9963_v13 }
 0x471   :  { %v1052_v27 = vmul.f32 %v1035_v19, %v1024_v25  ;;  %v1081_v31 = vadd.f32 %v1068_v30, %v1053_v26  ;;  %8459 = vmatprep.subr.mxu0 %v9536_v0 }
 0x472   :  { %v8441_v34 = vpop.f32.mrf.mxu0  ;;  %8460 = vmatpush3.msra.mxu0 %v9970_v14 }
 0x473   :  { %v1080_v29 = vadd.f32 %v1063_v28, %v1052_v27  ;;  %8475 = vmatprep.subr.mxu0 %v9536_v0 }
 0x475   :  { %8425 = vmatprep.mubr.msk.f32.mxu1 %vm277_vm3, %v1080_v29  ;;  %v10016_v29 = vld [vmem:[#allocation8] ss:$0 sm:$0xff] }
 0x476   :  { %8426 = vmatmul.mubr.msk.f32.vlgmr.msra.gmra.mxu1 %vm277_vm3, %v1081_v31 }
 0x477   :  { %8443 = vmatpush3.msra.mxu1 %v9921_v7 }
 0x478   :  { %8444 = vmatprep.subr.mxu1 %v9536_v0 }
 0x479   :  { %8445 = vmatpush3.msra.mxu1 %v9926_v8 }
 0x47a   :  { %8446 = vmatprep.subr.mxu1 %v9536_v0 }
 0x47b   :  { %8447 = vmatpush3.msra.mxu1 %v9933_v9 }
 0x47c   :  { %8448 = vmatprep.subr.mxu1 %v9536_v0 }
 0x47d   :  { %8449 = vmatpush3.msra.mxu1 %v9940_v10 }
 0x47e   :  { %8464 = vmatprep.subr.mxu1 %v9536_v0 }
 0x536   :  { %v9884_v35 = vpop.f32.mrf.mxu1 }
 0x538   :  { %v1171_v37 = vpop.f32.mrf.mxu1 }
 0x539   :  { %v9889_v38 = vadd.f32 %v9886_v36, %v1171_v37 }
 0x53b   :  { %v1277_v39 = vadd.f32 %v1273_v33, %v9889_v38 }
 0x53d   :  { %9047 = vtanh.f32 %v1277_v39  ;;  %v7856_v41 = vmul.f32 -1.442695, %v1277_v39 }
 0x53f   :  { %9049 = vpow2.f32 %v7856_v41 }
 0x54a   :  { %v9048_v40 = vpop.eup %9047 }
 0x54b   :  { %1287 = vrot.lane.b32.xlu0 %v9048_v40, %s9539_s28 }
 0x54c   :  { %v9050_v42 = vpop.eup %9049 }
 0x54d   :  { %v1281_v43 = vadd.f32 1.0, %v9050_v42 }
 0x54f   :  { %9051 = vrcp.f32 %v1281_v43 }
 0x55c   :  { %v9052_v44 = vpop.eup %9051 }
 0x55d   :  { %v1285_v50 = vmul.f32 0.0, %v9052_v44 }
 0x5bd   :  { %v1288_v45 = vpop.permute.xlu0 %1287 }
 0x5be   :  { %v1290_v46 = vmul.f32 %v9052_v44, %v1288_v45 }
 0x5c0   :  { %1292 = vrot.lane.b32.xlu1 %v1290_v46, %s9540_s0 }
 0x5c4   :  { %1012 = vperm.xlu1 %9046, %v998_v47  }
 0x5c8   :  { %1044 = vperm.xlu1 %9046, %v1030_v48  }
 0x5cc   :  { %1072 = vperm.xlu1 %9046, %v1058_v49  }
 0x632   :  { %v1293_v51 = vpop.permute.xlu1 %1292 }
 0x633   :  { %v9903_v52 = vadd.f32 %v1293_v51, %v1285_v50 }
 0x635   :  { %9053 = vtanh.f32 %v9903_v52 }
 0x63f   :  { %v1013_v55 = vpop.permute.xlu1 %1012 }
 0x640   :  { %v1022_v57 = vadd.f32 %v1013_v55, %v994_v54 }
 0x642   :  { %v9054_v58 = vpop.eup %9053  ;;  %v1026_v59 = vmax.f32 %v1022_v57, 0.0  ;;  %v1566_v57 = vrot.slane %v9903_v52, 6 }
 0x643   :  { %v1045_v60 = vpop.permute.xlu1 %1044  ;;  %1298 = vrot.lane.b32.xlu0 %v9054_v58, %s9539_s28 }
 0x644   :  { %v1054_v63 = vmul.f32 %v1045_v60, %v1026_v59 }
 0x647   :  { %v1073_v1 = vpop.permute.xlu1 %1072  ;;  %1017 = vperm.xlu0 %9045, %v999_v61  }
 0x648   :  { %v1082_v5 = vadd.f32 %v1073_v1, %v1054_v63 }
 0x64a   :  { %8428 = vmatprep.mubr.msk.f32.mxu1 %vm277_vm3, %v1082_v5 }
 0x64b   :  { %1049 = vperm.xlu0 %9045, %v1031_v56  }
 0x64f   :  { %1077 = vperm.xlu0 %9045, %v1059_v6  }
 0x6b5   :  { %v1299_v15 = vpop.permute.xlu0 %1298 }
 0x6b6   :  { %v1301_v16 = vmul.f32 %v9052_v44, %v1299_v15 }
 0x6b8   :  { %1373 = vrot.lane.b32.xlu1 %v1301_v16, %s9540_s0 }
 0x6c2   :  { %v1018_v17 = vpop.permute.xlu0 %1017 }
 0x6c3   :  { %v1023_v18 = vadd.f32 %v1018_v17, %v9880_v24 }
 0x6c5   :  { %v1027_v19 = vmax.f32 %v1023_v18, 0.0 }
 0x6c6   :  { %v1050_v20 = vpop.permute.xlu0 %1049 }
 0x6c7   :  { %v1055_v21 = vmul.f32 %v1050_v20, %v1027_v19 }
 0x6ca   :  { %v1078_v22 = vpop.permute.xlu0 %1077 }
 0x6cb   :  { %v1083_v23 = vadd.f32 %v1078_v22, %v1055_v21 }
 0x6cd   :  { %8429 = vmatmul.mubr.msk.f32.gmra.mxu1 %vm277_vm3, %v1083_v23 }
 0x6ce   :  { %8450 = vmatprep.mubr.msk.f32.mxu1 %vm9537_vm0, %v9536_v0 }
 0x6d1   :  { %8451 = vmatmul.mubr.f32.vlgmr.msra.gmra.mxu1 %v9536_v0 }
 0x6d2   :  { %8465 = vmatpush3.msra.mxu1 %v9851_v62  ;;  %8472 = vmatprep.mubr.msk.f32.mxu1 %vm9537_vm0, %v9536_v0 }
 0x6d3   :  { %8466 = vmatprep.subr.mxu1 %v9536_v0 }
 0x6d4   :  { %8467 = vmatpush3.msra.mxu1 %v9858_v2 }
 0x6d5   :  { %8468 = vmatprep.subr.mxu1 %v9536_v0 }
 0x6d6   :  { %8469 = vmatpush3.msra.mxu1 %v9865_v3 }
 0x6d7   :  { %8470 = vmatprep.subr.mxu1 %v9536_v0 }
 0x6d8   :  { %8471 = vmatpush3.msra.mxu1 %v9871_v4 }
 0x6d9   :  { %8486 = vmatprep.subr.mxu1 %v9536_v0 }
 0x72a   :  { %v1374_v24 = vpop.permute.xlu1 %1373 }
 0x72b   :  { %8462 = vmatmul.mubr.msk.f32.vlgmr.msra.gmra.mxu0 %vm1203_vm7, %v1374_v24  ;;  %8473 = vmatmul.mubr.msk.f32.vlgmr.msra.gmra.mxu1 %vm1203_vm7, %v1374_v24 }
 0x72c   :  { %8476 = vmatpush3.msra.mxu0 %v9921_v7  ;;  %8487 = vmatpush3.msra.mxu1 %v9945_v11 }
 0x72d   :  { %8477 = vmatprep.subr.mxu0 %v9536_v0  ;;  %8488 = vmatprep.subr.mxu1 %v9536_v0 }
 0x72e   :  { %8478 = vmatpush3.msra.mxu0 %v9926_v8  ;;  %8489 = vmatpush3.msra.mxu1 %v9954_v12 }
 0x72f   :  { %8479 = vmatprep.subr.mxu0 %v9536_v0  ;;  %8490 = vmatprep.subr.mxu1 %v9536_v0 }
 0x730   :  { %8480 = vmatpush3.msra.mxu0 %v9933_v9  ;;  %8483 = vmatprep.mubr.msk.f32.mxu0 %vm9537_vm0, %v9536_v0 }
 0x731   :  { %8481 = vmatprep.subr.mxu0 %v9536_v0  ;;  %8491 = vmatpush3.msra.mxu1 %v9963_v13 }
 0x732   :  { %8482 = vmatpush3.msra.mxu0 %v9940_v10  ;;  %8492 = vmatprep.subr.mxu1 %v9536_v0 }
 0x733   :  { %8497 = vmatprep.subr.mxu0 %v9536_v0  ;;  %8493 = vmatpush3.msra.mxu1 %v9970_v14 }
 0x734   :  { %8494 = vmatprep.mubr.msk.f32.mxu1 %vm9537_vm0, %v9536_v0  ;;  %8508 = vmatprep.subr.mxu1 %v9536_v0 }
 0x78d   :  { %v10012_v25 = vpop.f32.mrf.mxu1 }
 0x78f   :  { %v10014_v26 = vpop.f32.mrf.mxu1 }
 0x791   :  { %v1368_v27 = vpop.f32.mrf.mxu1 }
 0x793   :  { %v8452_v28 = vpop.f32.mrf.mxu1 }
 0x7eb   :  { %v1443_v30 = vpop.f32.mrf.mxu0  ;;  %v1550_v31 = vpop.f32.mrf.mxu1 }
 0x7ec   :  { %v1444_v32 = vadd.f32 %v1443_v30, %v1368_v27  ;;  %v1555_v33 = vrot.slane %v1550_v31, 6 }
 0x7ed   :  { %v8463_v34 = vpop.f32.mrf.mxu0  ;;  %v8474_v37 = vpop.f32.mrf.mxu1 }
 0x7ee   :  { %v1453_v39 = vadd.f32 %v10016_v29, %v1444_v32  ;;  %v1557_v40 = vadd.f32 %v1555_v33, %v9889_v38 }
 0x7f0   :  { %9055 = vtanh.f32 %v1453_v39  ;;  %v7859_v43 = vmul.f32 -1.442695, %v1453_v39  ;;  %v7861_v44 = vmul.f32 -1.442695, %v1557_v40 }
 0x7f1   :  { %9057 = vtanh.f32 %v1557_v40 }
 0x7f2   :  { %9059 = vpow2.f32 %v7859_v43 }
 0x7f3   :  { %9061 = vpow2.f32 %v7861_v44 }
 0x7fd   :  { %v9056_v41 = vpop.eup %9055 }
 0x7fe   :  { %v9058_v42 = vpop.eup %9057  ;;  %1463 = vrot.lane.b32.xlu0 %v9056_v41, %s9539_s28 }
 0x7ff   :  { %1570 = vrot.lane.b32.xlu1 %v9058_v42, %s9539_s28  ;;  %v9060_v45 = vpop.eup %9059 }
 0x800   :  { %v9062_v46 = vpop.eup %9061  ;;  %v1457_v47 = vadd.f32 1.0, %v9060_v45 }
 0x801   :  { %v1561_v48 = vadd.f32 1.0, %v9062_v46 }
 0x802   :  { %9063 = vrcp.f32 %v1457_v47 }
 0x803   :  { %9065 = vrcp.f32 %v1561_v48 }
 0x80f   :  { %v9064_v49 = vpop.eup %9063 }
 0x810   :  { %v9066_v51 = vpop.eup %9065  ;;  %v1461_v58 = vmul.f32 0.0, %v9064_v49 }
 0x811   :  { %v1568_v60 = vmul.f32 %v9066_v51, %v1566_v57 }
 0x870   :  { %v1464_v50 = vpop.permute.xlu0 %1463 }
 0x871   :  { %v1466_v53 = vmul.f32 %v9064_v49, %v1464_v50  ;;  %v1571_v54 = vpop.permute.xlu1 %1570 }
 0x872   :  { %v1573_v55 = vmul.f32 %v9066_v51, %v1571_v54 }
 0x873   :  { %1468 = vrot.lane.b32.xlu0 %v1466_v53, %s9540_s0 }
 0x874   :  { %1575 = vrot.lane.b32.xlu1 %v1573_v55, %s9540_s0 }
 0x8e5   :  { %v1469_v59 = vpop.permute.xlu0 %1468 }
 0x8e6   :  { %v10025_v61 = vadd.f32 %v1469_v59, %v1461_v58  ;;  %v1576_v63 = vpop.permute.xlu1 %1575 }
 0x8e7   :  { %v10027_v1 = vadd.f32 %v1576_v63, %v1568_v60 }
 0x8e8   :  { %9067 = vtanh.f32 %v10025_v61 }
 0x8e9   :  { %9069 = vtanh.f32 %v10027_v1  ;;  %v1845_v54 = vrot.slane %v10027_v1, 6 }
 0x8f5   :  { %v9068_v5 = vpop.eup %9067 }
 0x8f6   :  { %v9070_v56 = vpop.eup %9069  ;;  %1474 = vrot.lane.b32.xlu0 %v9068_v5, %s9539_s28 }
 0x8f7   :  { %1581 = vrot.lane.b32.xlu1 %v9070_v56, %s9539_s28 }
 0x968   :  { %v1475_v6 = vpop.permute.xlu0 %1474 }
 0x969   :  { %v1477_v52 = vmul.f32 %v9064_v49, %v1475_v6  ;;  %v1582_v15 = vpop.permute.xlu1 %1581 }
 0x96a   :  { %v1584_v16 = vmul.f32 %v9066_v51, %v1582_v15 }
 0x96b   :  { %1479 = vrot.lane.b32.xlu0 %v1477_v52, %s9540_s0 }
 0x96c   :  { %v1658_v17 = vrot.slane %v1584_v16, 2 }
 0x96e   :  { %1659 = vrot.lane.b32.xlu1 %v1658_v17, %s9540_s0 }
 0x9dd   :  { %v1480_v18 = vpop.permute.xlu0 %1479 }
 0x9de   :  { %1483 = vst.msk [vmem:[#allocation2] sm:$0x3] %vm1482_vm8, %v1480_v18  ;;  %8484 = vmatmul.mubr.msk.f32.vlgmr.msra.gmra.mxu0 %vm1203_vm7, %v1480_v18 }
 0x9df   :  { %8498 = vmatpush3.msra.mxu0 %v9851_v62  ;;  %8505 = vmatprep.mubr.msk.f32.mxu0 %vm9537_vm0, %v9536_v0 }
 0x9e0   :  { %8499 = vmatprep.subr.mxu0 %v9536_v0  ;;  %v1660_v19 = vpop.permute.xlu1 %1659 }
 0x9e1   :  { %8495 = vmatmul.mubr.msk.f32.vlgmr.msra.gmra.mxu1 %vm1203_vm7, %v1660_v19  ;;  %8500 = vmatpush3.msra.mxu0 %v9858_v2 }
 0x9e2   :  { %8501 = vmatprep.subr.mxu0 %v9536_v0  ;;  %8509 = vmatpush3.msra.mxu1 %v9921_v7 }
 0x9e3   :  { %8502 = vmatpush3.msra.mxu0 %v9865_v3  ;;  %8510 = vmatprep.subr.mxu1 %v9536_v0 }
 0x9e4   :  { %8503 = vmatprep.subr.mxu0 %v9536_v0  ;;  %8511 = vmatpush3.msra.mxu1 %v9926_v8 }
 0x9e5   :  { %8504 = vmatpush3.msra.mxu0 %v9871_v4  ;;  %8512 = vmatprep.subr.mxu1 %v9536_v0 }
 0x9e6   :  { %8506 = vmatmul.mubr.msk.f32.vlgmr.msra.gmra.mxu0 %vm1203_vm7, %v1660_v19  ;;  %8513 = vmatpush3.msra.mxu1 %v9933_v9 }
 0x9e7   :  { %8514 = vmatprep.subr.mxu1 %v9536_v0  ;;  %8516 = vmatprep.mubr.msk.f32.mxu1 %vm9537_vm0, %v9536_v0 }
 0x9e8   :  { %8515 = vmatpush3.msra.mxu1 %v9940_v10  ;;  %8519 = vmatprep.subr.mxu0 %v9536_v0 }
 0x9e9   :  { %8530 = vmatprep.subr.mxu1 %v9536_v0  ;;  %8520 = vmatpush3.msra.mxu0 %v9945_v11 }
 0x9ea   :  { %8521 = vmatprep.subr.mxu0 %v9536_v0  ;;  %8527 = vmatprep.mubr.msk.f32.mxu0 %vm9537_vm0, %v9536_v0 }
 0x9eb   :  { %8522 = vmatpush3.msra.mxu0 %v9954_v12 }
 0x9ec   :  { %8523 = vmatprep.subr.mxu0 %v9536_v0 }
 0x9ed   :  { %8524 = vmatpush3.msra.mxu0 %v9963_v13 }
 0x9ee   :  { %8525 = vmatprep.subr.mxu0 %v9536_v0 }
 0x9ef   :  { %8526 = vmatpush3.msra.mxu0 %v9970_v14 }
 0x9f0   :  { %8541 = vmatprep.subr.mxu0 %v9536_v0 }
 0xa9e   :  { %v1653_v20 = vpop.f32.mrf.mxu0 }
 0xaa0   :  { %v8485_v21 = vpop.f32.mrf.mxu0 }
 0xaa1   :  { %v1729_v22 = vpop.f32.mrf.mxu1 }
 0xaa2   :  { %v1730_v23 = vadd.f32 %v1729_v22, %v1653_v20 }
 0xaa3   :  { %v8496_v24 = vpop.f32.mrf.mxu1 }
 0xaa4   :  { %v1733_v27 = vadd.f32 %v10016_v29, %v1730_v23 }
 0xaa6   :  { %9071 = vtanh.f32 %v1733_v27  ;;  %v1829_v28 = vpop.f32.mrf.mxu0  ;;  %v7864_v37 = vmul.f32 -1.442695, %v1733_v27 }
 0xaa7   :  { %v1834_v30 = vrot.slane %v1829_v28, 4 }
 0xaa8   :  { %v8507_v31 = vpop.f32.mrf.mxu0 }
 0xaa9   :  { %v1836_v32 = vadd.f32 %v1834_v30, %v9889_v38 }
 0xaab   :  { %9073 = vtanh.f32 %v1836_v32  ;;  %v7866_v39 = vmul.f32 -1.442695, %v1836_v32 }
 0xaac   :  { %9075 = vpow2.f32 %v7864_v37 }
 0xaad   :  { %9077 = vpow2.f32 %v7866_v39 }
 0xab3   :  { %v9072_v33 = vpop.eup %9071 }
 0xab4   :  { %1743 = vrot.lane.b32.xlu0 %v9072_v33, %s9539_s28 }
 0xab8   :  { %v9074_v34 = vpop.eup %9073 }
 0xab9   :  { %1849 = vrot.lane.b32.xlu1 %v9074_v34, %s9539_s28  ;;  %v9076_v40 = vpop.eup %9075 }
 0xaba   :  { %v1737_v41 = vadd.f32 1.0, %v9076_v40  ;;  %v9078_v42 = vpop.eup %9077 }
 0xabb   :  { %v1840_v43 = vadd.f32 1.0, %v9078_v42 }
 0xabc   :  { %9079 = vrcp.f32 %v1737_v41 }
 0xabd   :  { %9081 = vrcp.f32 %v1840_v43 }
 0xac9   :  { %v9080_v44 = vpop.eup %9079 }
 0xaca   :  { %v9082_v47 = vpop.eup %9081  ;;  %v1741_v50 = vmul.f32 %v9080_v44, %v10025_v61 }
 0xacb   :  { %v1847_v55 = vmul.f32 %v9082_v47, %v1845_v54 }
 0xb26   :  { %v1744_v45 = vpop.permute.xlu0 %1743 }
 0xb27   :  { %v1746_v46 = vmul.f32 %v9080_v44, %v1744_v45 }
 0xb29   :  { %1748 = vrot.lane.b32.xlu0 %v1746_v46, %s9540_s0 }
 0xb2b   :  { %v1850_v48 = vpop.permute.xlu1 %1849 }
 0xb2c   :  { %v1852_v49 = vmul.f32 %v9082_v47, %v1850_v48 }
 0xb2e   :  { %1854 = vrot.lane.b32.xlu1 %v1852_v49, %s9540_s0 }
 0xb9b   :  { %v1749_v51 = vpop.permute.xlu0 %1748 }
 0xb9c   :  { %v10076_v53 = vadd.f32 %v1749_v51, %v1741_v50 }
 0xb9e   :  { %9083 = vtanh.f32 %v10076_v53 }
 0xba0   :  { %v1855_v57 = vpop.permute.xlu1 %1854 }
 0xba1   :  { %v10080_v58 = vadd.f32 %v1855_v57, %v1847_v55 }
 0xba3   :  { %9085 = vtanh.f32 %v10080_v58 }
 0xbab   :  { %v9084_v59 = vpop.eup %9083 }
 0xbac   :  { %1754 = vrot.lane.b32.xlu0 %v9084_v59, %s9539_s28 }
 0xbb0   :  { %v9086_v60 = vpop.eup %9085 }
 0xbb1   :  { %1860 = vrot.lane.b32.xlu1 %v9086_v60, %s9539_s28 }
 0xc1e   :  { %v1755_v61 = vpop.permute.xlu0 %1754 }
 0xc1f   :  { %v1757_v63 = vmul.f32 %v9080_v44, %v1755_v61  ;;  %v2124_v44 = vrot.slane %v10080_v58, 6 }
 0xc21   :  { %1759 = vrot.lane.b32.xlu0 %v1757_v63, %s9540_s0 }
 0xc23   :  { %v1861_v5 = vpop.permute.xlu1 %1860 }
 0xc24   :  { %v1863_v1 = vmul.f32 %v9082_v47, %v1861_v5 }
 0xc26   :  { %v1937_v56 = vrot.slane %v1863_v1, 4 }
 0xc28   :  { %1938 = vrot.lane.b32.xlu1 %v1937_v56, %s9540_s0 }
 0xc93   :  { %v1760_v6 = vpop.permute.xlu0 %1759 }
 0xc94   :  { %1762 = vst.msk [vmem:[#allocation2 + $0x2] sm:$0x3] %vm1482_vm8, %v1760_v6  ;;  %8517 = vmatmul.mubr.msk.f32.vlgmr.msra.gmra.mxu1 %vm1203_vm7, %v1760_v6 }
 0xc95   :  { %8531 = vmatpush3.msra.mxu1 %v9851_v62  ;;  %8538 = vmatprep.mubr.msk.f32.mxu1 %vm9537_vm0, %v9536_v0 }
 0xc96   :  { %8532 = vmatprep.subr.mxu1 %v9536_v0 }
 0xc97   :  { %8533 = vmatpush3.msra.mxu1 %v9858_v2 }
 0xc98   :  { %8534 = vmatprep.subr.mxu1 %v9536_v0 }
 0xc99   :  { %8535 = vmatpush3.msra.mxu1 %v9865_v3 }
 0xc9a   :  { %8536 = vmatprep.subr.mxu1 %v9536_v0  ;;  %v1939_v52 = vpop.permute.xlu1 %1938 }
 0xc9b   :  { %8537 = vmatpush3.msra.mxu1 %v9871_v4  ;;  %8528 = vmatmul.mubr.msk.f32.vlgmr.msra.gmra.mxu0 %vm1203_vm7, %v1939_v52 }
 0xc9c   :  { %8539 = vmatmul.mubr.msk.f32.vlgmr.msra.gmra.mxu1 %vm1203_vm7, %v1939_v52  ;;  %8542 = vmatpush3.msra.mxu0 %v9921_v7 }
 0xc9d   :  { %8543 = vmatprep.subr.mxu0 %v9536_v0  ;;  %8552 = vmatprep.subr.mxu1 %v9536_v0 }
 0xc9e   :  { %8544 = vmatpush3.msra.mxu0 %v9926_v8  ;;  %8553 = vmatpush3.msra.mxu1 %v9945_v11 }
 0xc9f   :  { %8545 = vmatprep.subr.mxu0 %v9536_v0  ;;  %8554 = vmatprep.subr.mxu1 %v9536_v0 }
 0xca0   :  { %8546 = vmatpush3.msra.mxu0 %v9933_v9  ;;  %8555 = vmatpush3.msra.mxu1 %v9954_v12 }
 0xca1   :  { %8547 = vmatprep.subr.mxu0 %v9536_v0  ;;  %8556 = vmatprep.subr.mxu1 %v9536_v0 }
 0xca2   :  { %8548 = vmatpush3.msra.mxu0 %v9940_v10  ;;  %8549 = vmatprep.mubr.msk.f32.mxu0 %vm9537_vm0, %v9536_v0 }
 0xca3   :  { %8557 = vmatpush3.msra.mxu1 %v9963_v13  ;;  %8563 = vmatprep.subr.mxu0 %v9536_v0 }
 0xca4   :  { %8558 = vmatprep.subr.mxu1 %v9536_v0  ;;  %8560 = vmatprep.mubr.msk.f32.mxu1 %vm9537_vm0, %v9536_v0 }
 0xca5   :  { %8559 = vmatpush3.msra.mxu1 %v9970_v14 }
 0xca6   :  { %8574 = vmatprep.subr.mxu1 %v9536_v0 }
 0xd54   :  { %v1932_v15 = vpop.f32.mrf.mxu1 }
 0xd56   :  { %v8518_v16 = vpop.f32.mrf.mxu1 }
 0xd5b   :  { %v2008_v17 = vpop.f32.mrf.mxu0 }
 0xd5c   :  { %v2009_v18 = vadd.f32 %v2008_v17, %v1932_v15  ;;  %v2108_v19 = vpop.f32.mrf.mxu1  ;;  %v10176_v15 = vadd.f32 %v9884_v35, %v9886_v36 }
 0xd5d   :  { %v2113_v20 = vrot.slane %v2108_v19, 2  ;;  %v8529_v21 = vpop.f32.mrf.mxu0 }
 0xd5e   :  { %v2012_v22 = vadd.f32 %v10016_v29, %v2009_v18  ;;  %v8540_v23 = vpop.f32.mrf.mxu1 }
 0xd5f   :  { %v2115_v24 = vadd.f32 %v2113_v20, %v9889_v38 }
 0xd60   :  { %9087 = vtanh.f32 %v2012_v22  ;;  %v7869_v30 = vmul.f32 -1.442695, %v2012_v22 }
 0xd61   :  { %9089 = vtanh.f32 %v2115_v24  ;;  %v7871_v31 = vmul.f32 -1.442695, %v2115_v24 }
 0xd62   :  { %9091 = vpow2.f32 %v7869_v30 }
 0xd63   :  { %9093 = vpow2.f32 %v7871_v31 }
 0xd6d   :  { %v9088_v27 = vpop.eup %9087 }
 0xd6e   :  { %v9090_v28 = vpop.eup %9089  ;;  %2022 = vrot.lane.b32.xlu1 %v9088_v27, %s9539_s28 }
 0xd6f   :  { %2128 = vrot.lane.b32.xlu0 %v9090_v28, %s9539_s28  ;;  %v9092_v32 = vpop.eup %9091 }
 0xd70   :  { %v9094_v33 = vpop.eup %9093  ;;  %v2016_v34 = vadd.f32 1.0, %v9092_v32 }
 0xd71   :  { %v2119_v37 = vadd.f32 1.0, %v9094_v33 }
 0xd72   :  { %9095 = vrcp.f32 %v2016_v34 }
 0xd73   :  { %9097 = vrcp.f32 %v2119_v37 }
 0xd7f   :  { %v9096_v39 = vpop.eup %9095 }
 0xd80   :  { %v9098_v40 = vpop.eup %9097  ;;  %v2020_v45 = vmul.f32 %v9096_v39, %v10076_v53 }
 0xd81   :  { %v2126_v47 = vmul.f32 %v9098_v40, %v2124_v44 }
 0xde0   :  { %v2023_v38 = vpop.permute.xlu1 %2022 }
 0xde1   :  { %v2025_v41 = vmul.f32 %v9096_v39, %v2023_v38  ;;  %v2129_v42 = vpop.permute.xlu0 %2128 }
 0xde2   :  { %v2131_v43 = vmul.f32 %v9098_v40, %v2129_v42 }
 0xde3   :  { %2027 = vrot.lane.b32.xlu1 %v2025_v41, %s9540_s0 }
 0xde4   :  { %2133 = vrot.lane.b32.xlu0 %v2131_v43, %s9540_s0 }
 0xe55   :  { %v2028_v46 = vpop.permute.xlu1 %2027 }
 0xe56   :  { %v10129_v48 = vadd.f32 %v2028_v46, %v2020_v45  ;;  %v2134_v49 = vpop.permute.xlu0 %2133 }
 0xe57   :  { %v10131_v50 = vadd.f32 %v2134_v49, %v2126_v47 }
 0xe58   :  { %9099 = vtanh.f32 %v10129_v48 }
 0xe59   :  { %9101 = vtanh.f32 %v10131_v50  ;;  %v2400_v37 = vrot.slane %v10131_v50, 6 }
 0xe65   :  { %v9100_v51 = vpop.eup %9099 }
 0xe66   :  { %v9102_v54 = vpop.eup %9101  ;;  %2033 = vrot.lane.b32.xlu1 %v9100_v51, %s9539_s28 }
 0xe67   :  { %2139 = vrot.lane.b32.xlu0 %v9102_v54, %s9539_s28 }
 0xed8   :  { %v2034_v55 = vpop.permute.xlu1 %2033 }
 0xed9   :  { %v2036_v57 = vmul.f32 %v9096_v39, %v2034_v55  ;;  %v2140_v53 = vpop.permute.xlu0 %2139 }
 0xeda   :  { %v2142_v58 = vmul.f32 %v9098_v40, %v2140_v53 }
 0xedb   :  { %2038 = vrot.lane.b32.xlu0 %v2036_v57, %s9540_s0 }
 0xedc   :  { %v2216_v59 = vrot.slane %v2142_v58, 6 }
 0xede   :  { %2217 = vrot.lane.b32.xlu1 %v2216_v59, %s9540_s0 }
 0xf4d   :  { %v2039_v60 = vpop.permute.xlu0 %2038 }
 0xf4e   :  { %2041 = vst.msk [vmem:[#allocation2 + $0x4] sm:$0x3] %vm1482_vm8, %v2039_v60  ;;  %8550 = vmatmul.mubr.msk.f32.vlgmr.msra.gmra.mxu0 %vm1203_vm7, %v2039_v60 }
 0xf4f   :  { %8564 = vmatpush3.msra.mxu0 %v9851_v62  ;;  %8571 = vmatprep.mubr.msk.f32.mxu0 %vm9537_vm0, %v9536_v0 }
 0xf50   :  { %v2218_v61 = vpop.permute.xlu1 %2217  ;;  %8565 = vmatprep.subr.mxu0 %v9536_v0 }
 0xf51   :  { %8561 = vmatmul.mubr.msk.f32.vlgmr.msra.gmra.mxu1 %vm1203_vm7, %v2218_v61  ;;  %8566 = vmatpush3.msra.mxu0 %v9858_v2 }
 0xf52   :  { %8567 = vmatprep.subr.mxu0 %v9536_v0  ;;  %8575 = vmatpush3.msra.mxu1 %v9921_v7 }
 0xf53   :  { %8568 = vmatpush3.msra.mxu0 %v9865_v3  ;;  %8576 = vmatprep.subr.mxu1 %v9536_v0 }
 0xf54   :  { %8569 = vmatprep.subr.mxu0 %v9536_v0  ;;  %8577 = vmatpush3.msra.mxu1 %v9926_v8 }
 0xf55   :  { %8570 = vmatpush3.msra.mxu0 %v9871_v4  ;;  %8578 = vmatprep.subr.mxu1 %v9536_v0 }
 0xf56   :  { %8572 = vmatmul.mubr.msk.f32.vlgmr.msra.gmra.mxu0 %vm1203_vm7, %v2218_v61  ;;  %8585 = vmatprep.subr.mxu0 %v9536_v0 }
 0xf57   :  { %8579 = vmatpush3.msra.mxu1 %v9933_v9  ;;  %8586 = vmatpush3.msra.mxu0 %v9945_v11 }
 0xf58   :  { %8580 = vmatprep.subr.mxu1 %v9536_v0  ;;  %8587 = vmatprep.subr.mxu0 %v9536_v0 }
 0xf59   :  { %8581 = vmatpush3.msra.mxu1 %v9940_v10  ;;  %8588 = vmatpush3.msra.mxu0 %v9954_v12 }
 0xf5a   :  { %8582 = vmatprep.mubr.msk.f32.mxu1 %vm9537_vm0, %v9536_v0  ;;  %8589 = vmatprep.subr.mxu0 %v9536_v0 }
 0xf5b   :  { %8596 = vmatprep.subr.mxu1 %v9536_v0  ;;  %8590 = vmatpush3.msra.mxu0 %v9963_v13 }
 0xf5c   :  { %8591 = vmatprep.subr.mxu0 %v9536_v0  ;;  %8593 = vmatprep.mubr.msk.f32.mxu0 %vm9537_vm0, %v9536_v0 }
 0xf5d   :  { %8592 = vmatpush3.msra.mxu0 %v9970_v14 }
 0xf5e   :  { %8607 = vmatprep.subr.mxu0 %v9536_v0 }
0x100e   :  { %v2211_v63 = vpop.f32.mrf.mxu0 }
0x1010   :  { %v8551_v5 = vpop.f32.mrf.mxu0 }
0x1011   :  { %v2287_v1 = vpop.f32.mrf.mxu1 }
0x1012   :  { %v2288_v56 = vadd.f32 %v2287_v1, %v2211_v63 }
0x1013   :  { %v8562_v6 = vpop.f32.mrf.mxu1 }
0x1014   :  { %v2291_v52 = vadd.f32 %v10016_v29, %v2288_v56 }
0x1016   :  { %9103 = vtanh.f32 %v2291_v52  ;;  %v2387_v16 = vpop.f32.mrf.mxu0  ;;  %v7874_v21 = vmul.f32 -1.442695, %v2291_v52 }
0x1017   :  { %v2391_v17 = vadd.f32 %v2387_v16, %v10176_v15 }
0x1018   :  { %v8573_v18 = vpop.f32.mrf.mxu0 }
0x1019   :  { %9105 = vtanh.f32 %v2391_v17  ;;  %v7876_v22 = vmul.f32 -1.442695, %v2391_v17 }
0x101a   :  { %9107 = vpow2.f32 %v7874_v21 }
0x101b   :  { %9109 = vpow2.f32 %v7876_v22 }
0x1023   :  { %v9104_v19 = vpop.eup %9103 }
0x1024   :  { %2301 = vrot.lane.b32.xlu0 %v9104_v19, %s9539_s28 }
0x1026   :  { %v9106_v20 = vpop.eup %9105 }
0x1027   :  { %2404 = vrot.lane.b32.xlu1 %v9106_v20, %s9539_s28  ;;  %v9108_v23 = vpop.eup %9107 }
0x1028   :  { %v9110_v24 = vpop.eup %9109  ;;  %v2295_v35 = vadd.f32 1.0, %v9108_v23 }
0x1029   :  { %v2395_v36 = vadd.f32 1.0, %v9110_v24 }
0x102a   :  { %9111 = vrcp.f32 %v2295_v35 }
0x102b   :  { %9113 = vrcp.f32 %v2395_v36 }
0x1037   :  { %v9112_v27 = vpop.eup %9111 }
0x1038   :  { %v9114_v31 = vpop.eup %9113  ;;  %v2299_v34 = vmul.f32 %v9112_v27, %v10129_v48 }
0x1039   :  { %v2402_v40 = vmul.f32 %v9114_v31, %v2400_v37 }
0x1096   :  { %v2302_v28 = vpop.permute.xlu0 %2301 }
0x1097   :  { %v2304_v30 = vmul.f32 %v9112_v27, %v2302_v28 }
0x1099   :  { %v2405_v32 = vpop.permute.xlu1 %2404  ;;  %2306 = vrot.lane.b32.xlu0 %v2304_v30, %s9540_s0 }
0x109a   :  { %v2407_v33 = vmul.f32 %v9114_v31, %v2405_v32 }
0x109c   :  { %2409 = vrot.lane.b32.xlu1 %v2407_v33, %s9540_s0 }
0x110b   :  { %v2307_v39 = vpop.permute.xlu0 %2306 }
0x110c   :  { %v10185_v38 = vadd.f32 %v2307_v39, %v2299_v34 }
0x110e   :  { %9115 = vtanh.f32 %v10185_v38  ;;  %v2410_v41 = vpop.permute.xlu1 %2409 }
0x110f   :  { %v10188_v42 = vadd.f32 %v2410_v41, %v2402_v40  ;;  %v10261_v40 = vld [vmem:[%s11967_s14 + $0x10] sm:$0xff]  ;;  %v10268_v41 = vld [vmem:[%s11967_s14 + $0x8] sm:$0xff] }
0x1111   :  { %9117 = vtanh.f32 %v10188_v42  ;;  %v2678_v24 = vrot.slane %v10188_v42, 6 }
0x111b   :  { %v9116_v43 = vpop.eup %9115 }
0x111c   :  { %2312 = vrot.lane.b32.xlu0 %v9116_v43, %s9539_s28  ;;  %v10276_v43 = vld [vmem:[%s11967_s14] sm:$0xff] }
0x111e   :  { %v9118_v44 = vpop.eup %9117 }
0x111f   :  { %2415 = vrot.lane.b32.xlu1 %v9118_v44, %s9539_s28 }
0x118e   :  { %v2313_v45 = vpop.permute.xlu0 %2312 }
0x118f   :  { %v2315_v46 = vmul.f32 %v9112_v27, %v2313_v45 }
0x1191   :  { %v2416_v47 = vpop.permute.xlu1 %2415  ;;  %2317 = vrot.lane.b32.xlu0 %v2315_v46, %s9540_s0 }
0x1192   :  { %v2418_v48 = vmul.f32 %v9114_v31, %v2416_v47 }
0x1194   :  { %2492 = vrot.lane.b32.xlu1 %v2418_v48, %s9540_s0 }
0x1203   :  { %v2318_v49 = vpop.permute.xlu0 %2317 }
0x1204   :  { %2320 = vst.msk [vmem:[#allocation2 + $0x6] sm:$0x3] %vm1482_vm8, %v2318_v49  ;;  %8583 = vmatmul.mubr.msk.f32.vlgmr.msra.gmra.mxu1 %vm1203_vm7, %v2318_v49 }
0x1205   :  { %8597 = vmatpush3.msra.mxu1 %v9851_v62  ;;  %8604 = vmatprep.mubr.msk.f32.mxu1 %vm9537_vm0, %v9536_v0 }
0x1206   :  { %8598 = vmatprep.subr.mxu1 %v9536_v0  ;;  %v2493_v50 = vpop.permute.xlu1 %2492 }
0x1207   :  { %8599 = vmatpush3.msra.mxu1 %v9858_v2  ;;  %8594 = vmatmul.mubr.msk.f32.vlgmr.msra.gmra.mxu0 %vm1203_vm7, %v2493_v50 }
0x1208   :  { %8600 = vmatprep.subr.mxu1 %v9536_v0  ;;  %8608 = vmatpush3.msra.mxu0 %v9921_v7 }
0x1209   :  { %8601 = vmatpush3.msra.mxu1 %v9865_v3  ;;  %8609 = vmatprep.subr.mxu0 %v9536_v0 }
0x120a   :  { %8602 = vmatprep.subr.mxu1 %v9536_v0  ;;  %8610 = vmatpush3.msra.mxu0 %v9926_v8 }
0x120b   :  { %8603 = vmatpush3.msra.mxu1 %v9871_v4  ;;  %8611 = vmatprep.subr.mxu0 %v9536_v0 }
0x120c   :  { %8605 = vmatmul.mubr.msk.f32.vlgmr.msra.gmra.mxu1 %vm1203_vm7, %v2493_v50  ;;  %8612 = vmatpush3.msra.mxu0 %v9933_v9 }
0x120d   :  { %8613 = vmatprep.subr.mxu0 %v9536_v0  ;;  %8618 = vmatprep.subr.mxu1 %v9536_v0 }
0x120e   :  { %8614 = vmatpush3.msra.mxu0 %v9940_v10  ;;  %8615 = vmatprep.mubr.msk.f32.mxu0 %vm9537_vm0, %v9536_v0 }
0x120f   :  { %8619 = vmatpush3.msra.mxu1 %v9945_v11  ;;  %8629 = vmatprep.subr.mxu0 %v9536_v0 }
0x1210   :  { %8620 = vmatprep.subr.mxu1 %v9536_v0  ;;  %8626 = vmatprep.mubr.msk.f32.mxu1 %vm9537_vm0, %v9536_v0 }
0x1211   :  { %8621 = vmatpush3.msra.mxu1 %v9954_v12 }
0x1212   :  { %8622 = vmatprep.subr.mxu1 %v9536_v0 }
0x1213   :  { %8623 = vmatpush3.msra.mxu1 %v9963_v13 }
0x1214   :  { %8624 = vmatprep.subr.mxu1 %v9536_v0 }
0x1215   :  { %8625 = vmatpush3.msra.mxu1 %v9970_v14 }
0x1216   :  { %8640 = vmatprep.subr.mxu1 %v9536_v0 }
0x12c4   :  { %v2487_v62 = vpop.f32.mrf.mxu1 }
0x12c6   :  { %v8584_v2 = vpop.f32.mrf.mxu1 }
0x12c7   :  { %v2562_v3 = vpop.f32.mrf.mxu0 }
0x12c8   :  { %v2563_v4 = vadd.f32 %v2562_v3, %v2487_v62 }
0x12c9   :  { %v8595_v51 = vpop.f32.mrf.mxu0 }
0x12ca   :  { %v2566_v54 = vadd.f32 %v10016_v29, %v2563_v4 }
0x12cc   :  { %9119 = vtanh.f32 %v2566_v54  ;;  %v2662_v55 = vpop.f32.mrf.mxu1  ;;  %v7879_v61 = vmul.f32 -1.442695, %v2566_v54 }
0x12cd   :  { %v2667_v57 = vrot.slane %v2662_v55, 6 }
0x12ce   :  { %v8606_v53 = vpop.f32.mrf.mxu1 }
0x12cf   :  { %v2669_v58 = vadd.f32 %v2667_v57, %v10176_v15 }
0x12d1   :  { %9121 = vtanh.f32 %v2669_v58  ;;  %v7881_v63 = vmul.f32 -1.442695, %v2669_v58 }
0x12d2   :  { %9123 = vpow2.f32 %v7879_v61 }
0x12d3   :  { %9125 = vpow2.f32 %v7881_v63 }
0x12d9   :  { %v9120_v59 = vpop.eup %9119 }
0x12da   :  { %2576 = vrot.lane.b32.xlu0 %v9120_v59, %s9539_s28 }
0x12de   :  { %v9122_v60 = vpop.eup %9121 }
0x12df   :  { %2682 = vrot.lane.b32.xlu1 %v9122_v60, %s9539_s28  ;;  %v9124_v5 = vpop.eup %9123 }
0x12e0   :  { %v2570_v1 = vadd.f32 1.0, %v9124_v5  ;;  %v9126_v56 = vpop.eup %9125 }
0x12e1   :  { %v2673_v6 = vadd.f32 1.0, %v9126_v56 }
0x12e2   :  { %9127 = vrcp.f32 %v2570_v1 }
0x12e3   :  { %9129 = vrcp.f32 %v2673_v6 }
0x12ef   :  { %v9128_v52 = vpop.eup %9127 }
0x12f0   :  { %v9130_v18 = vpop.eup %9129  ;;  %v2574_v21 = vmul.f32 %v9128_v52, %v10185_v38  ;;  %v10252_v38 = vld [vmem:[%s11967_s14 + $0x18] sm:$0xff] }
0x12f1   :  { %v2680_v35 = vmul.f32 %v9130_v18, %v2678_v24  ;;  %v10357_v24 = vld [vmem:[%s11970_s17] sm:$0xff] }
0x134c   :  { %v2577_v16 = vpop.permute.xlu0 %2576 }
0x134d   :  { %v2579_v17 = vmul.f32 %v9128_v52, %v2577_v16 }
0x134f   :  { %2581 = vrot.lane.b32.xlu0 %v2579_v17, %s9540_s0 }
0x1351   :  { %v2683_v19 = vpop.permute.xlu1 %2682 }
0x1352   :  { %v2685_v20 = vmul.f32 %v9130_v18, %v2683_v19 }
0x1354   :  { %2687 = vrot.lane.b32.xlu1 %v2685_v20, %s9540_s0 }
0x13c1   :  { %v2582_v22 = vpop.permute.xlu0 %2581 }
0x13c2   :  { %v10236_v23 = vadd.f32 %v2582_v22, %v2574_v21  ;;  %v10331_v21 = vld [vmem:[%s11970_s17 + $0x18] sm:$0xff]  ;;  %v10340_v22 = vld [vmem:[%s11970_s17 + $0x10] sm:$0xff] }
0x13c4   :  { %9131 = vtanh.f32 %v10236_v23 }
0x13c6   :  { %v2688_v36 = vpop.permute.xlu1 %2687 }
0x13c7   :  { %v10240_v27 = vadd.f32 %v2688_v36, %v2680_v35  ;;  %v10365_v35 = vld [vmem:[%s11969_s16 + $0x18] sm:$0xff]  ;;  %v10375_v36 = vld [vmem:[%s11969_s16 + $0x10] sm:$0xff] }
0x13c9   :  { %9133 = vtanh.f32 %v10240_v27  ;;  %v2957_v53 = vrot.slane %v10240_v27, 6  ;;  %v10382_v27 = vld [vmem:[%s11969_s16 + $0x8] sm:$0xff] }
0x13d1   :  { %v9132_v28 = vpop.eup %9131 }
0x13d2   :  { %2587 = vrot.lane.b32.xlu0 %v9132_v28, %s9539_s28  ;;  %v10389_v28 = vld [vmem:[%s11969_s16] sm:$0xff] }
0x13d6   :  { %v9134_v30 = vpop.eup %9133 }
0x13d7   :  { %2693 = vrot.lane.b32.xlu1 %v9134_v30, %s9539_s28 }
0x1444   :  { %v2588_v31 = vpop.permute.xlu0 %2587 }
0x1445   :  { %v2590_v32 = vmul.f32 %v9128_v52, %v2588_v31 }
0x1447   :  { %2592 = vrot.lane.b32.xlu0 %v2590_v32, %s9540_s0 }
0x1449   :  { %v2694_v33 = vpop.permute.xlu1 %2693 }
0x144a   :  { %v2696_v34 = vmul.f32 %v9130_v18, %v2694_v33 }
0x144c   :  { %v2770_v37 = vrot.slane %v2696_v34, 2 }
0x144e   :  { %2771 = vrot.lane.b32.xlu1 %v2770_v37, %s9540_s0  ;;  %v10393_v37 = vld [vmem:[#allocation8] ss:$0 sm:$0xff] }
0x14b9   :  { %v2593_v39 = vpop.permute.xlu0 %2592 }
0x14ba   :  { %2595 = vst.msk [vmem:[#allocation2 + $0x8] sm:$0x3] %vm1482_vm8, %v2593_v39  ;;  %8616 = vmatmul.mubr.msk.f32.vlgmr.msra.gmra.mxu0 %vm1203_vm7, %v2593_v39 }
0x14bb   :  { %8630 = vmatpush3.msra.mxu0 %v10252_v38  ;;  %8637 = vmatprep.mubr.msk.f32.mxu0 %vm9537_vm0, %v9536_v0 }
0x14bc   :  { %8631 = vmatprep.subr.mxu0 %v9536_v0 }
0x14bd   :  { %8632 = vmatpush3.msra.mxu0 %v10261_v40 }
0x14be   :  { %8633 = vmatprep.subr.mxu0 %v9536_v0 }
0x14bf   :  { %8634 = vmatpush3.msra.mxu0 %v10268_v41 }
0x14c0   :  { %8635 = vmatprep.subr.mxu0 %v9536_v0  ;;  %v2772_v42 = vpop.permute.xlu1 %2771 }
0x14c1   :  { %8627 = vmatmul.mubr.msk.f32.vlgmr.msra.gmra.mxu1 %vm1203_vm7, %v2772_v42  ;;  %8636 = vmatpush3.msra.mxu0 %v10276_v43 }
0x14c2   :  { %8638 = vmatmul.mubr.msk.f32.vlgmr.msra.gmra.mxu0 %vm1203_vm7, %v2772_v42  ;;  %8641 = vmatpush3.msra.mxu1 %v9921_v7 }
0x14c3   :  { %8642 = vmatprep.subr.mxu1 %v9536_v0  ;;  %8651 = vmatprep.subr.mxu0 %v9536_v0 }
0x14c4   :  { %8643 = vmatpush3.msra.mxu1 %v9926_v8  ;;  %8652 = vmatpush3.msra.mxu0 %v9945_v11 }
0x14c5   :  { %8644 = vmatprep.subr.mxu1 %v9536_v0  ;;  %8653 = vmatprep.subr.mxu0 %v9536_v0 }
0x14c6   :  { %8645 = vmatpush3.msra.mxu1 %v9933_v9  ;;  %8654 = vmatpush3.msra.mxu0 %v9954_v12 }
0x14c7   :  { %8646 = vmatprep.subr.mxu1 %v9536_v0  ;;  %8648 = vmatprep.mubr.msk.f32.mxu1 %vm9537_vm0, %v9536_v0 }
0x14c8   :  { %8647 = vmatpush3.msra.mxu1 %v9940_v10  ;;  %8655 = vmatprep.subr.mxu0 %v9536_v0 }
0x14c9   :  { %8662 = vmatprep.subr.mxu1 %v9536_v0  ;;  %8656 = vmatpush3.msra.mxu0 %v9963_v13 }
0x14ca   :  { %8657 = vmatprep.subr.mxu0 %v9536_v0  ;;  %8659 = vmatprep.mubr.msk.f32.mxu0 %vm9537_vm0, %v9536_v0 }
0x14cb   :  { %8658 = vmatpush3.msra.mxu0 %v9970_v14 }
0x14cc   :  { %8673 = vmatprep.subr.mxu0 %v9536_v0 }
0x157a   :  { %v2765_v7 = vpop.f32.mrf.mxu0 }
0x157c   :  { %v8617_v8 = vpop.f32.mrf.mxu0 }
0x1581   :  { %v2841_v9 = vpop.f32.mrf.mxu1 }
0x1582   :  { %v2842_v11 = vadd.f32 %v2841_v9, %v2765_v7  ;;  %v2941_v10 = vpop.f32.mrf.mxu0 }
0x1583   :  { %v2946_v12 = vrot.slane %v2941_v10, 4  ;;  %v8628_v44 = vpop.f32.mrf.mxu1 }
0x1584   :  { %v2845_v45 = vadd.f32 %v10016_v29, %v2842_v11  ;;  %v8639_v46 = vpop.f32.mrf.mxu0 }
0x1585   :  { %v2948_v13 = vadd.f32 %v2946_v12, %v10176_v15 }
0x1586   :  { %9135 = vtanh.f32 %v2845_v45  ;;  %v7884_v14 = vmul.f32 -1.442695, %v2845_v45 }
0x1587   :  { %9137 = vtanh.f32 %v2948_v13  ;;  %v7886_v49 = vmul.f32 -1.442695, %v2948_v13 }
0x1588   :  { %9139 = vpow2.f32 %v7884_v14 }
0x1589   :  { %9141 = vpow2.f32 %v7886_v49 }
0x1593   :  { %v9136_v47 = vpop.eup %9135 }
0x1594   :  { %v9138_v48 = vpop.eup %9137  ;;  %2855 = vrot.lane.b32.xlu0 %v9136_v47, %s9539_s28 }
0x1595   :  { %2961 = vrot.lane.b32.xlu1 %v9138_v48, %s9539_s28  ;;  %v9140_v50 = vpop.eup %9139 }
0x1596   :  { %v9142_v62 = vpop.eup %9141  ;;  %v2849_v2 = vadd.f32 1.0, %v9140_v50 }
0x1597   :  { %v2952_v3 = vadd.f32 1.0, %v9142_v62 }
0x1598   :  { %9143 = vrcp.f32 %v2849_v2 }
0x1599   :  { %9145 = vrcp.f32 %v2952_v3 }
0x15a5   :  { %v9144_v29 = vpop.eup %9143 }
0x15a6   :  { %v9146_v51 = vpop.eup %9145  ;;  %v2853_v58 = vmul.f32 %v9144_v29, %v10236_v23  ;;  %v10349_v23 = vld [vmem:[%s11970_s17 + $0x8] sm:$0xff] }
0x15a7   :  { %v2959_v60 = vmul.f32 %v9146_v51, %v2957_v53 }
0x1606   :  { %v2856_v4 = vpop.permute.xlu0 %2855 }
0x1607   :  { %v2858_v54 = vmul.f32 %v9144_v29, %v2856_v4  ;;  %v2962_v55 = vpop.permute.xlu1 %2961 }
0x1608   :  { %v2964_v57 = vmul.f32 %v9146_v51, %v2962_v55 }
0x1609   :  { %2860 = vrot.lane.b32.xlu0 %v2858_v54, %s9540_s0 }
0x160a   :  { %2966 = vrot.lane.b32.xlu1 %v2964_v57, %s9540_s0 }
0x167b   :  { %v2861_v59 = vpop.permute.xlu0 %2860 }
0x167c   :  { %v10309_v61 = vadd.f32 %v2861_v59, %v2853_v58  ;;  %v2967_v63 = vpop.permute.xlu1 %2966 }
0x167d   :  { %v10311_v5 = vadd.f32 %v2967_v63, %v2959_v60 }
0x167e   :  { %9147 = vtanh.f32 %v10309_v61 }
0x167f   :  { %9149 = vtanh.f32 %v10311_v5  ;;  %v3236_v4 = vrot.slane %v10311_v5, 6 }
0x168b   :  { %v9148_v1 = vpop.eup %9147 }
0x168c   :  { %v9150_v56 = vpop.eup %9149  ;;  %2866 = vrot.lane.b32.xlu0 %v9148_v1, %s9539_s28 }
0x168d   :  { %2972 = vrot.lane.b32.xlu1 %v9150_v56, %s9539_s28 }
0x16fe   :  { %v2867_v6 = vpop.permute.xlu0 %2866 }
0x16ff   :  { %v2869_v52 = vmul.f32 %v9144_v29, %v2867_v6  ;;  %v2973_v16 = vpop.permute.xlu1 %2972 }
0x1700   :  { %v2975_v17 = vmul.f32 %v9146_v51, %v2973_v16 }
0x1701   :  { %2871 = vrot.lane.b32.xlu0 %v2869_v52, %s9540_s0  ;;  %v10447_v52 = vld [vmem:[#allocation6] ss:$0 sm:$0xff] }
0x1702   :  { %v3049_v18 = vrot.slane %v2975_v17, 4  ;;  %v10451_v16 = vadd.f32 %v10447_v52, %v10014_v26 }
0x1704   :  { %3050 = vrot.lane.b32.xlu1 %v3049_v18, %s9540_s0 }
0x1773   :  { %v2872_v19 = vpop.permute.xlu0 %2871 }
0x1774   :  { %2874 = vst.msk [vmem:[#allocation2 + $0xa] sm:$0x3] %vm1482_vm8, %v2872_v19  ;;  %8649 = vmatmul.mubr.msk.f32.vlgmr.msra.gmra.mxu1 %vm1203_vm7, %v2872_v19 }
0x1775   :  { %8663 = vmatpush3.msra.mxu1 %v10252_v38  ;;  %8670 = vmatprep.mubr.msk.f32.mxu1 %vm9537_vm0, %v9536_v0 }
0x1776   :  { %8664 = vmatprep.subr.mxu1 %v9536_v0  ;;  %v3051_v20 = vpop.permute.xlu1 %3050 }
0x1777   :  { %8665 = vmatpush3.msra.mxu1 %v10261_v40  ;;  %8660 = vmatmul.mubr.msk.f32.vlgmr.msra.gmra.mxu0 %vm1203_vm7, %v3051_v20 }
0x1778   :  { %8666 = vmatprep.subr.mxu1 %v9536_v0  ;;  %8674 = vmatpush3.msra.mxu0 %v10331_v21 }
0x1779   :  { %8667 = vmatpush3.msra.mxu1 %v10268_v41  ;;  %8675 = vmatprep.subr.mxu0 %v9536_v0 }
0x177a   :  { %8668 = vmatprep.subr.mxu1 %v9536_v0  ;;  %8676 = vmatpush3.msra.mxu0 %v10340_v22 }
0x177b   :  { %8669 = vmatpush3.msra.mxu1 %v10276_v43  ;;  %8677 = vmatprep.subr.mxu0 %v9536_v0 }
0x177c   :  { %8671 = vmatmul.mubr.msk.f32.vlgmr.msra.gmra.mxu1 %vm1203_vm7, %v3051_v20  ;;  %8678 = vmatpush3.msra.mxu0 %v10349_v23 }
0x177d   :  { %8679 = vmatprep.subr.mxu0 %v9536_v0  ;;  %8684 = vmatprep.subr.mxu1 %v9536_v0 }
0x177e   :  { %8680 = vmatpush3.msra.mxu0 %v10357_v24  ;;  %8681 = vmatprep.mubr.msk.f32.mxu0 %vm9537_vm0, %v9536_v0 }
0x177f   :  { %8685 = vmatpush3.msra.mxu1 %v10365_v35  ;;  %8695 = vmatprep.subr.mxu0 %v9536_v0 }
0x1780   :  { %8686 = vmatprep.subr.mxu1 %v9536_v0  ;;  %8692 = vmatprep.mubr.msk.f32.mxu1 %vm9537_vm0, %v9536_v0 }
0x1781   :  { %8687 = vmatpush3.msra.mxu1 %v10375_v36 }
0x1782   :  { %8688 = vmatprep.subr.mxu1 %v9536_v0 }
0x1783   :  { %8689 = vmatpush3.msra.mxu1 %v10382_v27 }
0x1784   :  { %8690 = vmatprep.subr.mxu1 %v9536_v0 }
0x1785   :  { %8691 = vmatpush3.msra.mxu1 %v10389_v28 }
0x1786   :  { %8706 = vmatprep.subr.mxu1 %v9536_v0 }
0x1834   :  { %v3044_v30 = vpop.f32.mrf.mxu1 }
0x1836   :  { %v8650_v31 = vpop.f32.mrf.mxu1 }
0x1837   :  { %v3120_v32 = vpop.f32.mrf.mxu0 }
0x1838   :  { %v3121_v33 = vadd.f32 %v3120_v32, %v3044_v30 }
0x1839   :  { %v8661_v34 = vpop.f32.mrf.mxu0 }
0x183a   :  { %v3124_v39 = vadd.f32 %v10393_v37, %v3121_v33 }
0x183c   :  { %9151 = vtanh.f32 %v3124_v39  ;;  %v3220_v42 = vpop.f32.mrf.mxu1  ;;  %v7889_v12 = vmul.f32 -1.442695, %v3124_v39 }
0x183d   :  { %v3225_v7 = vrot.slane %v3220_v42, 2 }
0x183e   :  { %v8672_v8 = vpop.f32.mrf.mxu1 }
0x183f   :  { %v3227_v9 = vadd.f32 %v3225_v7, %v10176_v15 }
0x1841   :  { %9153 = vtanh.f32 %v3227_v9  ;;  %v7891_v44 = vmul.f32 -1.442695, %v3227_v9 }
0x1842   :  { %9155 = vpow2.f32 %v7889_v12 }
0x1843   :  { %9157 = vpow2.f32 %v7891_v44 }
0x1849   :  { %v9152_v11 = vpop.eup %9151 }
0x184a   :  { %3134 = vrot.lane.b32.xlu1 %v9152_v11, %s9539_s28 }
0x184e   :  { %v9154_v10 = vpop.eup %9153 }
0x184f   :  { %3240 = vrot.lane.b32.xlu0 %v9154_v10, %s9539_s28  ;;  %v9156_v45 = vpop.eup %9155 }
0x1850   :  { %v3128_v46 = vadd.f32 1.0, %v9156_v45  ;;  %v9158_v13 = vpop.eup %9157 }
0x1851   :  { %v3231_v47 = vadd.f32 1.0, %v9158_v13 }
0x1852   :  { %9159 = vrcp.f32 %v3128_v46 }
0x1853   :  { %9161 = vrcp.f32 %v3231_v47 }
0x185f   :  { %v9160_v48 = vpop.eup %9159 }
0x1860   :  { %v9162_v49 = vpop.eup %9161  ;;  %v3132_v2 = vmul.f32 %v9160_v48, %v10309_v61 }
0x1861   :  { %v3238_v51 = vmul.f32 %v9162_v49, %v3236_v4 }
0x18bc   :  { %v3135_v14 = vpop.permute.xlu1 %3134 }
0x18bd   :  { %v3137_v15 = vmul.f32 %v9160_v48, %v3135_v14 }
0x18bf   :  { %3139 = vrot.lane.b32.xlu1 %v3137_v15, %s9540_s0 }
0x18c1   :  { %v3241_v50 = vpop.permute.xlu0 %3240 }
0x18c2   :  { %v3243_v62 = vmul.f32 %v9162_v49, %v3241_v50 }
0x18c4   :  { %3245 = vrot.lane.b32.xlu0 %v3243_v62, %s9540_s0 }
0x1931   :  { %v3140_v3 = vpop.permute.xlu1 %3139 }
0x1932   :  { %v10402_v29 = vadd.f32 %v3140_v3, %v3132_v2 }
0x1934   :  { %9163 = vtanh.f32 %v10402_v29 }
0x1936   :  { %v3246_v54 = vpop.permute.xlu0 %3245 }
0x1937   :  { %v10406_v55 = vadd.f32 %v3246_v54, %v3238_v51 }
0x1939   :  { %9165 = vtanh.f32 %v10406_v55  ;;  %v3512_v13 = vrot.slane %v10406_v55, 6 }
0x1941   :  { %v9164_v57 = vpop.eup %9163 }
0x1942   :  { %3145 = vrot.lane.b32.xlu1 %v9164_v57, %s9539_s28 }
0x1946   :  { %v9166_v53 = vpop.eup %9165 }
0x1947   :  { %3251 = vrot.lane.b32.xlu0 %v9166_v53, %s9539_s28 }
0x19b4   :  { %v3146_v58 = vpop.permute.xlu1 %3145 }
0x19b5   :  { %v3148_v59 = vmul.f32 %v9160_v48, %v3146_v58 }
0x19b7   :  { %3150 = vrot.lane.b32.xlu0 %v3148_v59, %s9540_s0 }
0x19b9   :  { %v3252_v60 = vpop.permute.xlu0 %3251 }
0x19ba   :  { %v3254_v61 = vmul.f32 %v9162_v49, %v3252_v60 }
0x19bc   :  { %v3328_v63 = vrot.slane %v3254_v61, 6 }
0x19be   :  { %3329 = vrot.lane.b32.xlu1 %v3328_v63, %s9540_s0 }
0x1a29   :  { %v3151_v5 = vpop.permute.xlu0 %3150 }
0x1a2a   :  { %3153 = vst.msk [vmem:[#allocation2 + $0xc] sm:$0x3] %vm1482_vm8, %v3151_v5  ;;  %8682 = vmatmul.mubr.msk.f32.vlgmr.msra.gmra.mxu0 %vm1203_vm7, %v3151_v5 }
0x1a2b   :  { %8696 = vmatpush3.msra.mxu0 %v10252_v38  ;;  %8703 = vmatprep.mubr.msk.f32.mxu0 %vm9537_vm0, %v9536_v0 }
0x1a2c   :  { %8697 = vmatprep.subr.mxu0 %v9536_v0 }
0x1a2d   :  { %8698 = vmatpush3.msra.mxu0 %v10261_v40 }
0x1a2e   :  { %8699 = vmatprep.subr.mxu0 %v9536_v0 }
0x1a2f   :  { %8700 = vmatpush3.msra.mxu0 %v10268_v41 }
0x1a30   :  { %v3330_v1 = vpop.permute.xlu1 %3329  ;;  %8701 = vmatprep.subr.mxu0 %v9536_v0 }
0x1a31   :  { %8693 = vmatmul.mubr.msk.f32.vlgmr.msra.gmra.mxu1 %vm1203_vm7, %v3330_v1  ;;  %8702 = vmatpush3.msra.mxu0 %v10276_v43 }
0x1a32   :  { %8704 = vmatmul.mubr.msk.f32.vlgmr.msra.gmra.mxu0 %vm1203_vm7, %v3330_v1  ;;  %8717 = vmatprep.subr.mxu0 %v9536_v0 }
0x1a33   :  { %8707 = vmatpush3.msra.mxu1 %v10331_v21  ;;  %8718 = vmatpush3.msra.mxu0 %v10365_v35 }
0x1a34   :  { %8708 = vmatprep.subr.mxu1 %v9536_v0  ;;  %8719 = vmatprep.subr.mxu0 %v9536_v0 }
0x1a35   :  { %8709 = vmatpush3.msra.mxu1 %v10340_v22  ;;  %8720 = vmatpush3.msra.mxu0 %v10375_v36 }
0x1a36   :  { %8710 = vmatprep.subr.mxu1 %v9536_v0  ;;  %8721 = vmatprep.subr.mxu0 %v9536_v0 }
0x1a37   :  { %8711 = vmatpush3.msra.mxu1 %v10349_v23  ;;  %8722 = vmatpush3.msra.mxu0 %v10382_v27 }
0x1a38   :  { %8712 = vmatprep.subr.mxu1 %v9536_v0  ;;  %8723 = vmatprep.subr.mxu0 %v9536_v0 }
0x1a39   :  { %8713 = vmatpush3.msra.mxu1 %v10357_v24  ;;  %8724 = vmatpush3.msra.mxu0 %v10389_v28 }
0x1a3a   :  { %8725 = vmatprep.mubr.msk.f32.mxu0 %vm9537_vm0, %v9536_v0  ;;  %8714 = vmatprep.mubr.msk.f32.mxu1 %vm9537_vm0, %v9536_v0 }
0x1a3b   :  { %8728 = vmatprep.subr.mxu1 %v9536_v0  ;;  %8739 = vmatprep.subr.mxu0 %v9536_v0 }
0x1aea   :  { %v3323_v56 = vpop.f32.mrf.mxu0 }
0x1aec   :  { %v8683_v6 = vpop.f32.mrf.mxu0 }
0x1af1   :  { %v3399_v17 = vpop.f32.mrf.mxu1 }
0x1af2   :  { %v3400_v18 = vadd.f32 %v3399_v17, %v3323_v56  ;;  %v3499_v19 = vpop.f32.mrf.mxu0 }
0x1af3   :  { %v3503_v20 = vadd.f32 %v3499_v19, %v10451_v16  ;;  %v8694_v30 = vpop.f32.mrf.mxu1 }
0x1af4   :  { %v3403_v31 = vadd.f32 %v10393_v37, %v3400_v18  ;;  %v8705_v32 = vpop.f32.mrf.mxu0 }
0x1af5   :  { %9167 = vtanh.f32 %v3503_v20  ;;  %v7896_v39 = vmul.f32 -1.442695, %v3503_v20 }
0x1af6   :  { %9169 = vtanh.f32 %v3403_v31  ;;  %v7894_v26 = vmul.f32 -1.442695, %v3403_v31 }
0x1af7   :  { %9171 = vpow2.f32 %v7896_v39 }
0x1af8   :  { %9173 = vpow2.f32 %v7894_v26 }
0x1b02   :  { %v9168_v33 = vpop.eup %9167 }
0x1b03   :  { %v9170_v34 = vpop.eup %9169  ;;  %3516 = vrot.lane.b32.xlu1 %v9168_v33, %s9539_s28 }
0x1b04   :  { %3413 = vrot.lane.b32.xlu0 %v9170_v34, %s9539_s28  ;;  %v9172_v42 = vpop.eup %9171 }
0x1b05   :  { %v9174_v7 = vpop.eup %9173  ;;  %v3507_v8 = vadd.f32 1.0, %v9172_v42 }
0x1b06   :  { %v3407_v9 = vadd.f32 1.0, %v9174_v7 }
0x1b07   :  { %9175 = vrcp.f32 %v3507_v8 }
0x1b08   :  { %9177 = vrcp.f32 %v3407_v9 }
0x1b14   :  { %v9176_v11 = vpop.eup %9175 }
0x1b15   :  { %v9178_v12 = vpop.eup %9177  ;;  %v3514_v47 = vmul.f32 %v9176_v11, %v3512_v13 }
0x1b16   :  { %v3411_v14 = vmul.f32 %v9178_v12, %v10402_v29 }
0x1b75   :  { %v3517_v10 = vpop.permute.xlu1 %3516 }
0x1b76   :  { %v3519_v44 = vmul.f32 %v9176_v11, %v3517_v10  ;;  %v3414_v45 = vpop.permute.xlu0 %3413 }
0x1b77   :  { %v3416_v46 = vmul.f32 %v9178_v12, %v3414_v45 }
0x1b78   :  { %3521 = vrot.lane.b32.xlu1 %v3519_v44, %s9540_s0 }
0x1b79   :  { %3418 = vrot.lane.b32.xlu0 %v3416_v46, %s9540_s0 }
0x1bea   :  { %v3522_v48 = vpop.permute.xlu1 %3521 }
0x1beb   :  { %v10461_v15 = vadd.f32 %v3522_v48, %v3514_v47  ;;  %v3419_v49 = vpop.permute.xlu0 %3418 }
0x1bec   :  { %v10463_v50 = vadd.f32 %v3419_v49, %v3411_v14 }
0x1bed   :  { %9179 = vtanh.f32 %v10461_v15  ;;  %v3790_v10 = vrot.slane %v10461_v15, 6 }
0x1bee   :  { %9181 = vtanh.f32 %v10463_v50 }
0x1bfa   :  { %v9180_v62 = vpop.eup %9179 }
0x1bfb   :  { %v9182_v2 = vpop.eup %9181  ;;  %3527 = vrot.lane.b32.xlu1 %v9180_v62, %s9539_s28 }
0x1bfc   :  { %3424 = vrot.lane.b32.xlu0 %v9182_v2, %s9539_s28 }
0x1c6d   :  { %v3528_v3 = vpop.permute.xlu1 %3527 }
0x1c6e   :  { %v3530_v4 = vmul.f32 %v9176_v11, %v3528_v3  ;;  %v3425_v51 = vpop.permute.xlu0 %3424 }
0x1c6f   :  { %v3427_v54 = vmul.f32 %v9178_v12, %v3425_v51 }
0x1c70   :  { %3604 = vrot.lane.b32.xlu1 %v3530_v4, %s9540_s0 }
0x1c71   :  { %3429 = vrot.lane.b32.xlu0 %v3427_v54, %s9540_s0 }
0x1ce2   :  { %v3605_v29 = vpop.permute.xlu1 %3604 }
0x1ce3   :  { %v3430_v55 = vpop.permute.xlu0 %3429  ;;  %8726 = vmatmul.mubr.msk.f32.vlgmr.msra.gmra.mxu0 %vm1203_vm7, %v3605_v29 }
0x1ce4   :  { %3432 = vst.msk [vmem:[#allocation2 + $0xe] sm:$0x3] %vm1482_vm8, %v3430_v55  ;;  %8715 = vmatmul.mubr.msk.f32.vlgmr.msra.gmra.mxu1 %vm1203_vm7, %v3430_v55  ;;  %8740 = vmatpush3.msra.mxu0 %v10331_v21 }
0x1ce5   :  { %8729 = vmatpush3.msra.mxu1 %v10252_v38  ;;  %8736 = vmatprep.mubr.msk.f32.mxu1 %vm9537_vm0, %v9536_v0 }
0x1ce6   :  { %8730 = vmatprep.subr.mxu1 %v9536_v0  ;;  %8741 = vmatprep.subr.mxu0 %v9536_v0 }
0x1ce7   :  { %8731 = vmatpush3.msra.mxu1 %v10261_v40  ;;  %8742 = vmatpush3.msra.mxu0 %v10340_v22 }
0x1ce8   :  { %8732 = vmatprep.subr.mxu1 %v9536_v0  ;;  %8743 = vmatprep.subr.mxu0 %v9536_v0 }
0x1ce9   :  { %8733 = vmatpush3.msra.mxu1 %v10268_v41  ;;  %8744 = vmatpush3.msra.mxu0 %v10349_v23 }
0x1cea   :  { %8734 = vmatprep.subr.mxu1 %v9536_v0  ;;  %8745 = vmatprep.subr.mxu0 %v9536_v0 }
0x1ceb   :  { %8735 = vmatpush3.msra.mxu1 %v10276_v43  ;;  %8746 = vmatpush3.msra.mxu0 %v10357_v24 }
0x1cec   :  { %8737 = vmatmul.mubr.msk.f32.vlgmr.msra.gmra.mxu1 %vm1203_vm7, %v3605_v29  ;;  %8747 = vmatprep.mubr.msk.f32.mxu0 %vm9537_vm0, %v9536_v0 }
0x1ced   :  { %8750 = vmatprep.subr.mxu1 %v9536_v0  ;;  %8761 = vmatprep.subr.mxu0 %v9536_v0 }
0x1cee   :  { %8751 = vmatpush3.msra.mxu1 %v10365_v35  ;;  %8758 = vmatprep.mubr.msk.f32.mxu1 %vm9537_vm0, %v9536_v0 }
0x1cef   :  { %8752 = vmatprep.subr.mxu1 %v9536_v0 }
0x1cf0   :  { %8753 = vmatpush3.msra.mxu1 %v10375_v36 }
0x1cf1   :  { %8754 = vmatprep.subr.mxu1 %v9536_v0 }
0x1cf2   :  { %8755 = vmatpush3.msra.mxu1 %v10382_v27 }
0x1cf3   :  { %8756 = vmatprep.subr.mxu1 %v9536_v0 }
0x1cf4   :  { %8757 = vmatpush3.msra.mxu1 %v10389_v28 }
0x1cf5   :  { %8772 = vmatprep.subr.mxu1 %v9536_v0 }
0x1da3   :  { %v3674_v57 = vpop.f32.mrf.mxu0 }
0x1da4   :  { %v3599_v53 = vpop.f32.mrf.mxu1 }
0x1da5   :  { %v3675_v58 = vadd.f32 %v3674_v57, %v3599_v53  ;;  %v8727_v59 = vpop.f32.mrf.mxu0 }
0x1da6   :  { %v8716_v60 = vpop.f32.mrf.mxu1 }
0x1da7   :  { %v3678_v61 = vadd.f32 %v10393_v37, %v3675_v58 }
0x1da9   :  { %9183 = vtanh.f32 %v3678_v61  ;;  %v7899_v18 = vmul.f32 -1.442695, %v3678_v61 }
0x1dac   :  { %v3774_v63 = vpop.f32.mrf.mxu1 }
0x1dad   :  { %v3779_v5 = vrot.slane %v3774_v63, 6 }
0x1dae   :  { %v8738_v1 = vpop.f32.mrf.mxu1 }
0x1daf   :  { %v3781_v56 = vadd.f32 %v3779_v5, %v10451_v16 }
0x1db1   :  { %9185 = vtanh.f32 %v3781_v56  ;;  %v7901_v19 = vmul.f32 -1.442695, %v3781_v56 }
0x1db2   :  { %9187 = vpow2.f32 %v7899_v18 }
0x1db3   :  { %9189 = vpow2.f32 %v7901_v19 }
0x1db6   :  { %v9184_v6 = vpop.eup %9183 }
0x1db7   :  { %3688 = vrot.lane.b32.xlu0 %v9184_v6, %s9539_s28 }
0x1dbe   :  { %v9186_v17 = vpop.eup %9185 }
0x1dbf   :  { %3794 = vrot.lane.b32.xlu1 %v9186_v17, %s9539_s28  ;;  %v9188_v20 = vpop.eup %9187 }
0x1dc0   :  { %v3682_v30 = vadd.f32 1.0, %v9188_v20  ;;  %v9190_v31 = vpop.eup %9189 }
0x1dc1   :  { %v3785_v32 = vadd.f32 1.0, %v9190_v31 }
0x1dc2   :  { %9191 = vrcp.f32 %v3682_v30 }
0x1dc3   :  { %9193 = vrcp.f32 %v3785_v32 }
0x1dcf   :  { %v9192_v33 = vpop.eup %9191 }
0x1dd0   :  { %v9194_v26 = vpop.eup %9193  ;;  %v3686_v8 = vmul.f32 %v9192_v33, %v10463_v50 }
0x1dd1   :  { %v3792_v12 = vmul.f32 %v9194_v26, %v3790_v10 }
0x1e29   :  { %v3689_v34 = vpop.permute.xlu0 %3688 }
0x1e2a   :  { %v3691_v39 = vmul.f32 %v9192_v33, %v3689_v34 }
0x1e2c   :  { %3693 = vrot.lane.b32.xlu0 %v3691_v39, %s9540_s0 }
0x1e31   :  { %v3795_v42 = vpop.permute.xlu1 %3794 }
0x1e32   :  { %v3797_v7 = vmul.f32 %v9194_v26, %v3795_v42 }
0x1e34   :  { %3799 = vrot.lane.b32.xlu1 %v3797_v7, %s9540_s0 }
0x1e9e   :  { %v3694_v9 = vpop.permute.xlu0 %3693 }
0x1e9f   :  { %v10512_v11 = vadd.f32 %v3694_v9, %v3686_v8 }
0x1ea1   :  { %9195 = vtanh.f32 %v10512_v11 }
0x1ea6   :  { %v3800_v44 = vpop.permute.xlu1 %3799 }
0x1ea7   :  { %v10516_v45 = vadd.f32 %v3800_v44, %v3792_v12 }
0x1ea9   :  { %9197 = vtanh.f32 %v10516_v45  ;;  %v4069_v32 = vrot.slane %v10516_v45, 6 }
0x1eae   :  { %v9196_v46 = vpop.eup %9195 }
0x1eaf   :  { %3699 = vrot.lane.b32.xlu0 %v9196_v46, %s9539_s28 }
0x1eb6   :  { %v9198_v13 = vpop.eup %9197 }
0x1eb7   :  { %3805 = vrot.lane.b32.xlu1 %v9198_v13, %s9539_s28 }
0x1f21   :  { %v3700_v47 = vpop.permute.xlu0 %3699 }
0x1f22   :  { %v3702_v48 = vmul.f32 %v9192_v33, %v3700_v47 }
0x1f24   :  { %3704 = vrot.lane.b32.xlu0 %v3702_v48, %s9540_s0 }
0x1f29   :  { %v3806_v14 = vpop.permute.xlu1 %3805 }
0x1f2a   :  { %v3808_v49 = vmul.f32 %v9194_v26, %v3806_v14 }
0x1f2c   :  { %v3882_v50 = vrot.slane %v3808_v49, 2 }
0x1f2e   :  { %3883 = vrot.lane.b32.xlu1 %v3882_v50, %s9540_s0 }
0x1f96   :  { %v3705_v15 = vpop.permute.xlu0 %3704 }
0x1f97   :  { %3707 = vst.msk [vmem:[#allocation2 + $0x10] sm:$0x3] %vm1482_vm8, %v3705_v15  ;;  %8748 = vmatmul.mubr.msk.f32.vlgmr.msra.gmra.mxu0 %vm1203_vm7, %v3705_v15 }
0x1f98   :  { %8762 = vmatpush3.msra.mxu0 %v10252_v38  ;;  %8769 = vmatprep.mubr.msk.f32.mxu0 %vm9537_vm0, %v9536_v0 }
0x1f99   :  { %8763 = vmatprep.subr.mxu0 %v9536_v0 }
0x1f9a   :  { %8764 = vmatpush3.msra.mxu0 %v10261_v40 }
0x1f9b   :  { %8765 = vmatprep.subr.mxu0 %v9536_v0 }
0x1f9c   :  { %8766 = vmatpush3.msra.mxu0 %v10268_v41 }
0x1f9d   :  { %8767 = vmatprep.subr.mxu0 %v9536_v0 }
0x1f9e   :  { %8768 = vmatpush3.msra.mxu0 %v10276_v43 }
0x1f9f   :  { %8783 = vmatprep.subr.mxu0 %v9536_v0 }
0x1fa0   :  { %v3884_v62 = vpop.permute.xlu1 %3883 }
0x1fa1   :  { %8759 = vmatmul.mubr.msk.f32.vlgmr.msra.gmra.mxu1 %vm1203_vm7, %v3884_v62  ;;  %8770 = vmatmul.mubr.msk.f32.vlgmr.msra.gmra.mxu0 %vm1203_vm7, %v3884_v62 }
0x1fa2   :  { %8773 = vmatpush3.msra.mxu1 %v10331_v21  ;;  %8784 = vmatpush3.msra.mxu0 %v10365_v35 }
0x1fa3   :  { %8774 = vmatprep.subr.mxu1 %v9536_v0  ;;  %8785 = vmatprep.subr.mxu0 %v9536_v0 }
0x1fa4   :  { %8775 = vmatpush3.msra.mxu1 %v10340_v22  ;;  %8786 = vmatpush3.msra.mxu0 %v10375_v36 }
0x1fa5   :  { %8776 = vmatprep.subr.mxu1 %v9536_v0  ;;  %8787 = vmatprep.subr.mxu0 %v9536_v0 }
0x1fa6   :  { %8777 = vmatpush3.msra.mxu1 %v10349_v23  ;;  %8780 = vmatprep.mubr.msk.f32.mxu1 %vm9537_vm0, %v9536_v0 }
0x1fa7   :  { %8778 = vmatprep.subr.mxu1 %v9536_v0  ;;  %8788 = vmatpush3.msra.mxu0 %v10382_v27 }
0x1fa8   :  { %8779 = vmatpush3.msra.mxu1 %v10357_v24  ;;  %8789 = vmatprep.subr.mxu0 %v9536_v0 }
0x1fa9   :  { %8794 = vmatprep.subr.mxu1 %v9536_v0  ;;  %8790 = vmatpush3.msra.mxu0 %v10389_v28 }
0x1faa   :  { %8791 = vmatprep.mubr.msk.f32.mxu0 %vm9537_vm0, %v9536_v0  ;;  %8805 = vmatprep.subr.mxu0 %v9536_v0 }
0x2057   :  { %v3877_v2 = vpop.f32.mrf.mxu0 }
0x2059   :  { %v8749_v3 = vpop.f32.mrf.mxu0 }
0x2061   :  { %v3953_v4 = vpop.f32.mrf.mxu1  ;;  %v4053_v51 = vpop.f32.mrf.mxu0 }
0x2062   :  { %v3954_v54 = vadd.f32 %v3953_v4, %v3877_v2  ;;  %v4058_v29 = vrot.slane %v4053_v51, 4 }
0x2063   :  { %v8760_v55 = vpop.f32.mrf.mxu1  ;;  %v8771_v57 = vpop.f32.mrf.mxu0 }
0x2064   :  { %v3957_v53 = vadd.f32 %v10393_v37, %v3954_v54  ;;  %v4060_v58 = vadd.f32 %v4058_v29, %v10451_v16 }
0x2066   :  { %9199 = vtanh.f32 %v3957_v53  ;;  %v7904_v61 = vmul.f32 -1.442695, %v3957_v53  ;;  %v7906_v63 = vmul.f32 -1.442695, %v4060_v58 }
0x2067   :  { %9201 = vtanh.f32 %v4060_v58 }
0x2068   :  { %9203 = vpow2.f32 %v7904_v61 }
0x2069   :  { %9205 = vpow2.f32 %v7906_v63 }
0x2073   :  { %v9200_v59 = vpop.eup %9199 }
0x2074   :  { %v9202_v60 = vpop.eup %9201  ;;  %3967 = vrot.lane.b32.xlu0 %v9200_v59, %s9539_s28 }
0x2075   :  { %4073 = vrot.lane.b32.xlu1 %v9202_v60, %s9539_s28  ;;  %v9204_v5 = vpop.eup %9203 }
0x2076   :  { %v9206_v1 = vpop.eup %9205  ;;  %v3961_v56 = vadd.f32 1.0, %v9204_v5 }
0x2077   :  { %v4064_v6 = vadd.f32 1.0, %v9206_v1 }
0x2078   :  { %9207 = vrcp.f32 %v3961_v56 }
0x2079   :  { %9209 = vrcp.f32 %v4064_v6 }
0x2085   :  { %v9208_v17 = vpop.eup %9207 }
0x2086   :  { %v9210_v19 = vpop.eup %9209  ;;  %v3965_v33 = vmul.f32 %v9208_v17, %v10512_v11 }
0x2087   :  { %v4071_v39 = vmul.f32 %v9210_v19, %v4069_v32 }
0x20e6   :  { %v3968_v18 = vpop.permute.xlu0 %3967 }
0x20e7   :  { %v3970_v20 = vmul.f32 %v9208_v17, %v3968_v18  ;;  %v4074_v30 = vpop.permute.xlu1 %4073 }
0x20e8   :  { %v4076_v31 = vmul.f32 %v9210_v19, %v4074_v30 }
0x20e9   :  { %3972 = vrot.lane.b32.xlu0 %v3970_v20, %s9540_s0 }
0x20ea   :  { %4078 = vrot.lane.b32.xlu1 %v4076_v31, %s9540_s0 }
0x215b   :  { %v3973_v34 = vpop.permute.xlu0 %3972 }
0x215c   :  { %v10565_v26 = vadd.f32 %v3973_v34, %v3965_v33  ;;  %v4079_v42 = vpop.permute.xlu1 %4078 }
0x215d   :  { %v10567_v7 = vadd.f32 %v4079_v42, %v4071_v39  ;;  %v10632_v39 = vld [vmem:[%s11967_s14 + $0x18] sm:$0xff]  ;;  %v10648_v42 = vld [vmem:[%s11967_s14 + $0x8] sm:$0xff] }
0x215e   :  { %9211 = vtanh.f32 %v10565_v26 }
0x215f   :  { %9213 = vtanh.f32 %v10567_v7  ;;  %v4348_v1 = vrot.slane %v10567_v7, 6 }
0x216b   :  { %v9212_v8 = vpop.eup %9211 }
0x216c   :  { %v9214_v9 = vpop.eup %9213  ;;  %3978 = vrot.lane.b32.xlu0 %v9212_v8, %s9539_s28  ;;  %v10655_v8 = vld [vmem:[%s11967_s14] sm:$0xff] }
0x216d   :  { %4084 = vrot.lane.b32.xlu1 %v9214_v9, %s9539_s28 }
0x21de   :  { %v3979_v10 = vpop.permute.xlu0 %3978 }
0x21df   :  { %v3981_v12 = vmul.f32 %v9208_v17, %v3979_v10  ;;  %v4085_v11 = vpop.permute.xlu1 %4084 }
0x21e0   :  { %v4087_v44 = vmul.f32 %v9210_v19, %v4085_v11 }
0x21e1   :  { %3983 = vrot.lane.b32.xlu0 %v3981_v12, %s9540_s0 }
0x21e2   :  { %v4161_v45 = vrot.slane %v4087_v44, 4 }
0x21e4   :  { %4162 = vrot.lane.b32.xlu1 %v4161_v45, %s9540_s0 }
0x2253   :  { %v3984_v46 = vpop.permute.xlu0 %3983 }
0x2254   :  { %3986 = vst.msk [vmem:[#allocation2 + $0x12] sm:$0x3] %vm1482_vm8, %v3984_v46  ;;  %8781 = vmatmul.mubr.msk.f32.vlgmr.msra.gmra.mxu1 %vm1203_vm7, %v3984_v46 }
0x2255   :  { %8795 = vmatpush3.msra.mxu1 %v10252_v38  ;;  %8802 = vmatprep.mubr.msk.f32.mxu1 %vm9537_vm0, %v9536_v0 }
0x2256   :  { %8796 = vmatprep.subr.mxu1 %v9536_v0  ;;  %v4163_v13 = vpop.permute.xlu1 %4162 }
0x2257   :  { %8792 = vmatmul.mubr.msk.f32.vlgmr.msra.gmra.mxu0 %vm1203_vm7, %v4163_v13  ;;  %8797 = vmatpush3.msra.mxu1 %v10261_v40 }
0x2258   :  { %8798 = vmatprep.subr.mxu1 %v9536_v0  ;;  %8806 = vmatpush3.msra.mxu0 %v10331_v21 }
0x2259   :  { %8799 = vmatpush3.msra.mxu1 %v10268_v41  ;;  %8807 = vmatprep.subr.mxu0 %v9536_v0 }
0x225a   :  { %8800 = vmatprep.subr.mxu1 %v9536_v0  ;;  %8808 = vmatpush3.msra.mxu0 %v10340_v22 }
0x225b   :  { %8801 = vmatpush3.msra.mxu1 %v10276_v43  ;;  %8809 = vmatprep.subr.mxu0 %v9536_v0 }
0x225c   :  { %8803 = vmatmul.mubr.msk.f32.vlgmr.msra.gmra.mxu1 %vm1203_vm7, %v4163_v13  ;;  %8810 = vmatpush3.msra.mxu0 %v10349_v23 }
0x225d   :  { %8811 = vmatprep.subr.mxu0 %v9536_v0  ;;  %8813 = vmatprep.mubr.msk.f32.mxu0 %vm9537_vm0, %v9536_v0 }
0x225e   :  { %8812 = vmatpush3.msra.mxu0 %v10357_v24  ;;  %8816 = vmatprep.subr.mxu1 %v9536_v0 }
0x225f   :  { %8827 = vmatprep.subr.mxu0 %v9536_v0  ;;  %8817 = vmatpush3.msra.mxu1 %v10365_v35 }
0x2260   :  { %8818 = vmatprep.subr.mxu1 %v9536_v0  ;;  %8824 = vmatprep.mubr.msk.f32.mxu1 %vm9537_vm0, %v9536_v0 }
0x2261   :  { %8819 = vmatpush3.msra.mxu1 %v10375_v36 }
0x2262   :  { %8820 = vmatprep.subr.mxu1 %v9536_v0 }
0x2263   :  { %8821 = vmatpush3.msra.mxu1 %v10382_v27 }
0x2264   :  { %8822 = vmatprep.subr.mxu1 %v9536_v0 }
0x2265   :  { %8823 = vmatpush3.msra.mxu1 %v10389_v28 }
0x2266   :  { %8838 = vmatprep.subr.mxu1 %v9536_v0 }
0x2314   :  { %v4156_v38 = vpop.f32.mrf.mxu1 }
0x2316   :  { %v8782_v40 = vpop.f32.mrf.mxu1 }
0x2317   :  { %v4232_v41 = vpop.f32.mrf.mxu0 }
0x2318   :  { %v4233_v43 = vadd.f32 %v4232_v41, %v4156_v38 }
0x2319   :  { %v8793_v47 = vpop.f32.mrf.mxu0 }
0x231a   :  { %v4236_v48 = vadd.f32 %v10393_v37, %v4233_v43 }
0x231c   :  { %9215 = vtanh.f32 %v4236_v48  ;;  %v4332_v14 = vpop.f32.mrf.mxu1  ;;  %v7909_v3 = vmul.f32 -1.442695, %v4236_v48 }
0x231d   :  { %v4337_v49 = vrot.slane %v4332_v14, 2 }
0x231e   :  { %v8804_v50 = vpop.f32.mrf.mxu1 }
0x231f   :  { %v4339_v15 = vadd.f32 %v4337_v49, %v10451_v16 }
0x2321   :  { %9217 = vtanh.f32 %v4339_v15  ;;  %v7911_v4 = vmul.f32 -1.442695, %v4339_v15 }
0x2322   :  { %9219 = vpow2.f32 %v7909_v3 }
0x2323   :  { %9221 = vpow2.f32 %v7911_v4 }
0x2329   :  { %v9216_v62 = vpop.eup %9215 }
0x232a   :  { %4246 = vrot.lane.b32.xlu1 %v9216_v62, %s9539_s28 }
0x232e   :  { %v9218_v2 = vpop.eup %9217 }
0x232f   :  { %4352 = vrot.lane.b32.xlu0 %v9218_v2, %s9539_s28  ;;  %v9220_v51 = vpop.eup %9219 }
0x2330   :  { %v4240_v54 = vadd.f32 1.0, %v9220_v51  ;;  %v9222_v29 = vpop.eup %9221 }
0x2331   :  { %v4343_v55 = vadd.f32 1.0, %v9222_v29 }
0x2332   :  { %9223 = vrcp.f32 %v4240_v54 }
0x2333   :  { %9225 = vrcp.f32 %v4343_v55 }
0x233f   :  { %v9224_v57 = vpop.eup %9223 }
0x2340   :  { %v9226_v58 = vpop.eup %9225  ;;  %v4244_v61 = vmul.f32 %v9224_v57, %v10565_v26  ;;  %v10641_v26 = vld [vmem:[%s11967_s14 + $0x10] sm:$0xff] }
0x2341   :  { %v4350_v56 = vmul.f32 %v9226_v58, %v4348_v1  ;;  %v10773_v1 = vld [vmem:[%s11969_s16] sm:$0xff] }
0x239c   :  { %v4247_v53 = vpop.permute.xlu1 %4246 }
0x239d   :  { %v4249_v16 = vmul.f32 %v9224_v57, %v4247_v53 }
0x239f   :  { %4251 = vrot.lane.b32.xlu1 %v4249_v16, %s9540_s0  ;;  %v10709_v16 = vld [vmem:[%s11970_s17 + $0x18] sm:$0xff] }
0x23a1   :  { %v4353_v59 = vpop.permute.xlu0 %4352 }
0x23a2   :  { %v4355_v60 = vmul.f32 %v9226_v58, %v4353_v59  ;;  %v10730_v59 = vld [vmem:[%s11970_s17 + $0x8] sm:$0xff] }
0x23a4   :  { %4357 = vrot.lane.b32.xlu0 %v4355_v60, %s9540_s0  ;;  %v10739_v60 = vld [vmem:[%s11970_s17] sm:$0xff] }
0x2411   :  { %v4252_v63 = vpop.permute.xlu1 %4251 }
0x2412   :  { %v10616_v5 = vadd.f32 %v4252_v63, %v4244_v61  ;;  %v10750_v61 = vld [vmem:[%s11969_s16 + $0x18] sm:$0xff]  ;;  %v10759_v63 = vld [vmem:[%s11969_s16 + $0x10] sm:$0xff] }
0x2414   :  { %9227 = vtanh.f32 %v10616_v5 }
0x2416   :  { %v4358_v6 = vpop.permute.xlu0 %4357 }
0x2417   :  { %v10620_v17 = vadd.f32 %v4358_v6, %v4350_v56 }
0x2419   :  { %9229 = vtanh.f32 %v10620_v17  ;;  %v4624_v48 = vrot.slane %v10620_v17, 6 }
0x2421   :  { %v9228_v18 = vpop.eup %9227 }
0x2422   :  { %4257 = vrot.lane.b32.xlu1 %v9228_v18, %s9539_s28 }
0x2426   :  { %v9230_v19 = vpop.eup %9229 }
0x2427   :  { %4363 = vrot.lane.b32.xlu0 %v9230_v19, %s9539_s28 }
0x2494   :  { %v4258_v20 = vpop.permute.xlu1 %4257 }
0x2495   :  { %v4260_v30 = vmul.f32 %v9224_v57, %v4258_v20  ;;  %v10777_v20 = vld [vmem:[#allocation8] ss:$0 sm:$0xff] }
0x2497   :  { %4262 = vrot.lane.b32.xlu0 %v4260_v30, %s9540_s0 }
0x2499   :  { %v4364_v31 = vpop.permute.xlu0 %4363 }
0x249a   :  { %v4366_v32 = vmul.f32 %v9226_v58, %v4364_v31  ;;  %v10721_v58 = vld [vmem:[%s11970_s17 + $0x10] sm:$0xff] }
0x249c   :  { %v4440_v33 = vrot.slane %v4366_v32, 6 }
0x249e   :  { %4441 = vrot.lane.b32.xlu1 %v4440_v33, %s9540_s0 }
0x2509   :  { %v4263_v34 = vpop.permute.xlu0 %4262 }
0x250a   :  { %4265 = vst.msk [vmem:[#allocation2 + $0x14] sm:$0x3] %vm1482_vm8, %v4263_v34  ;;  %8814 = vmatmul.mubr.msk.f32.vlgmr.msra.gmra.mxu0 %vm1203_vm7, %v4263_v34 }
0x250b   :  { %8828 = vmatpush3.msra.mxu0 %v10632_v39  ;;  %8835 = vmatprep.mubr.msk.f32.mxu0 %vm9537_vm0, %v9536_v0 }
0x250c   :  { %8829 = vmatprep.subr.mxu0 %v9536_v0 }
0x250d   :  { %8830 = vmatpush3.msra.mxu0 %v10641_v26 }
0x250e   :  { %8831 = vmatprep.subr.mxu0 %v9536_v0 }
0x250f   :  { %8832 = vmatpush3.msra.mxu0 %v10648_v42 }
0x2510   :  { %8833 = vmatprep.subr.mxu0 %v9536_v0  ;;  %v4442_v7 = vpop.permute.xlu1 %4441 }
0x2511   :  { %8834 = vmatpush3.msra.mxu0 %v10655_v8  ;;  %8825 = vmatmul.mubr.msk.f32.vlgmr.msra.gmra.mxu1 %vm1203_vm7, %v4442_v7 }
0x2512   :  { %8836 = vmatmul.mubr.msk.f32.vlgmr.msra.gmra.mxu0 %vm1203_vm7, %v4442_v7  ;;  %8849 = vmatprep.subr.mxu0 %v9536_v0 }
0x2513   :  { %8850 = vmatpush3.msra.mxu0 %v10365_v35  ;;  %8839 = vmatpush3.msra.mxu1 %v10331_v21 }
0x2514   :  { %8851 = vmatprep.subr.mxu0 %v9536_v0  ;;  %8840 = vmatprep.subr.mxu1 %v9536_v0 }
0x2515   :  { %8852 = vmatpush3.msra.mxu0 %v10375_v36  ;;  %8841 = vmatpush3.msra.mxu1 %v10340_v22 }
0x2516   :  { %8853 = vmatprep.subr.mxu0 %v9536_v0  ;;  %8842 = vmatprep.subr.mxu1 %v9536_v0 }
0x2517   :  { %8854 = vmatpush3.msra.mxu0 %v10382_v27  ;;  %8843 = vmatpush3.msra.mxu1 %v10349_v23  ;;  %v10683_v23 = vadd.f32 %v10447_v52, %v10012_v25 }
0x2518   :  { %8855 = vmatprep.subr.mxu0 %v9536_v0  ;;  %8844 = vmatprep.subr.mxu1 %v9536_v0 }
0x2519   :  { %8856 = vmatpush3.msra.mxu0 %v10389_v28  ;;  %8857 = vmatprep.mubr.msk.f32.mxu0 %vm9537_vm0, %v9536_v0 }
0x251a   :  { %8845 = vmatpush3.msra.mxu1 %v10357_v24  ;;  %8846 = vmatprep.mubr.msk.f32.mxu1 %vm9537_vm0, %v9536_v0 }
0x251b   :  { %8860 = vmatprep.subr.mxu1 %v9536_v0  ;;  %8871 = vmatprep.subr.mxu0 %v9536_v0 }
0x25ca   :  { %v4435_v21 = vpop.f32.mrf.mxu0 }
0x25cc   :  { %v8815_v22 = vpop.f32.mrf.mxu0 }
0x25d1   :  { %v4511_v35 = vpop.f32.mrf.mxu1 }
0x25d2   :  { %v4512_v36 = vadd.f32 %v4511_v35, %v4435_v21  ;;  %v4611_v27 = vpop.f32.mrf.mxu0 }
0x25d3   :  { %v4615_v28 = vadd.f32 %v4611_v27, %v10683_v23  ;;  %v8826_v9 = vpop.f32.mrf.mxu1 }
0x25d4   :  { %v4515_v24 = vadd.f32 %v10393_v37, %v4512_v36  ;;  %v8837_v10 = vpop.f32.mrf.mxu0 }
0x25d5   :  { %9231 = vtanh.f32 %v4615_v28  ;;  %v7916_v44 = vmul.f32 -1.442695, %v4615_v28 }
0x25d6   :  { %9233 = vtanh.f32 %v4515_v24  ;;  %v7914_v25 = vmul.f32 -1.442695, %v4515_v24 }
0x25d7   :  { %9235 = vpow2.f32 %v7916_v44 }
0x25d8   :  { %9237 = vpow2.f32 %v7914_v25 }
0x25e2   :  { %v9232_v12 = vpop.eup %9231 }
0x25e3   :  { %v9234_v11 = vpop.eup %9233  ;;  %4628 = vrot.lane.b32.xlu1 %v9232_v12, %s9539_s28 }
0x25e4   :  { %4525 = vrot.lane.b32.xlu0 %v9234_v11, %s9539_s28  ;;  %v9236_v52 = vpop.eup %9235 }
0x25e5   :  { %v9238_v45 = vpop.eup %9237  ;;  %v4619_v46 = vadd.f32 1.0, %v9236_v52 }
0x25e6   :  { %v4519_v13 = vadd.f32 1.0, %v9238_v45 }
0x25e7   :  { %9239 = vrcp.f32 %v4619_v46 }
0x25e8   :  { %9241 = vrcp.f32 %v4519_v13 }
0x25f4   :  { %v9240_v37 = vpop.eup %9239 }
0x25f5   :  { %v9242_v40 = vpop.eup %9241  ;;  %v4626_v14 = vmul.f32 %v9240_v37, %v4624_v48 }
0x25f6   :  { %v4523_v50 = vmul.f32 %v9242_v40, %v10616_v5  ;;  %v10766_v5 = vld [vmem:[%s11969_s16 + $0x8] sm:$0xff] }
0x2655   :  { %v4629_v38 = vpop.permute.xlu1 %4628 }
0x2656   :  { %v4631_v41 = vmul.f32 %v9240_v37, %v4629_v38  ;;  %v4526_v43 = vpop.permute.xlu0 %4525 }
0x2657   :  { %v4528_v47 = vmul.f32 %v9242_v40, %v4526_v43 }
0x2658   :  { %4633 = vrot.lane.b32.xlu1 %v4631_v41, %s9540_s0 }
0x2659   :  { %4530 = vrot.lane.b32.xlu0 %v4528_v47, %s9540_s0 }
0x26ca   :  { %v4634_v49 = vpop.permute.xlu1 %4633 }
0x26cb   :  { %v10693_v15 = vadd.f32 %v4634_v49, %v4626_v14  ;;  %v4531_v62 = vpop.permute.xlu0 %4530 }
0x26cc   :  { %v10695_v2 = vadd.f32 %v4531_v62, %v4523_v50 }
0x26cd   :  { %9243 = vtanh.f32 %v10693_v15  ;;  %v4902_v13 = vrot.slane %v10693_v15, 6 }
0x26ce   :  { %9245 = vtanh.f32 %v10695_v2 }
0x26da   :  { %v9244_v3 = vpop.eup %9243 }
0x26db   :  { %v9246_v4 = vpop.eup %9245  ;;  %4639 = vrot.lane.b32.xlu1 %v9244_v3, %s9539_s28 }
0x26dc   :  { %4536 = vrot.lane.b32.xlu0 %v9246_v4, %s9539_s28 }
0x274d   :  { %v4640_v51 = vpop.permute.xlu1 %4639 }
0x274e   :  { %v4642_v54 = vmul.f32 %v9240_v37, %v4640_v51  ;;  %v4537_v29 = vpop.permute.xlu0 %4536 }
0x274f   :  { %v4539_v55 = vmul.f32 %v9242_v40, %v4537_v29 }
0x2750   :  { %4716 = vrot.lane.b32.xlu1 %v4642_v54, %s9540_s0 }
0x2751   :  { %4541 = vrot.lane.b32.xlu0 %v4539_v55, %s9540_s0 }
0x27c2   :  { %v4717_v57 = vpop.permute.xlu1 %4716 }
0x27c3   :  { %8858 = vmatmul.mubr.msk.f32.vlgmr.msra.gmra.mxu0 %vm1203_vm7, %v4717_v57  ;;  %v4542_v53 = vpop.permute.xlu0 %4541 }
0x27c4   :  { %4544 = vst.msk [vmem:[#allocation2 + $0x16] sm:$0x3] %vm1482_vm8, %v4542_v53  ;;  %8847 = vmatmul.mubr.msk.f32.vlgmr.msra.gmra.mxu1 %vm1203_vm7, %v4542_v53  ;;  %8872 = vmatpush3.msra.mxu0 %v10709_v16 }
0x27c5   :  { %8861 = vmatpush3.msra.mxu1 %v10632_v39  ;;  %8868 = vmatprep.mubr.msk.f32.mxu1 %vm9537_vm0, %v9536_v0 }
0x27c6   :  { %8862 = vmatprep.subr.mxu1 %v9536_v0  ;;  %8873 = vmatprep.subr.mxu0 %v9536_v0 }
0x27c7   :  { %8863 = vmatpush3.msra.mxu1 %v10641_v26  ;;  %8874 = vmatpush3.msra.mxu0 %v10721_v58 }
0x27c8   :  { %8864 = vmatprep.subr.mxu1 %v9536_v0  ;;  %8875 = vmatprep.subr.mxu0 %v9536_v0 }
0x27c9   :  { %8865 = vmatpush3.msra.mxu1 %v10648_v42  ;;  %8876 = vmatpush3.msra.mxu0 %v10730_v59 }
0x27ca   :  { %8866 = vmatprep.subr.mxu1 %v9536_v0  ;;  %8877 = vmatprep.subr.mxu0 %v9536_v0 }
0x27cb   :  { %8867 = vmatpush3.msra.mxu1 %v10655_v8  ;;  %8878 = vmatpush3.msra.mxu0 %v10739_v60 }
0x27cc   :  { %8869 = vmatmul.mubr.msk.f32.vlgmr.msra.gmra.mxu1 %vm1203_vm7, %v4717_v57  ;;  %8879 = vmatprep.mubr.msk.f32.mxu0 %vm9537_vm0, %v9536_v0 }
0x27cd   :  { %8882 = vmatprep.subr.mxu1 %v9536_v0  ;;  %8893 = vmatprep.subr.mxu0 %v9536_v0 }
0x27ce   :  { %8883 = vmatpush3.msra.mxu1 %v10750_v61  ;;  %8890 = vmatprep.mubr.msk.f32.mxu1 %vm9537_vm0, %v9536_v0 }
0x27cf   :  { %8884 = vmatprep.subr.mxu1 %v9536_v0 }
0x27d0   :  { %8885 = vmatpush3.msra.mxu1 %v10759_v63 }
0x27d1   :  { %8886 = vmatprep.subr.mxu1 %v9536_v0 }
0x27d2   :  { %8887 = vmatpush3.msra.mxu1 %v10766_v5 }
0x27d3   :  { %8888 = vmatprep.subr.mxu1 %v9536_v0 }
0x27d4   :  { %8889 = vmatpush3.msra.mxu1 %v10773_v1 }
0x27d5   :  { %8904 = vmatprep.subr.mxu1 %v9536_v0 }
0x2883   :  { %v4786_v56 = vpop.f32.mrf.mxu0 }
0x2884   :  { %v4711_v6 = vpop.f32.mrf.mxu1 }
0x2885   :  { %v4787_v17 = vadd.f32 %v4786_v56, %v4711_v6  ;;  %v8859_v18 = vpop.f32.mrf.mxu0 }
0x2886   :  { %v8848_v19 = vpop.f32.mrf.mxu1 }
0x2887   :  { %v4790_v30 = vadd.f32 %v10777_v20, %v4787_v17 }
0x2889   :  { %9247 = vtanh.f32 %v4790_v30  ;;  %v7919_v22 = vmul.f32 -1.442695, %v4790_v30 }
0x288c   :  { %v4886_v31 = vpop.f32.mrf.mxu1 }
0x288d   :  { %v4891_v32 = vrot.slane %v4886_v31, 6 }
0x288e   :  { %v8870_v33 = vpop.f32.mrf.mxu1 }
0x288f   :  { %v4893_v34 = vadd.f32 %v4891_v32, %v10683_v23 }
0x2891   :  { %9249 = vtanh.f32 %v4893_v34  ;;  %v7921_v35 = vmul.f32 -1.442695, %v4893_v34 }
0x2892   :  { %9251 = vpow2.f32 %v7919_v22 }
0x2893   :  { %9253 = vpow2.f32 %v7921_v35 }
0x2896   :  { %v9248_v7 = vpop.eup %9247 }
0x2897   :  { %4800 = vrot.lane.b32.xlu0 %v9248_v7, %s9539_s28 }
0x289e   :  { %v9250_v21 = vpop.eup %9249 }
0x289f   :  { %4906 = vrot.lane.b32.xlu1 %v9250_v21, %s9539_s28  ;;  %v9252_v36 = vpop.eup %9251 }
0x28a0   :  { %v4794_v27 = vadd.f32 1.0, %v9252_v36  ;;  %v9254_v28 = vpop.eup %9253 }
0x28a1   :  { %v4897_v9 = vadd.f32 1.0, %v9254_v28 }
0x28a2   :  { %9255 = vrcp.f32 %v4794_v27 }
0x28a3   :  { %9257 = vrcp.f32 %v4897_v9 }
0x28af   :  { %v9256_v24 = vpop.eup %9255 }
0x28b0   :  { %v9258_v11 = vpop.eup %9257  ;;  %v4798_v52 = vmul.f32 %v9256_v24, %v10695_v2 }
0x28b1   :  { %v4904_v37 = vmul.f32 %v9258_v11, %v4902_v13 }
0x2909   :  { %v4801_v10 = vpop.permute.xlu0 %4800 }
0x290a   :  { %v4803_v12 = vmul.f32 %v9256_v24, %v4801_v10 }
0x290c   :  { %4805 = vrot.lane.b32.xlu0 %v4803_v12, %s9540_s0 }
0x2911   :  { %v4907_v44 = vpop.permute.xlu1 %4906 }
0x2912   :  { %v4909_v25 = vmul.f32 %v9258_v11, %v4907_v44 }
0x2914   :  { %4911 = vrot.lane.b32.xlu1 %v4909_v25, %s9540_s0 }
0x297e   :  { %v4806_v45 = vpop.permute.xlu0 %4805 }
0x297f   :  { %v10786_v46 = vadd.f32 %v4806_v45, %v4798_v52 }
0x2981   :  { %9259 = vtanh.f32 %v10786_v46 }
0x2986   :  { %v4912_v38 = vpop.permute.xlu1 %4911 }
0x2987   :  { %v10790_v40 = vadd.f32 %v4912_v38, %v4904_v37 }
0x2989   :  { %9261 = vtanh.f32 %v10790_v40  ;;  %v5181_v27 = vrot.slane %v10790_v40, 6 }
0x298e   :  { %v9260_v41 = vpop.eup %9259 }
0x298f   :  { %4811 = vrot.lane.b32.xlu0 %v9260_v41, %s9539_s28 }
0x2996   :  { %v9262_v43 = vpop.eup %9261 }
0x2997   :  { %4917 = vrot.lane.b32.xlu1 %v9262_v43, %s9539_s28 }
0x2a01   :  { %v4812_v47 = vpop.permute.xlu0 %4811 }
0x2a02   :  { %v4814_v48 = vmul.f32 %v9256_v24, %v4812_v47 }
0x2a04   :  { %4816 = vrot.lane.b32.xlu0 %v4814_v48, %s9540_s0 }
0x2a09   :  { %v4918_v14 = vpop.permute.xlu1 %4917 }
0x2a0a   :  { %v4920_v49 = vmul.f32 %v9258_v11, %v4918_v14 }
0x2a0c   :  { %v4994_v50 = vrot.slane %v4920_v49, 2 }
0x2a0e   :  { %4995 = vrot.lane.b32.xlu1 %v4994_v50, %s9540_s0 }
0x2a76   :  { %v4817_v15 = vpop.permute.xlu0 %4816 }
0x2a77   :  { %4819 = vst.msk [vmem:[#allocation2 + $0x18] sm:$0x3] %vm1482_vm8, %v4817_v15  ;;  %8880 = vmatmul.mubr.msk.f32.vlgmr.msra.gmra.mxu0 %vm1203_vm7, %v4817_v15 }
0x2a78   :  { %8894 = vmatpush3.msra.mxu0 %v10632_v39  ;;  %8901 = vmatprep.mubr.msk.f32.mxu0 %vm9537_vm0, %v9536_v0 }
0x2a79   :  { %8895 = vmatprep.subr.mxu0 %v9536_v0 }
0x2a7a   :  { %8896 = vmatpush3.msra.mxu0 %v10641_v26 }
0x2a7b   :  { %8897 = vmatprep.subr.mxu0 %v9536_v0 }
0x2a7c   :  { %8898 = vmatpush3.msra.mxu0 %v10648_v42 }
0x2a7d   :  { %8899 = vmatprep.subr.mxu0 %v9536_v0 }
0x2a7e   :  { %8900 = vmatpush3.msra.mxu0 %v10655_v8 }
0x2a7f   :  { %8915 = vmatprep.subr.mxu0 %v9536_v0 }
0x2a80   :  { %v4996_v62 = vpop.permute.xlu1 %4995 }
0x2a81   :  { %8891 = vmatmul.mubr.msk.f32.vlgmr.msra.gmra.mxu1 %vm1203_vm7, %v4996_v62  ;;  %8902 = vmatmul.mubr.msk.f32.vlgmr.msra.gmra.mxu0 %vm1203_vm7, %v4996_v62 }
0x2a82   :  { %8905 = vmatpush3.msra.mxu1 %v10709_v16  ;;  %8916 = vmatpush3.msra.mxu0 %v10750_v61 }
0x2a83   :  { %8906 = vmatprep.subr.mxu1 %v9536_v0  ;;  %8917 = vmatprep.subr.mxu0 %v9536_v0 }
0x2a84   :  { %8907 = vmatpush3.msra.mxu1 %v10721_v58  ;;  %8918 = vmatpush3.msra.mxu0 %v10759_v63 }
0x2a85   :  { %8908 = vmatprep.subr.mxu1 %v9536_v0  ;;  %8919 = vmatprep.subr.mxu0 %v9536_v0 }
0x2a86   :  { %8909 = vmatpush3.msra.mxu1 %v10730_v59  ;;  %8912 = vmatprep.mubr.msk.f32.mxu1 %vm9537_vm0, %v9536_v0 }
0x2a87   :  { %8910 = vmatprep.subr.mxu1 %v9536_v0  ;;  %8920 = vmatpush3.msra.mxu0 %v10766_v5 }
0x2a88   :  { %8911 = vmatpush3.msra.mxu1 %v10739_v60  ;;  %8921 = vmatprep.subr.mxu0 %v9536_v0 }
0x2a89   :  { %8926 = vmatprep.subr.mxu1 %v9536_v0  ;;  %8922 = vmatpush3.msra.mxu0 %v10773_v1 }
0x2a8a   :  { %8923 = vmatprep.mubr.msk.f32.mxu0 %vm9537_vm0, %v9536_v0  ;;  %8937 = vmatprep.subr.mxu0 %v9536_v0 }
0x2b37   :  { %v4989_v2 = vpop.f32.mrf.mxu0 }
0x2b39   :  { %v8881_v3 = vpop.f32.mrf.mxu0 }
0x2b41   :  { %v5065_v4 = vpop.f32.mrf.mxu1  ;;  %v5165_v51 = vpop.f32.mrf.mxu0 }
0x2b42   :  { %v5066_v54 = vadd.f32 %v5065_v4, %v4989_v2  ;;  %v5170_v29 = vrot.slane %v5165_v51, 4 }
0x2b43   :  { %v8892_v55 = vpop.f32.mrf.mxu1  ;;  %v8903_v57 = vpop.f32.mrf.mxu0 }
0x2b44   :  { %v5069_v53 = vadd.f32 %v10777_v20, %v5066_v54  ;;  %v5172_v56 = vadd.f32 %v5170_v29, %v10683_v23 }
0x2b46   :  { %9263 = vtanh.f32 %v5069_v53  ;;  %v7924_v18 = vmul.f32 -1.442695, %v5069_v53  ;;  %v7926_v19 = vmul.f32 -1.442695, %v5172_v56 }
0x2b47   :  { %9265 = vtanh.f32 %v5172_v56  ;;  %v5668_v56 = vld [vmem:[%s11972_s19 + $0x18] sm:$0xff] }
0x2b48   :  { %9267 = vpow2.f32 %v7924_v18  ;;  %v7942_v18 = vld [vmem:[%s11972_s19 + $0x38] sm:$0xff] }
0x2b49   :  { %9269 = vpow2.f32 %v7926_v19 }
0x2b53   :  { %v9264_v6 = vpop.eup %9263 }
0x2b54   :  { %v9266_v17 = vpop.eup %9265  ;;  %5079 = vrot.lane.b32.xlu0 %v9264_v6, %s9539_s28 }
0x2b55   :  { %5185 = vrot.lane.b32.xlu1 %v9266_v17, %s9539_s28  ;;  %v9268_v30 = vpop.eup %9267 }
0x2b56   :  { %v9270_v31 = vpop.eup %9269  ;;  %v5073_v32 = vadd.f32 1.0, %v9268_v30 }
0x2b57   :  { %v5176_v33 = vadd.f32 1.0, %v9270_v31 }
0x2b58   :  { %9271 = vrcp.f32 %v5073_v32 }
0x2b59   :  { %9273 = vrcp.f32 %v5176_v33 }
0x2b65   :  { %v9272_v34 = vpop.eup %9271 }
0x2b66   :  { %v9274_v21 = vpop.eup %9273  ;;  %v5077_v28 = vmul.f32 %v9272_v34, %v10786_v46 }
0x2b67   :  { %v5183_v24 = vmul.f32 %v9274_v21, %v5181_v27  ;;  %v7941_v27 = vld [vmem:[%s11972_s19 + $0x30] sm:$0xff] }
0x2bc6   :  { %v5080_v7 = vpop.permute.xlu0 %5079 }
0x2bc7   :  { %v5082_v22 = vmul.f32 %v9272_v34, %v5080_v7  ;;  %v5186_v35 = vpop.permute.xlu1 %5185  ;;  %v5667_v7 = vld [vmem:[%s11972_s19 + $0x10] sm:$0xff] }
0x2bc8   :  { %v5188_v36 = vmul.f32 %v9274_v21, %v5186_v35  ;;  %v5665_v35 = vld [vmem:[%s11972_s19] sm:$0xff] }
0x2bc9   :  { %5084 = vrot.lane.b32.xlu0 %v5082_v22, %s9540_s0  ;;  %v5666_v22 = vld [vmem:[%s11972_s19 + $0x8] sm:$0xff] }
0x2bca   :  { %5190 = vrot.lane.b32.xlu1 %v5188_v36, %s9540_s0 }
0x2c3b   :  { %v5085_v9 = vpop.permute.xlu0 %5084 }
0x2c3c   :  { %v10839_v10 = vadd.f32 %v5085_v9, %v5077_v28  ;;  %v5191_v12 = vpop.permute.xlu1 %5190  ;;  %v5658_v28 = vld [vmem:[#allocation2 + $0x8] sm:$0xff]  ;;  %v5659_v9 = vld [vmem:[#allocation2 + $0x10] sm:$0xff] }
0x2c3d   :  { %v10841_v11 = vadd.f32 %v5191_v12, %v5183_v24  ;;  %v7940_v24 = vld [vmem:[%s11972_s19 + $0x28] sm:$0xff] }
0x2c3e   :  { %9275 = vtanh.f32 %v10839_v10 }
0x2c3f   :  { %9277 = vtanh.f32 %v10841_v11  ;;  %v5460_v29 = vrot.slane %v10841_v11, 6 }
0x2c4b   :  { %v9276_v44 = vpop.eup %9275 }
0x2c4c   :  { %v9278_v25 = vpop.eup %9277  ;;  %5090 = vrot.lane.b32.xlu0 %v9276_v44, %s9539_s28 }
0x2c4d   :  { %5196 = vrot.lane.b32.xlu1 %v9278_v25, %s9539_s28 }
0x2cbe   :  { %v5091_v52 = vpop.permute.xlu0 %5090 }
0x2cbf   :  { %v5093_v45 = vmul.f32 %v9272_v34, %v5091_v52  ;;  %v5197_v46 = vpop.permute.xlu1 %5196 }
0x2cc0   :  { %v5199_v13 = vmul.f32 %v9274_v21, %v5197_v46  ;;  %v10907_v21 = vld [vmem:[#allocation2] sm:$0xff] }
0x2cc1   :  { %5095 = vrot.lane.b32.xlu0 %v5093_v45, %s9540_s0 }
0x2cc2   :  { %v5273_v37 = vrot.slane %v5199_v13, 4 }
0x2cc4   :  { %5274 = vrot.lane.b32.xlu1 %v5273_v37, %s9540_s0 }
0x2d33   :  { %v5096_v38 = vpop.permute.xlu0 %5095 }
0x2d34   :  { %5098 = vst.msk [vmem:[#allocation2 + $0x1a] sm:$0x3] %vm1482_vm8, %v5096_v38  ;;  %8913 = vmatmul.mubr.msk.f32.vlgmr.msra.gmra.mxu1 %vm1203_vm7, %v5096_v38 }
0x2d35   :  { %8927 = vmatpush3.msra.mxu1 %v10632_v39  ;;  %8934 = vmatprep.mubr.msk.f32.mxu1 %vm9537_vm0, %v9536_v0 }
0x2d36   :  { %8928 = vmatprep.subr.mxu1 %v9536_v0  ;;  %v5275_v40 = vpop.permute.xlu1 %5274 }
0x2d37   :  { %8924 = vmatmul.mubr.msk.f32.vlgmr.msra.gmra.mxu0 %vm1203_vm7, %v5275_v40  ;;  %8929 = vmatpush3.msra.mxu1 %v10641_v26 }
0x2d38   :  { %8930 = vmatprep.subr.mxu1 %v9536_v0  ;;  %8938 = vmatpush3.msra.mxu0 %v10709_v16 }
0x2d39   :  { %8931 = vmatpush3.msra.mxu1 %v10648_v42  ;;  %8939 = vmatprep.subr.mxu0 %v9536_v0 }
0x2d3a   :  { %8932 = vmatprep.subr.mxu1 %v9536_v0  ;;  %8940 = vmatpush3.msra.mxu0 %v10721_v58 }
0x2d3b   :  { %8933 = vmatpush3.msra.mxu1 %v10655_v8  ;;  %8941 = vmatprep.subr.mxu0 %v9536_v0 }
0x2d3c   :  { %8935 = vmatmul.mubr.msk.f32.vlgmr.msra.gmra.mxu1 %vm1203_vm7, %v5275_v40  ;;  %8942 = vmatpush3.msra.mxu0 %v10730_v59 }
0x2d3d   :  { %8943 = vmatprep.subr.mxu0 %v9536_v0  ;;  %8948 = vmatprep.subr.mxu1 %v9536_v0 }
0x2d3e   :  { %8944 = vmatpush3.msra.mxu0 %v10739_v60  ;;  %8945 = vmatprep.mubr.msk.f32.mxu0 %vm9537_vm0, %v9536_v0 }
0x2d3f   :  { %8949 = vmatpush3.msra.mxu1 %v10750_v61  ;;  %8956 = vmatprep.mubr.msk.f32.mxu1 %vm9537_vm0, %v9536_v0 }
0x2d40   :  { %8950 = vmatprep.subr.mxu1 %v9536_v0  ;;  %8959 = vmatprep.subr.mxu0 %v5668_v56 }
0x2d41   :  { %8951 = vmatpush3.msra.mxu1 %v10759_v63 }
0x2d42   :  { %8952 = vmatprep.subr.mxu1 %v9536_v0 }
0x2d43   :  { %8953 = vmatpush3.msra.mxu1 %v10766_v5 }
0x2d44   :  { %8954 = vmatprep.subr.mxu1 %v9536_v0 }
0x2d45   :  { %8955 = vmatpush3.msra.mxu1 %v10773_v1 }
0x2d46   :  { %8973 = vmatprep.subr.mxu1 %v7942_v18 }
0x2df4   :  { %v5268_v39 = vpop.f32.mrf.mxu1 }
0x2df6   :  { %v8914_v26 = vpop.f32.mrf.mxu1 }
0x2df7   :  { %v5344_v42 = vpop.f32.mrf.mxu0 }
0x2df8   :  { %v5345_v8 = vadd.f32 %v5344_v42, %v5268_v39 }
0x2df9   :  { %v8925_v16 = vpop.f32.mrf.mxu0 }
0x2dfa   :  { %v5348_v58 = vadd.f32 %v10777_v20, %v5345_v8 }
0x2dfc   :  { %9279 = vtanh.f32 %v5348_v58  ;;  %v5444_v59 = vpop.f32.mrf.mxu1  ;;  %v7929_v1 = vmul.f32 -1.442695, %v5348_v58  ;;  %v7954_v58 = vld [vmem:[%s11972_s19 + $0x58] sm:$0xff] }
0x2dfd   :  { %v5449_v60 = vrot.slane %v5444_v59, 2  ;;  %v7953_v59 = vld [vmem:[%s11972_s19 + $0x50] sm:$0xff] }
0x2dfe   :  { %v8936_v61 = vpop.f32.mrf.mxu1 }
0x2dff   :  { %v5451_v63 = vadd.f32 %v5449_v60, %v10683_v23  ;;  %v7952_v60 = vld [vmem:[%s11972_s19 + $0x48] sm:$0xff]  ;;  %v7951_v61 = vld [vmem:[%s11972_s19 + $0x40] sm:$0xff] }
0x2e01   :  { %9281 = vtanh.f32 %v5451_v63  ;;  %v7931_v43 = vmul.f32 -1.442695, %v5451_v63 }
0x2e02   :  { %9283 = vpow2.f32 %v7929_v1 }
0x2e03   :  { %9285 = vpow2.f32 %v7931_v43 }
0x2e09   :  { %v9280_v41 = vpop.eup %9279 }
0x2e0a   :  { %5358 = vrot.lane.b32.xlu1 %v9280_v41, %s9539_s28 }
0x2e0e   :  { %v9282_v5 = vpop.eup %9281 }
0x2e0f   :  { %5464 = vrot.lane.b32.xlu0 %v9282_v5, %s9539_s28  ;;  %v9284_v47 = vpop.eup %9283 }
0x2e10   :  { %v5352_v48 = vadd.f32 1.0, %v9284_v47  ;;  %v9286_v14 = vpop.eup %9285 }
0x2e11   :  { %v5455_v49 = vadd.f32 1.0, %v9286_v14 }
0x2e12   :  { %9287 = vrcp.f32 %v5352_v48 }
0x2e13   :  { %9289 = vrcp.f32 %v5455_v49 }
0x2e1f   :  { %v9288_v50 = vpop.eup %9287 }
0x2e20   :  { %v9290_v62 = vpop.eup %9289  ;;  %v5356_v4 = vmul.f32 %v9288_v50, %v10839_v10  ;;  %v7939_v10 = vld [vmem:[%s11972_s19 + $0x20] sm:$0xff] }
0x2e21   :  { %v5462_v55 = vmul.f32 %v9290_v62, %v5460_v29 }
0x2e7c   :  { %v5359_v15 = vpop.permute.xlu1 %5358 }
0x2e7d   :  { %v5361_v23 = vmul.f32 %v9288_v50, %v5359_v15 }
0x2e7f   :  { %5363 = vrot.lane.b32.xlu1 %v5361_v23, %s9540_s0 }
0x2e81   :  { %v5465_v2 = vpop.permute.xlu0 %5464 }
0x2e82   :  { %v5467_v3 = vmul.f32 %v9290_v62, %v5465_v2 }
0x2e84   :  { %5469 = vrot.lane.b32.xlu0 %v5467_v3, %s9540_s0 }
0x2ef1   :  { %v5364_v51 = vpop.permute.xlu1 %5363 }
0x2ef2   :  { %v10888_v54 = vadd.f32 %v5364_v51, %v5356_v4 }
0x2ef4   :  { %9291 = vtanh.f32 %v10888_v54 }
0x2ef6   :  { %v5470_v57 = vpop.permute.xlu0 %5469 }
0x2ef7   :  { %v5472_v53 = vadd.f32 %v5470_v57, %v5462_v55  ;;  %v5953_v57 = vld [vmem:[%s12014_s13] sm:$0xff] }
0x2ef9   :  { %9293 = vtanh.f32 %v5472_v53  ;;  %v5954_v53 = vld [vmem:[%s12014_s13 + $0x8] sm:$0xff] }
0x2f01   :  { %v9292_v6 = vpop.eup %9291 }
0x2f02   :  { %5369 = vrot.lane.b32.xlu1 %v9292_v6, %s9539_s28  ;;  %v5956_v6 = vld [vmem:[%s12014_s13 + $0x18] sm:$0xff] }
0x2f06   :  { %v9294_v17 = vpop.eup %9293 }
0x2f07   :  { %5475 = vrot.lane.b32.xlu0 %v9294_v17, %s9539_s28  ;;  %v6218_v17 = vld [vmem:[%s11976_s23 + $0x78] sm:$0xff] }
0x2f74   :  { %v5370_v19 = vpop.permute.xlu1 %5369 }
0x2f75   :  { %v5372_v30 = vmul.f32 %v9288_v50, %v5370_v19  ;;  %v6216_v19 = vld [vmem:[%s11976_s23 + $0x68] sm:$0xff] }
0x2f77   :  { %5374 = vrot.lane.b32.xlu0 %v5372_v30, %s9540_s0  ;;  %v6403_v30 = vld [vmem:[%s11976_s23 + $0x178] sm:$0xff] }
0x2f79   :  { %v5476_v31 = vpop.permute.xlu0 %5475 }
0x2f7a   :  { %v5478_v32 = vmul.f32 %v9290_v62, %v5476_v31  ;;  %v6215_v31 = vld [vmem:[%s11976_s23 + $0x60] sm:$0xff] }
0x2f7c   :  { %v5552_v33 = vrot.slane %v5478_v32, 6  ;;  %v6402_v32 = vld [vmem:[%s11976_s23 + $0x170] sm:$0xff] }
0x2f7e   :  { %5553 = vrot.lane.b32.xlu1 %v5552_v33, %s9540_s0  ;;  %v6214_v33 = vld [vmem:[%s11976_s23 + $0x58] sm:$0xff] }
0x2fe9   :  { %v5375_v34 = vpop.permute.xlu0 %5374 }
0x2fea   :  { %5377 = vst.msk [vmem:[#allocation2 + $0x1c] sm:$0x3] %vm1482_vm8, %v5375_v34  ;;  %8946 = vmatmul.mubr.msk.f32.vlgmr.msra.gmra.mxu0 %vm1203_vm7, %v5375_v34  ;;  %v6401_v34 = vld [vmem:[%s11976_s23 + $0x168] sm:$0xff] }
0x2feb   :  { %8960 = vmatpush3.msra.mxu0 %v5668_v56  ;;  %8967 = vmatprep.mubr.msk.f32.mxu0 %vm1203_vm7, %v10907_v21  ;;  %v5955_v56 = vld [vmem:[%s12014_s13 + $0x10] sm:$0xff] }
0x2fec   :  { %8961 = vmatprep.subr.mxu0 %v5667_v7 }
0x2fed   :  { %8962 = vmatpush3.msra.mxu0 %v5667_v7  ;;  %v6213_v7 = vld [vmem:[%s11976_s23 + $0x50] sm:$0xff] }
0x2fee   :  { %8963 = vmatprep.subr.mxu0 %v5666_v22 }
0x2fef   :  { %8964 = vmatpush3.msra.mxu0 %v5666_v22  ;;  %v6212_v22 = vld [vmem:[%s11976_s23 + $0x48] sm:$0xff] }
0x2ff0   :  { %8965 = vmatprep.subr.mxu0 %v5665_v35  ;;  %v5554_v36 = vpop.permute.xlu1 %5553 }
0x2ff1   :  { %8966 = vmatpush3.msra.mxu0 %v5665_v35  ;;  %8957 = vmatmul.mubr.msk.f32.vlgmr.msra.gmra.mxu1 %vm1203_vm7, %v5554_v36  ;;  %v6399_v35 = vld [vmem:[%s11976_s23 + $0x158] sm:$0xff]  ;;  %v6211_v36 = vld [vmem:[%s11976_s23 + $0x40] sm:$0xff] }
0x2ff2   :  { %8968 = vmatmul.mubr.msk.f32.vlgmr.msra.gmra.mxu0 %vm1203_vm7, %v5658_v28  ;;  %8974 = vmatpush3.msra.mxu1 %v7942_v18  ;;  %v6217_v18 = vld [vmem:[%s11976_s23 + $0x70] sm:$0xff] }
0x2ff3   :  { %8970 = vmatprep.mubr.msk.f32.mxu0 %vm1203_vm7, %v5659_v9  ;;  %8975 = vmatprep.subr.mxu1 %v7941_v27 }
0x2ff4   :  { %8981 = vmatprep.mubr.msk.f32.mxu1 %vm1203_vm7, %v10907_v21  ;;  %8976 = vmatpush3.msra.mxu1 %v7941_v27  ;;  %v6398_v27 = vld [vmem:[%s11976_s23 + $0x150] sm:$0xff] }
0x2ff5   :  { %8977 = vmatprep.subr.mxu1 %v7940_v24 }
0x2ff6   :  { %8978 = vmatpush3.msra.mxu1 %v7940_v24  ;;  %v6209_v24 = vld [vmem:[%s11976_s23 + $0x30] sm:$0xff] }
0x2ff7   :  { %8979 = vmatprep.subr.mxu1 %v7939_v10 }
0x2ff8   :  { %8980 = vmatpush3.msra.mxu1 %v7939_v10  ;;  %v6396_v10 = vld [vmem:[%s11976_s23 + $0x140] sm:$0xff] }
0x2ff9   :  { %8982 = vmatmul.mubr.msk.f32.vlgmr.msra.gmra.mxu1 %vm1203_vm7, %v5658_v28  ;;  %9001 = vmatprep.subr.mxu1 %v7954_v58 }
0x2ffa   :  { %8984 = vmatprep.mubr.msk.f32.mxu1 %vm1203_vm7, %v5659_v9  ;;  %9002 = vmatpush3.msra.mxu1 %v7954_v58 }
0x2ffb   :  { %9003 = vmatprep.subr.mxu1 %v7953_v59 }
0x2ffc   :  { %9004 = vmatpush3.msra.mxu1 %v7953_v59 }
0x2ffd   :  { %9005 = vmatprep.subr.mxu1 %v7952_v60 }
0x2ffe   :  { %9006 = vmatpush3.msra.mxu1 %v7952_v60 }
0x2fff   :  { %9007 = vmatprep.subr.mxu1 %v7951_v61 }
0x3000   :  { %9008 = vmatpush3.msra.mxu1 %v7951_v61 }
0x3001   :  { %6423 = vmatprep.subr.mxu1 %v6403_v30  ;;  %v6307_v30 = vld [vmem:[%s11976_s23 + $0xd8] sm:$0xff] }
0x30aa   :  { %v5547_v12 = vpop.f32.mrf.mxu0 }
0x30ac   :  { %v8947_v11 = vpop.f32.mrf.mxu0 }
0x30ad   :  { %v6395_v11 = vld [vmem:[%s11976_s23 + $0x138] sm:$0xff] }
0x30b1   :  { %v5623_v44 = vpop.f32.mrf.mxu1 }
0x30b2   :  { %v5624_v25 = vadd.f32 %v5623_v44, %v5547_v12  ;;  %v8969_v47 = vpop.f32.mrf.mxu0  ;;  %v6208_v12 = vld [vmem:[%s11976_s23 + $0x28] sm:$0xff]  ;;  %v6207_v44 = vld [vmem:[%s11976_s23 + $0x20] sm:$0xff] }
0x30b3   :  { %v8958_v52 = vpop.f32.mrf.mxu1 }
0x30b4   :  { %v5627_v45 = vadd.f32 %v10777_v20, %v5624_v25  ;;  %v5747_v14 = vpop.f32.mrf.mxu0  ;;  %v6394_v25 = vld [vmem:[%s11976_s23 + $0x130] sm:$0xff]  ;;  %v6206_v52 = vld [vmem:[%s11976_s23 + $0x18] sm:$0xff] }
0x30b6   :  { %9295 = vtanh.f32 %v5627_v45  ;;  %v7934_v13 = vmul.f32 -1.442695, %v5627_v45  ;;  %v6393_v45 = vld [vmem:[%s11976_s23 + $0x128] sm:$0xff] }
0x30b8   :  { %9297 = vpow2.f32 %v7934_v13  ;;  %v6392_v13 = vld [vmem:[%s11976_s23 + $0x120] sm:$0xff] }
0x30b9   :  { %v10964_v48 = vpop.f32.mrf.mxu1 }
0x30bb   :  { %v10966_v49 = vpop.f32.mrf.mxu1 }
0x30c3   :  { %v9296_v46 = vpop.eup %9295 }
0x30c4   :  { %5637 = vrot.lane.b32.xlu0 %v9296_v46, %s9539_s28  ;;  %v6205_v46 = vld [vmem:[%s11976_s23 + $0x10] sm:$0xff] }
0x30c5   :  { %v9298_v37 = vpop.eup %9297 }
0x30c6   :  { %v5631_v38 = vadd.f32 1.0, %v9298_v37  ;;  %v6204_v37 = vld [vmem:[%s11976_s23 + $0x8] sm:$0xff] }
0x30c8   :  { %9299 = vrcp.f32 %v5631_v38  ;;  %v6391_v38 = vld [vmem:[%s11976_s23 + $0x118] sm:$0xff] }
0x30d5   :  { %v9300_v40 = vpop.eup %9299 }
0x30d6   :  { %v5635_v42 = vmul.f32 %v9300_v40, %v10888_v54 }
0x3136   :  { %v5638_v39 = vpop.permute.xlu0 %5637 }
0x3137   :  { %v5640_v26 = vmul.f32 %v9300_v40, %v5638_v39  ;;  %v6390_v39 = vld [vmem:[%s11976_s23 + $0x110] sm:$0xff] }
0x3139   :  { %5642 = vrot.lane.b32.xlu1 %v5640_v26, %s9540_s0  ;;  %v6311_v26 = vld [vmem:[%s11976_s23 + $0xf8] sm:$0xff] }
0x31ab   :  { %v5643_v8 = vpop.permute.xlu1 %5642 }
0x31ac   :  { %v5645_v16 = vadd.f32 %v5643_v8, %v5635_v42  ;;  %v6389_v42 = vld [vmem:[%s11976_s23 + $0x108] sm:$0xff]  ;;  %v6388_v8 = vld [vmem:[%s11976_s23 + $0x100] sm:$0xff] }
0x31ae   :  { %9301 = vtanh.f32 %v5645_v16  ;;  %v6587_v16 = vld [vmem:[%s11976_s23 + $0x278] sm:$0xff] }
0x31bb   :  { %v9302_v20 = vpop.eup %9301 }
0x31bc   :  { %5648 = vrot.lane.b32.xlu0 %v9302_v20, %s9539_s28 }
0x322e   :  { %v5649_v63 = vpop.permute.xlu0 %5648 }
0x322f   :  { %v5651_v41 = vmul.f32 %v9300_v40, %v5649_v63  ;;  %v6203_v40 = vld [vmem:[%s11976_s23] sm:$0xff] }
0x3231   :  { %5653 = vrot.lane.b32.xlu1 %v5651_v41, %s9540_s0  ;;  %s12013_s0 = sld [smem:[#allocation27_spill]] }
0x3237   :  { %v5661_v43 = vld [vmem:[%s12013_s0] sm:$0xff]  ;;  %v5662_v4 = vld [vmem:[%s12013_s0 + $0x8] sm:$0xff]  ;;  %v5663_v51 = vld [vmem:[%s12013_s0 + $0x10] sm:$0xff] }
0x3238   :  { %v5664_v55 = vld [vmem:[%s12013_s0 + $0x18] sm:$0xff] }
0x32a3   :  { %v5654_v5 = vpop.permute.xlu1 %5653 }
0x32a4   :  { %5656 = vst.msk [vmem:[#allocation2 + $0x1e] sm:$0x3] %vm1482_vm8, %v5654_v5 }
0x32ab   :  { %v5660_v1 = vld [vmem:[#allocation2 + $0x18] sm:$0xff] }
0x32ac   :  { %8971 = vmatmul.mubr.msk.f32.gmra.mxu0 %vm1203_vm7, %v5660_v1  ;;  %8985 = vmatmul.mubr.msk.f32.gmra.mxu1 %vm1203_vm7, %v5660_v1 }
0x32ad   :  { %9009 = vmatprep.mubr.msk.f32.mxu1 %vm1203_vm7, %v10907_v21  ;;  %8995 = vmatprep.mubr.msk.f32.mxu0 %vm1203_vm7, %v5661_v43  ;;  %v6400_v21 = vld [vmem:[%s11976_s23 + $0x160] sm:$0xff]  ;;  %v11107_v43 = vld [vmem:[#allocation9] ss:$0 sm:$0xff] }
0x32b0   :  { %9010 = vmatmul.mubr.msk.f32.vlgmr.msra.gmra.mxu1 %vm1203_vm7, %v5658_v28  ;;  %v6210_v28 = vld [vmem:[%s11976_s23 + $0x38] sm:$0xff] }
0x32b1   :  { %9012 = vmatprep.mubr.msk.f32.mxu1 %vm1203_vm7, %v5659_v9  ;;  %6424 = vmatpush1.msra.mxu1 %v6402_v32  ;;  %v6397_v9 = vld [vmem:[%s11976_s23 + $0x148] sm:$0xff]  ;;  %v6306_v32 = vld [vmem:[%s11976_s23 + $0xd0] sm:$0xff] }
0x32b2   :  { %6425 = vmatprep.subr.mxu1 %v6401_v34  ;;  %v6305_v34 = vld [vmem:[%s11976_s23 + $0xc8] sm:$0xff] }
0x32b3   :  { %6426 = vmatpush1.msra.mxu1 %v6400_v21  ;;  %v6304_v21 = vld [vmem:[%s11976_s23 + $0xc0] sm:$0xff] }
0x32b4   :  { %9013 = vmatmul.mubr.msk.f32.gmra.mxu1 %vm1203_vm7, %v5660_v1  ;;  %6427 = vmatprep.subr.mxu1 %v6399_v35 }
0x32b5   :  { %6471 = vmatprep.mubr.f32.mxu1 %v9536_v0  ;;  %6428 = vmatpush1.msra.mxu1 %v6398_v27  ;;  %v6581_v27 = vld [vmem:[%s11976_s23 + $0x248] sm:$0xff] }
0x32b6   :  { %6429 = vmatprep.subr.mxu1 %v6397_v9  ;;  %v6580_v9 = vld [vmem:[%s11976_s23 + $0x240] sm:$0xff] }
0x32b7   :  { %6430 = vmatpush1.msra.mxu1 %v6396_v10  ;;  %v6579_v10 = vld [vmem:[%s11976_s23 + $0x238] sm:$0xff] }
0x32b8   :  { %6431 = vmatprep.subr.mxu1 %v6395_v11  ;;  %v6578_v11 = vld [vmem:[%s11976_s23 + $0x230] sm:$0xff] }
0x32b9   :  { %6432 = vmatpush1.msra.mxu1 %v6394_v25  ;;  %v6299_v25 = vld [vmem:[%s11976_s23 + $0x98] sm:$0xff] }
0x32ba   :  { %6433 = vmatprep.subr.mxu1 %v6393_v45  ;;  %v6298_v45 = vld [vmem:[%s11976_s23 + $0x90] sm:$0xff] }
0x32bb   :  { %6434 = vmatpush1.msra.mxu1 %v6392_v13  ;;  %v6297_v13 = vld [vmem:[%s11976_s23 + $0x88] sm:$0xff] }
0x32bc   :  { %6435 = vmatprep.subr.mxu1 %v6391_v38  ;;  %v6296_v38 = vld [vmem:[%s11976_s23 + $0x80] sm:$0xff] }
0x32bd   :  { %6436 = vmatpush1.msra.mxu1 %v6390_v39 }
0x32be   :  { %6437 = vmatprep.subr.mxu1 %v6389_v42 }
0x32bf   :  { %6438 = vmatpush1.msra.mxu1 %v6388_v8  ;;  %v6573_v8 = vld [vmem:[%s11976_s23 + $0x208] sm:$0xff] }
0x32c0   :  { %6607 = vmatprep.subr.mxu1 %v6587_v16  ;;  %v6494_v16 = vld [vmem:[%s11976_s23 + $0x1f0] sm:$0xff] }
0x336c   :  { %v8972_v50 = vpop.f32.mrf.mxu0  ;;  %v10968_v15 = vpop.f32.mrf.mxu1 }
0x336d   :  { %8987 = vmatprep.subr.mxu0 %v8972_v50 }
0x336e   :  { %v5757_v23 = vpop.f32.mrf.mxu0  ;;  %v10970_v62 = vpop.f32.mrf.mxu1  ;;  %8988 = vmatpush3.msra.mxu0 %v8972_v50 }
0x336f   :  { %8989 = vmatprep.subr.mxu0 %v5757_v23 }
0x3370   :  { %8990 = vmatpush3.msra.mxu0 %v5757_v23  ;;  %v9011_v2 = vpop.f32.mrf.mxu1 }
0x3371   :  { %8991 = vmatprep.subr.mxu0 %v8969_v47 }
0x3372   :  { %8992 = vmatpush3.msra.mxu0 %v8969_v47  ;;  %v6028_v3 = vpop.f32.mrf.mxu1 }
0x3373   :  { %8993 = vmatprep.subr.mxu0 %v5747_v14 }
0x3374   :  { %8994 = vmatpush3.msra.mxu0 %v5747_v14  ;;  %v9014_v54 = vpop.f32.mrf.mxu1 }
0x3375   :  { %8996 = vmatmul.mubr.msk.f32.vlgmr.msra.gmra.mxu0 %vm1203_vm7, %v5662_v4  ;;  %9015 = vmatprep.subr.mxu0 %v9014_v54 }
0x3376   :  { %v6038_v29 = vpop.f32.mrf.mxu1  ;;  %9016 = vmatpush3.msra.mxu0 %v9014_v54  ;;  %8998 = vmatprep.mubr.msk.f32.mxu0 %vm1203_vm7, %v5663_v51  ;;  %v11115_v54 = vld [vmem:[#allocation12] ss:$0 sm:$0xff] }
0x3377   :  { %9017 = vmatprep.subr.mxu0 %v6038_v29 }
0x3378   :  { %9018 = vmatpush3.msra.mxu0 %v6038_v29 }
0x3379   :  { %8999 = vmatmul.mubr.msk.f32.gmra.mxu0 %vm1203_vm7, %v5664_v55  ;;  %9019 = vmatprep.subr.mxu0 %v9011_v2 }
0x337a   :  { %9020 = vmatpush3.msra.mxu0 %v9011_v2  ;;  %9023 = vmatprep.mubr.msk.f32.mxu0 %vm1203_vm7, %v5953_v57 }
0x337b   :  { %9021 = vmatprep.subr.mxu0 %v6028_v3 }
0x337c   :  { %9022 = vmatpush3.msra.mxu0 %v6028_v3  ;;  %v11111_v3 = vld [vmem:[#allocation11] ss:$0 sm:$0xff] }
0x337d   :  { %9024 = vmatmul.mubr.msk.f32.vlgmr.msra.gmra.mxu0 %vm1203_vm7, %v5954_v53  ;;  %6239 = vmatprep.subr.mxu0 %v6218_v17  ;;  %v6308_v17 = vld [vmem:[%s11976_s23 + $0xe0] sm:$0xff] }
0x337e   :  { %9026 = vmatprep.mubr.msk.f32.mxu0 %vm1203_vm7, %v5955_v56  ;;  %6240 = vmatpush1.msra.mxu0 %v6217_v18  ;;  %v6310_v56 = vld [vmem:[%s11976_s23 + $0xf0] sm:$0xff] }
0x337f   :  { %6241 = vmatprep.subr.mxu0 %v6216_v19  ;;  %v6586_v18 = vld [vmem:[%s11976_s23 + $0x270] sm:$0xff] }
0x3380   :  { %6242 = vmatpush1.msra.mxu0 %v6215_v31  ;;  %v6585_v31 = vld [vmem:[%s11976_s23 + $0x268] sm:$0xff] }
0x3381   :  { %9027 = vmatmul.mubr.msk.f32.gmra.mxu0 %vm1203_vm7, %v5956_v6  ;;  %6243 = vmatprep.subr.mxu0 %v6214_v33  ;;  %v6584_v33 = vld [vmem:[%s11976_s23 + $0x260] sm:$0xff] }
0x3382   :  { %6287 = vmatprep.mubr.f32.mxu0 %v9536_v0  ;;  %6244 = vmatpush1.msra.mxu0 %v6213_v7  ;;  %v6583_v7 = vld [vmem:[%s11976_s23 + $0x258] sm:$0xff] }
0x3383   :  { %6245 = vmatprep.subr.mxu0 %v6212_v22  ;;  %v6582_v22 = vld [vmem:[%s11976_s23 + $0x250] sm:$0xff] }
0x3384   :  { %6246 = vmatpush1.msra.mxu0 %v6211_v36  ;;  %v6303_v36 = vld [vmem:[%s11976_s23 + $0xb8] sm:$0xff] }
0x3385   :  { %6247 = vmatprep.subr.mxu0 %v6210_v28  ;;  %v6302_v28 = vld [vmem:[%s11976_s23 + $0xb0] sm:$0xff] }
0x3386   :  { %6248 = vmatpush1.msra.mxu0 %v6209_v24  ;;  %v6301_v24 = vld [vmem:[%s11976_s23 + $0xa8] sm:$0xff] }
0x3387   :  { %6249 = vmatprep.subr.mxu0 %v6208_v12  ;;  %v6300_v12 = vld [vmem:[%s11976_s23 + $0xa0] sm:$0xff] }
0x3388   :  { %6250 = vmatpush1.msra.mxu0 %v6207_v44 }
0x3389   :  { %6251 = vmatprep.subr.mxu0 %v6206_v52  ;;  %v6577_v52 = vld [vmem:[%s11976_s23 + $0x228] sm:$0xff] }
0x338a   :  { %6252 = vmatpush1.msra.mxu0 %v6205_v46  ;;  %v6576_v46 = vld [vmem:[%s11976_s23 + $0x220] sm:$0xff] }
0x338b   :  { %6253 = vmatprep.subr.mxu0 %v6204_v37  ;;  %v6575_v37 = vld [vmem:[%s11976_s23 + $0x218] sm:$0xff] }
0x338c   :  { %6254 = vmatpush1.msra.mxu0 %v6203_v40  ;;  %v6574_v40 = vld [vmem:[%s11976_s23 + $0x210] sm:$0xff] }
0x338d   :  { %6331 = vmatprep.subr.mxu0 %v6311_v26  ;;  %v6495_v26 = vld [vmem:[%s11976_s23 + $0x1f8] sm:$0xff] }
0x3435   :  { %v8997_v20 = vpop.f32.mrf.mxu0 }
0x3437   :  { %v5934_v58 = vpop.f32.mrf.mxu0 }
0x3438   :  { %v5935_v63 = vadd.f32 %v5934_v58, %v10966_v49  ;;  %v5940_v49 = vadd.f32 %v8997_v20, %v10964_v48  ;;  %v6309_v48 = vld [vmem:[%s11976_s23 + $0xe8] sm:$0xff]  ;;  %v6572_v20 = vld [vmem:[%s11976_s23 + $0x200] sm:$0xff] }
0x3439   :  { %v9000_v59 = vpop.f32.mrf.mxu0  ;;  %v6493_v58 = vld [vmem:[%s11976_s23 + $0x1e8] sm:$0xff] }
0x343a   :  { %v5950_v5 = vadd.f32 %v9000_v59, %v10968_v15 }
0x343b   :  { %v11103_v60 = vpop.f32.mrf.mxu0 }
0x343d   :  { %v9025_v61 = vpop.f32.mrf.mxu0 }
0x343e   :  { %v6145_v55 = vadd.f32 %v9025_v61, %v5940_v49  ;;  %v6771_v61 = vld [vmem:[%s11976_s23 + $0x378] sm:$0xff]  ;;  %v6765_v49 = vld [vmem:[%s11976_s23 + $0x348] sm:$0xff] }
0x343f   :  { %v6125_v41 = vpop.f32.mrf.mxu0 }
0x3440   :  { %v6144_v1 = vadd.f32 %v6125_v41, %v5935_v63  ;;  %v6156_v19 = vadd.f32 %v11107_v43, %v6145_v55  ;;  %v6492_v63 = vld [vmem:[%s11976_s23 + $0x1e0] sm:$0xff]  ;;  %v6770_v41 = vld [vmem:[%s11976_s23 + $0x370] sm:$0xff]  ;;  %v6485_v55 = vld [vmem:[%s11976_s23 + $0x1a8] sm:$0xff] }
0x3441   :  { %v9028_v47 = vpop.f32.mrf.mxu0 }
0x3442   :  { %v6155_v14 = vadd.f32 %v11107_v43, %v6144_v1  ;;  %v6147_v50 = vadd.f32 %v9028_v47, %v5950_v5  ;;  %v6160_v35 = vmax.f32 %v6156_v19, 0.0  ;;  %v6491_v5 = vld [vmem:[%s11976_s23 + $0x1d8] sm:$0xff]  ;;  %v6769_v1 = vld [vmem:[%s11976_s23 + $0x368] sm:$0xff]  ;;  %v6490_v47 = vld [vmem:[%s11976_s23 + $0x1d0] sm:$0xff] }
0x3443   :  { %v6482_v19 = vld [vmem:[%s11976_s23 + $0x190] sm:$0xff] }
0x3444   :  { %v6159_v23 = vmax.f32 %v6155_v14, 0.0  ;;  %v6158_v2 = vadd.f32 %v11107_v43, %v6147_v50  ;;  %v6171_v44 = vmul.f32 %v11111_v3, %v6160_v35  ;;  %v6768_v14 = vld [vmem:[%s11976_s23 + $0x360] sm:$0xff]  ;;  %v6489_v50 = vld [vmem:[%s11976_s23 + $0x1c8] sm:$0xff] }
0x3446   :  { %v6170_v4 = vmul.f32 %v11111_v3, %v6159_v23  ;;  %v6162_v51 = vmax.f32 %v6158_v2, 0.0  ;;  %v6182_v39 = vadd.f32 %v11115_v54, %v6171_v44  ;;  %v6767_v23 = vld [vmem:[%s11976_s23 + $0x358] sm:$0xff]  ;;  %v6488_v2 = vld [vmem:[%s11976_s23 + $0x1c0] sm:$0xff]  ;;  %v6953_v44 = vld [vmem:[%s11976_s23 + $0x468] sm:$0xff] }
0x3448   :  { %v6181_v15 = vadd.f32 %v11115_v54, %v6170_v4  ;;  %v6173_v29 = vmul.f32 %v11111_v3, %v6162_v51  ;;  %v11233_v59 = vmax.f32 %v6182_v39, 0.0  ;;  %v6766_v4 = vld [vmem:[%s11976_s23 + $0x350] sm:$0xff]  ;;  %v6487_v51 = vld [vmem:[%s11976_s23 + $0x1b8] sm:$0xff] }
0x3449   :  { %v6670_v39 = vld [vmem:[%s11976_s23 + $0x2b0] sm:$0xff] }
0x344a   :  { %v11119_v57 = vmax.f32 %v6181_v15, 0.0  ;;  %v11122_v53 = vadd.f32 %v11115_v54, %v6173_v29  ;;  %v6486_v15 = vld [vmem:[%s11976_s23 + $0x1b0] sm:$0xff]  ;;  %v6764_v29 = vld [vmem:[%s11976_s23 + $0x340] sm:$0xff] }
0x344c   :  { %v6404_v6 = vrot.slane %v11119_v57, 4  ;;  %7966 = vmatmul.mubr.msk.f32.vlgmr.msra.gmra.mxu0 %vm6219_vm9, %v11119_v57  ;;  %v6312_v42 = vrot.slane %v11119_v57, 2  ;;  %v6496_v35 = vrot.slane %v11119_v57, 6  ;;  %v6772_v57 = vrot.slane %v11233_v59, 4 }
0x344d   :  { %6332 = vmatpush1.msra.mxu0 %v6310_v56  ;;  %6379 = vmatprep.mubr.f32.mxu0 %v9536_v0  ;;  %v6763_v56 = vld [vmem:[%s11976_s23 + $0x338] sm:$0xff] }
0x344e   :  { %6333 = vmatprep.subr.mxu0 %v6309_v48  ;;  %7968 = vmatmul.mubr.msk.f32.vlgmr.msra.gmra.mxu1 %vm6219_vm9, %v6404_v6  ;;  %v6484_v48 = vld [vmem:[%s11976_s23 + $0x1a0] sm:$0xff]  ;;  %v6762_v6 = vld [vmem:[%s11976_s23 + $0x330] sm:$0xff] }
0x344f   :  { %6334 = vmatpush1.msra.mxu0 %v6308_v17  ;;  %6608 = vmatpush1.msra.mxu1 %v6586_v18  ;;  %v6483_v17 = vld [vmem:[%s11976_s23 + $0x198] sm:$0xff]  ;;  %v6761_v18 = vld [vmem:[%s11976_s23 + $0x328] sm:$0xff] }
0x3450   :  { %6335 = vmatprep.subr.mxu0 %v6307_v30  ;;  %6609 = vmatprep.subr.mxu1 %v6585_v31  ;;  %v6760_v30 = vld [vmem:[%s11976_s23 + $0x320] sm:$0xff]  ;;  %v6481_v31 = vld [vmem:[%s11976_s23 + $0x188] sm:$0xff] }
0x3451   :  { %6336 = vmatpush1.msra.mxu0 %v6306_v32  ;;  %6610 = vmatpush1.msra.mxu1 %v6584_v33  ;;  %v6759_v32 = vld [vmem:[%s11976_s23 + $0x318] sm:$0xff]  ;;  %v6480_v33 = vld [vmem:[%s11976_s23 + $0x180] sm:$0xff] }
0x3452   :  { %6337 = vmatprep.subr.mxu0 %v6305_v34  ;;  %6611 = vmatprep.subr.mxu1 %v6583_v7  ;;  %v6135_v34 = vpop.f32.mrf.mxu0  ;;  %v6758_v7 = vld [vmem:[%s11976_s23 + $0x310] sm:$0xff] }
0x3453   :  { %6338 = vmatpush1.msra.mxu0 %v6304_v21  ;;  %6612 = vmatpush1.msra.mxu1 %v6582_v22  ;;  %v5945_v21 = vadd.f32 %v11103_v60, %v10970_v62  ;;  %v6679_v22 = vld [vmem:[%s11976_s23 + $0x2f8] sm:$0xff]  ;;  %v6756_v62 = vld [vmem:[%s11976_s23 + $0x300] sm:$0xff]  ;;  %v6677_v60 = vld [vmem:[%s11976_s23 + $0x2e8] sm:$0xff] }
0x3454   :  { %6339 = vmatprep.subr.mxu0 %v6303_v36  ;;  %6613 = vmatprep.subr.mxu1 %v6581_v27  ;;  %v6757_v36 = vld [vmem:[%s11976_s23 + $0x308] sm:$0xff]  ;;  %v6678_v27 = vld [vmem:[%s11976_s23 + $0x2f0] sm:$0xff] }
0x3455   :  { %6340 = vmatpush1.msra.mxu0 %v6302_v28  ;;  %6614 = vmatpush1.msra.mxu1 %v6580_v9  ;;  %v6146_v28 = vadd.f32 %v6135_v34, %v5945_v21  ;;  %v6955_v9 = vld [vmem:[%s11976_s23 + $0x478] sm:$0xff]  ;;  %v7133_v34 = vld [vmem:[%s11976_s23 + $0x548] sm:$0xff]  ;;  %v7132_v21 = vld [vmem:[%s11976_s23 + $0x540] sm:$0xff] }
0x3456   :  { %6341 = vmatprep.subr.mxu0 %v6301_v24  ;;  %6615 = vmatprep.subr.mxu1 %v6579_v10  ;;  %v6676_v24 = vld [vmem:[%s11976_s23 + $0x2e0] sm:$0xff]  ;;  %v6954_v10 = vld [vmem:[%s11976_s23 + $0x470] sm:$0xff] }
0x3457   :  { %6342 = vmatpush1.msra.mxu0 %v6300_v12  ;;  %6616 = vmatpush1.msra.mxu1 %v6578_v11  ;;  %v6675_v12 = vld [vmem:[%s11976_s23 + $0x2d8] sm:$0xff]  ;;  %v6157_v11 = vadd.f32 %v11107_v43, %v6146_v28  ;;  %v6673_v43 = vld [vmem:[%s11976_s23 + $0x2c8] sm:$0xff] }
0x3458   :  { %6343 = vmatprep.subr.mxu0 %v6299_v25  ;;  %6617 = vmatprep.subr.mxu1 %v6577_v52  ;;  %v6674_v25 = vld [vmem:[%s11976_s23 + $0x2d0] sm:$0xff]  ;;  %v6952_v52 = vld [vmem:[%s11976_s23 + $0x460] sm:$0xff]  ;;  %v6851_v28 = vld [vmem:[%s11976_s23 + $0x398] sm:$0xff] }
0x3459   :  { %6344 = vmatpush1.msra.mxu0 %v6298_v45  ;;  %6618 = vmatpush1.msra.mxu1 %v6576_v46  ;;  %v6951_v45 = vld [vmem:[%s11976_s23 + $0x458] sm:$0xff]  ;;  %v6672_v46 = vld [vmem:[%s11976_s23 + $0x2c0] sm:$0xff] }
0x345a   :  { %6345 = vmatprep.subr.mxu0 %v6297_v13  ;;  %6619 = vmatprep.subr.mxu1 %v6575_v37  ;;  %v6950_v13 = vld [vmem:[%s11976_s23 + $0x450] sm:$0xff]  ;;  %v6671_v37 = vld [vmem:[%s11976_s23 + $0x2b8] sm:$0xff] }
0x345b   :  { %6346 = vmatpush1.msra.mxu0 %v6296_v38  ;;  %6620 = vmatpush1.msra.mxu1 %v6574_v40  ;;  %v6161_v38 = vmax.f32 %v6157_v11, 0.0  ;;  %v6949_v40 = vld [vmem:[%s11976_s23 + $0x448] sm:$0xff]  ;;  %v7047_v11 = vld [vmem:[%s11976_s23 + $0x4f8] sm:$0xff] }
0x345c   :  { %7967 = vmatmul.mubr.msk.f32.vlgmr.msra.gmra.mxu0 %vm6219_vm9, %v6312_v42  ;;  %6515 = vmatprep.subr.mxu0 %v6495_v26  ;;  %v6948_v26 = vld [vmem:[%s11976_s23 + $0x440] sm:$0xff]  ;;  %v6669_v42 = vld [vmem:[%s11976_s23 + $0x2a8] sm:$0xff] }
0x345d   :  { %6621 = vmatprep.subr.mxu1 %v6573_v8  ;;  %6516 = vmatpush1.msra.mxu0 %v6494_v16  ;;  %v6947_v8 = vld [vmem:[%s11976_s23 + $0x438] sm:$0xff]  ;;  %v6668_v16 = vld [vmem:[%s11976_s23 + $0x2a0] sm:$0xff] }
0x345e   :  { %6622 = vmatpush1.msra.mxu1 %v6572_v20  ;;  %6655 = vmatprep.mubr.f32.mxu1 %v9536_v0  ;;  %v6946_v20 = vld [vmem:[%s11976_s23 + $0x430] sm:$0xff] }
0x345f   :  { %6517 = vmatprep.subr.mxu0 %v6493_v58  ;;  %7970 = vmatmul.mubr.msk.f32.vlgmr.msra.gmra.mxu1 %vm6219_vm9, %v11233_v59  ;;  %v6667_v58 = vld [vmem:[%s11976_s23 + $0x298] sm:$0xff] }
0x3460   :  { %6791 = vmatprep.subr.mxu1 %v6771_v61  ;;  %6518 = vmatpush1.msra.mxu0 %v6492_v63  ;;  %v6172_v61 = vmul.f32 %v11111_v3, %v6161_v38  ;;  %v6945_v63 = vld [vmem:[%s11976_s23 + $0x428] sm:$0xff]  ;;  %v7043_v38 = vld [vmem:[%s11976_s23 + $0x4d8] sm:$0xff] }
0x3461   :  { %6792 = vmatpush1.msra.mxu1 %v6770_v41  ;;  %6519 = vmatprep.subr.mxu0 %v6491_v5  ;;  %v6666_v41 = vld [vmem:[%s11976_s23 + $0x290] sm:$0xff]  ;;  %v6944_v5 = vld [vmem:[%s11976_s23 + $0x420] sm:$0xff]  ;;  %v6665_v3 = vld [vmem:[%s11976_s23 + $0x288] sm:$0xff] }
0x3462   :  { %6793 = vmatprep.subr.mxu1 %v6769_v1  ;;  %6520 = vmatpush1.msra.mxu0 %v6490_v47  ;;  %v6943_v1 = vld [vmem:[%s11976_s23 + $0x418] sm:$0xff]  ;;  %v6664_v47 = vld [vmem:[%s11976_s23 + $0x280] sm:$0xff] }
0x3463   :  { %6794 = vmatpush1.msra.mxu1 %v6768_v14  ;;  %6521 = vmatprep.subr.mxu0 %v6489_v50  ;;  %v6942_v14 = vld [vmem:[%s11976_s23 + $0x410] sm:$0xff]  ;;  %v6183_v50 = vadd.f32 %v11115_v54, %v6172_v61  ;;  %v6940_v54 = vld [vmem:[%s11976_s23 + $0x400] sm:$0xff]  ;;  %v7317_v61 = vld [vmem:[%s11976_s23 + $0x648] sm:$0xff] }
0x3464   :  { %6795 = vmatprep.subr.mxu1 %v6767_v23  ;;  %6522 = vmatpush1.msra.mxu0 %v6488_v2  ;;  %v6863_v23 = vld [vmem:[%s11976_s23 + $0x3f8] sm:$0xff]  ;;  %v6680_v2 = vrot.slane %v11233_v59, 2 }
0x3465   :  { %6796 = vmatpush1.msra.mxu1 %v6766_v4  ;;  %6523 = vmatprep.subr.mxu0 %v6487_v51  ;;  %v6941_v4 = vld [vmem:[%s11976_s23 + $0x408] sm:$0xff]  ;;  %v6862_v51 = vld [vmem:[%s11976_s23 + $0x3f0] sm:$0xff] }
0x3466   :  { %6797 = vmatprep.subr.mxu1 %v6765_v49  ;;  %6524 = vmatpush1.msra.mxu0 %v6486_v15  ;;  %v6861_v49 = vld [vmem:[%s11976_s23 + $0x3e8] sm:$0xff]  ;;  %v11444_v15 = vmax.f32 %v6183_v50, 0.0 }
0x3467   :  { %6798 = vmatpush1.msra.mxu1 %v6764_v29  ;;  %6525 = vmatprep.subr.mxu0 %v6485_v55  ;;  %v7139_v29 = vld [vmem:[%s11976_s23 + $0x578] sm:$0xff]  ;;  %v6860_v55 = vld [vmem:[%s11976_s23 + $0x3e0] sm:$0xff]  ;;  %v7313_v50 = vld [vmem:[%s11976_s23 + $0x628] sm:$0xff] }
0x3468   :  { %6799 = vmatprep.subr.mxu1 %v6763_v56  ;;  %6526 = vmatpush1.msra.mxu0 %v6484_v48  ;;  %v7138_v56 = vld [vmem:[%s11976_s23 + $0x570] sm:$0xff]  ;;  %v6859_v48 = vld [vmem:[%s11976_s23 + $0x3d8] sm:$0xff] }
0x3469   :  { %6800 = vmatpush1.msra.mxu1 %v6762_v6  ;;  %6527 = vmatprep.subr.mxu0 %v6483_v17  ;;  %v7137_v6 = vld [vmem:[%s11976_s23 + $0x568] sm:$0xff]  ;;  %v6858_v17 = vld [vmem:[%s11976_s23 + $0x3d0] sm:$0xff] }
0x346a   :  { %6801 = vmatprep.subr.mxu1 %v6761_v18  ;;  %6528 = vmatpush1.msra.mxu0 %v6482_v19  ;;  %v7136_v18 = vld [vmem:[%s11976_s23 + $0x560] sm:$0xff]  ;;  %v6857_v19 = vld [vmem:[%s11976_s23 + $0x3c8] sm:$0xff] }
0x346b   :  { %6802 = vmatpush1.msra.mxu1 %v6760_v30  ;;  %6529 = vmatprep.subr.mxu0 %v6481_v31  ;;  %v7135_v30 = vld [vmem:[%s11976_s23 + $0x558] sm:$0xff]  ;;  %v6856_v31 = vld [vmem:[%s11976_s23 + $0x3c0] sm:$0xff] }
0x346c   :  { %6803 = vmatprep.subr.mxu1 %v6759_v32  ;;  %6530 = vmatpush1.msra.mxu0 %v6480_v33  ;;  %v7134_v32 = vld [vmem:[%s11976_s23 + $0x550] sm:$0xff]  ;;  %v6855_v33 = vld [vmem:[%s11976_s23 + $0x3b8] sm:$0xff] }
0x346d   :  { %6563 = vmatprep.mubr.f32.mxu0 %v9536_v0  ;;  %6804 = vmatpush1.msra.mxu1 %v6758_v7  ;;  %v6854_v7 = vld [vmem:[%s11976_s23 + $0x3b0] sm:$0xff] }
0x346e   :  { %7969 = vmatmul.mubr.msk.f32.vlgmr.msra.gmra.mxu0 %vm6219_vm9, %v6496_v35  ;;  %6699 = vmatprep.subr.mxu0 %v6679_v22  ;;  %v6853_v22 = vld [vmem:[%s11976_s23 + $0x3a8] sm:$0xff]  ;;  %v7131_v35 = vld [vmem:[%s11976_s23 + $0x538] sm:$0xff] }
0x346f   :  { %6805 = vmatprep.subr.mxu1 %v6757_v36  ;;  %6700 = vmatpush1.msra.mxu0 %v6678_v27  ;;  %v6852_v36 = vld [vmem:[%s11976_s23 + $0x3a0] sm:$0xff]  ;;  %v7130_v27 = vld [vmem:[%s11976_s23 + $0x530] sm:$0xff] }
0x3470   :  { %6806 = vmatpush1.msra.mxu1 %v6756_v62  ;;  %6839 = vmatprep.mubr.f32.mxu1 %v9536_v0  ;;  %v7129_v62 = vld [vmem:[%s11976_s23 + $0x528] sm:$0xff] }
0x3471   :  { %6701 = vmatprep.subr.mxu0 %v6677_v60  ;;  %7972 = vmatmul.mubr.msk.f32.vlgmr.msra.gmra.mxu1 %vm6219_vm9, %v6772_v57  ;;  %v6850_v60 = vld [vmem:[%s11976_s23 + $0x390] sm:$0xff]  ;;  %v7128_v57 = vld [vmem:[%s11976_s23 + $0x520] sm:$0xff] }
0x3472   :  { %6975 = vmatprep.subr.mxu1 %v6955_v9  ;;  %6702 = vmatpush1.msra.mxu0 %v6676_v24  ;;  %v6849_v9 = vld [vmem:[%s11976_s23 + $0x388] sm:$0xff]  ;;  %v7127_v24 = vld [vmem:[%s11976_s23 + $0x518] sm:$0xff] }
0x3473   :  { %6976 = vmatpush1.msra.mxu1 %v6954_v10  ;;  %6703 = vmatprep.subr.mxu0 %v6675_v12  ;;  %v6848_v10 = vld [vmem:[%s11976_s23 + $0x380] sm:$0xff]  ;;  %v7126_v12 = vld [vmem:[%s11976_s23 + $0x510] sm:$0xff] }
0x3474   :  { %6977 = vmatprep.subr.mxu1 %v6953_v44  ;;  %6704 = vmatpush1.msra.mxu0 %v6674_v25  ;;  %v6864_v44 = vrot.slane %v11233_v59, 6  ;;  %v7125_v25 = vld [vmem:[%s11976_s23 + $0x508] sm:$0xff] }
0x3475   :  { %6978 = vmatpush1.msra.mxu1 %v6952_v52  ;;  %6705 = vmatprep.subr.mxu0 %v6673_v43  ;;  %v7046_v52 = vld [vmem:[%s11976_s23 + $0x4f0] sm:$0xff]  ;;  %v7124_v43 = vld [vmem:[%s11976_s23 + $0x500] sm:$0xff]  ;;  %v7045_v59 = vld [vmem:[%s11976_s23 + $0x4e8] sm:$0xff] }
0x3476   :  { %6979 = vmatprep.subr.mxu1 %v6951_v45  ;;  %6706 = vmatpush1.msra.mxu0 %v6672_v46  ;;  %v7140_v45 = vrot.slane %v11444_v15, 4  ;;  %v7323_v46 = vld [vmem:[%s11976_s23 + $0x678] sm:$0xff] }
0x3477   :  { %6980 = vmatpush1.msra.mxu1 %v6950_v13  ;;  %6707 = vmatprep.subr.mxu0 %v6671_v37  ;;  %v7044_v13 = vld [vmem:[%s11976_s23 + $0x4e0] sm:$0xff]  ;;  %v7322_v37 = vld [vmem:[%s11976_s23 + $0x670] sm:$0xff] }
0x3478   :  { %6981 = vmatprep.subr.mxu1 %v6949_v40  ;;  %6708 = vmatpush1.msra.mxu0 %v6670_v39  ;;  %v7321_v40 = vld [vmem:[%s11976_s23 + $0x668] sm:$0xff]  ;;  %v7042_v39 = vld [vmem:[%s11976_s23 + $0x4d0] sm:$0xff] }
0x3479   :  { %6982 = vmatpush1.msra.mxu1 %v6948_v26  ;;  %6709 = vmatprep.subr.mxu0 %v6669_v42  ;;  %v7320_v26 = vld [vmem:[%s11976_s23 + $0x660] sm:$0xff]  ;;  %v7041_v42 = vld [vmem:[%s11976_s23 + $0x4c8] sm:$0xff] }
0x347a   :  { %6983 = vmatprep.subr.mxu1 %v6947_v8  ;;  %6710 = vmatpush1.msra.mxu0 %v6668_v16  ;;  %v7319_v8 = vld [vmem:[%s11976_s23 + $0x658] sm:$0xff]  ;;  %v7040_v16 = vld [vmem:[%s11976_s23 + $0x4c0] sm:$0xff] }
0x347b   :  { %6984 = vmatpush1.msra.mxu1 %v6946_v20  ;;  %6711 = vmatprep.subr.mxu0 %v6667_v58  ;;  %v7318_v20 = vld [vmem:[%s11976_s23 + $0x650] sm:$0xff]  ;;  %v7039_v58 = vld [vmem:[%s11976_s23 + $0x4b8] sm:$0xff] }
0x347c   :  { %6985 = vmatprep.subr.mxu1 %v6945_v63  ;;  %6712 = vmatpush1.msra.mxu0 %v6666_v41  ;;  %v7038_v63 = vld [vmem:[%s11976_s23 + $0x4b0] sm:$0xff]  ;;  %v7316_v41 = vld [vmem:[%s11976_s23 + $0x640] sm:$0xff] }
0x347d   :  { %6986 = vmatpush1.msra.mxu1 %v6944_v5  ;;  %6713 = vmatprep.subr.mxu0 %v6665_v3  ;;  %v7037_v5 = vld [vmem:[%s11976_s23 + $0x4a8] sm:$0xff]  ;;  %v7315_v3 = vld [vmem:[%s11976_s23 + $0x638] sm:$0xff] }
0x347e   :  { %6987 = vmatprep.subr.mxu1 %v6943_v1  ;;  %6714 = vmatpush1.msra.mxu0 %v6664_v47  ;;  %v7036_v1 = vld [vmem:[%s11976_s23 + $0x4a0] sm:$0xff]  ;;  %v7314_v47 = vld [vmem:[%s11976_s23 + $0x630] sm:$0xff] }
0x347f   :  { %6747 = vmatprep.mubr.f32.mxu0 %v9536_v0  ;;  %6988 = vmatpush1.msra.mxu1 %v6942_v14  ;;  %v7035_v14 = vld [vmem:[%s11976_s23 + $0x498] sm:$0xff] }
0x3480   :  { %7971 = vmatmul.mubr.msk.f32.vlgmr.msra.gmra.mxu0 %vm6219_vm9, %v6680_v2  ;;  %6883 = vmatprep.subr.mxu0 %v6863_v23  ;;  %v7034_v23 = vld [vmem:[%s11976_s23 + $0x490] sm:$0xff]  ;;  %v7312_v2 = vld [vmem:[%s11976_s23 + $0x620] sm:$0xff] }
0x3481   :  { %6989 = vmatprep.subr.mxu1 %v6941_v4  ;;  %6884 = vmatpush1.msra.mxu0 %v6862_v51  ;;  %v7033_v4 = vld [vmem:[%s11976_s23 + $0x488] sm:$0xff]  ;;  %v7311_v51 = vld [vmem:[%s11976_s23 + $0x618] sm:$0xff] }
0x3482   :  { %6990 = vmatpush1.msra.mxu1 %v6940_v54  ;;  %7023 = vmatprep.mubr.f32.mxu1 %v9536_v0  ;;  %v7032_v54 = vld [vmem:[%s11976_s23 + $0x480] sm:$0xff] }
0x3483   :  { %6885 = vmatprep.subr.mxu0 %v6861_v49  ;;  %7974 = vmatmul.mubr.msk.f32.vlgmr.msra.gmra.mxu1 %vm6219_vm9, %v11444_v15  ;;  %v7310_v49 = vld [vmem:[%s11976_s23 + $0x610] sm:$0xff] }
0x3484   :  { %7159 = vmatprep.subr.mxu1 %v7139_v29  ;;  %6886 = vmatpush1.msra.mxu0 %v6860_v55  ;;  %v7231_v29 = vld [vmem:[%s11976_s23 + $0x5f8] sm:$0xff]  ;;  %v7048_v55 = vrot.slane %v11444_v15, 2 }
0x3485   :  { %7160 = vmatpush1.msra.mxu1 %v7138_v56  ;;  %6887 = vmatprep.subr.mxu0 %v6859_v48  ;;  %v7309_v56 = vld [vmem:[%s11976_s23 + $0x608] sm:$0xff]  ;;  %v7230_v48 = vld [vmem:[%s11976_s23 + $0x5f0] sm:$0xff] }
0x3486   :  { %7161 = vmatprep.subr.mxu1 %v7137_v6  ;;  %6888 = vmatpush1.msra.mxu0 %v6858_v17  ;;  %v7308_v6 = vld [vmem:[%s11976_s23 + $0x600] sm:$0xff]  ;;  %v7229_v17 = vld [vmem:[%s11976_s23 + $0x5e8] sm:$0xff] }
0x3487   :  { %7162 = vmatpush1.msra.mxu1 %v7136_v18  ;;  %6889 = vmatprep.subr.mxu0 %v6857_v19  ;;  %v11651_v18 = vmax.f32 %v11122_v53, 0.0  ;;  %v7507_v19 = vld [vmem:[%s11976_s23 + $0x778] sm:$0xff] }
0x3488   :  { %7163 = vmatprep.subr.mxu1 %v7135_v30  ;;  %6890 = vmatpush1.msra.mxu0 %v6856_v31  ;;  %v7228_v30 = vld [vmem:[%s11976_s23 + $0x5e0] sm:$0xff]  ;;  %v7506_v31 = vld [vmem:[%s11976_s23 + $0x770] sm:$0xff]  ;;  %v7227_v53 = vld [vmem:[%s11976_s23 + $0x5d8] sm:$0xff] }
0x3489   :  { %7164 = vmatpush1.msra.mxu1 %v7134_v32  ;;  %6891 = vmatprep.subr.mxu0 %v6855_v33  ;;  %v7505_v32 = vld [vmem:[%s11976_s23 + $0x768] sm:$0xff]  ;;  %v7226_v33 = vld [vmem:[%s11976_s23 + $0x5d0] sm:$0xff] }
0x348a   :  { %7165 = vmatprep.subr.mxu1 %v7133_v34  ;;  %6892 = vmatpush1.msra.mxu0 %v6854_v7  ;;  %v7504_v34 = vld [vmem:[%s11976_s23 + $0x760] sm:$0xff]  ;;  %v7225_v7 = vld [vmem:[%s11976_s23 + $0x5c8] sm:$0xff] }
0x348b   :  { %7166 = vmatpush1.msra.mxu1 %v7132_v21  ;;  %6893 = vmatprep.subr.mxu0 %v6853_v22  ;;  %v7503_v21 = vld [vmem:[%s11976_s23 + $0x758] sm:$0xff]  ;;  %v7224_v22 = vld [vmem:[%s11976_s23 + $0x5c0] sm:$0xff] }
0x348c   :  { %7167 = vmatprep.subr.mxu1 %v7131_v35  ;;  %6894 = vmatpush1.msra.mxu0 %v6852_v36  ;;  %v7502_v35 = vld [vmem:[%s11976_s23 + $0x750] sm:$0xff]  ;;  %v7223_v36 = vld [vmem:[%s11976_s23 + $0x5b8] sm:$0xff] }
0x348d   :  { %7168 = vmatpush1.msra.mxu1 %v7130_v27  ;;  %6895 = vmatprep.subr.mxu0 %v6851_v28  ;;  %v7501_v27 = vld [vmem:[%s11976_s23 + $0x748] sm:$0xff]  ;;  %v7222_v28 = vld [vmem:[%s11976_s23 + $0x5b0] sm:$0xff] }
0x348e   :  { %7169 = vmatprep.subr.mxu1 %v7129_v62  ;;  %6896 = vmatpush1.msra.mxu0 %v6850_v60  ;;  %v7500_v62 = vld [vmem:[%s11976_s23 + $0x740] sm:$0xff]  ;;  %v7221_v60 = vld [vmem:[%s11976_s23 + $0x5a8] sm:$0xff] }
0x348f   :  { %7170 = vmatpush1.msra.mxu1 %v7128_v57  ;;  %6897 = vmatprep.subr.mxu0 %v6849_v9  ;;  %v7499_v57 = vld [vmem:[%s11976_s23 + $0x738] sm:$0xff]  ;;  %v7220_v9 = vld [vmem:[%s11976_s23 + $0x5a0] sm:$0xff] }
0x3490   :  { %7171 = vmatprep.subr.mxu1 %v7127_v24  ;;  %6898 = vmatpush1.msra.mxu0 %v6848_v10  ;;  %v7498_v24 = vld [vmem:[%s11976_s23 + $0x730] sm:$0xff]  ;;  %v7219_v10 = vld [vmem:[%s11976_s23 + $0x598] sm:$0xff] }
0x3491   :  { %6931 = vmatprep.mubr.f32.mxu0 %v9536_v0  ;;  %7172 = vmatpush1.msra.mxu1 %v7126_v12  ;;  %v7497_v12 = vld [vmem:[%s11976_s23 + $0x728] sm:$0xff] }
0x3492   :  { %7973 = vmatmul.mubr.msk.f32.vlgmr.msra.gmra.mxu0 %vm6219_vm9, %v6864_v44  ;;  %7067 = vmatprep.subr.mxu0 %v7047_v11  ;;  %v7218_v11 = vld [vmem:[%s11976_s23 + $0x590] sm:$0xff]  ;;  %v7496_v44 = vld [vmem:[%s11976_s23 + $0x720] sm:$0xff] }
0x3493   :  { %7173 = vmatprep.subr.mxu1 %v7125_v25  ;;  %7068 = vmatpush1.msra.mxu0 %v7046_v52  ;;  %v7217_v25 = vld [vmem:[%s11976_s23 + $0x588] sm:$0xff]  ;;  %v7495_v52 = vld [vmem:[%s11976_s23 + $0x718] sm:$0xff] }
0x3494   :  { %7174 = vmatpush1.msra.mxu1 %v7124_v43  ;;  %7207 = vmatprep.mubr.f32.mxu1 %v9536_v0  ;;  %v7216_v43 = vld [vmem:[%s11976_s23 + $0x580] sm:$0xff] }
0x3495   :  { %7069 = vmatprep.subr.mxu0 %v7045_v59  ;;  %7976 = vmatmul.mubr.msk.f32.vlgmr.msra.gmra.mxu1 %vm6219_vm9, %v7140_v45  ;;  %v7494_v59 = vld [vmem:[%s11976_s23 + $0x710] sm:$0xff]  ;;  %v7415_v45 = vld [vmem:[%s11976_s23 + $0x6f8] sm:$0xff] }
0x3496   :  { %7343 = vmatprep.subr.mxu1 %v7323_v46  ;;  %7070 = vmatpush1.msra.mxu0 %v7044_v13  ;;  %v7232_v46 = vrot.slane %v11444_v15, 6  ;;  %v7493_v13 = vld [vmem:[%s11976_s23 + $0x708] sm:$0xff] }
0x3497   :  { %7344 = vmatpush1.msra.mxu1 %v7322_v37  ;;  %7071 = vmatprep.subr.mxu0 %v7043_v38  ;;  %v7414_v37 = vld [vmem:[%s11976_s23 + $0x6f0] sm:$0xff]  ;;  %v7492_v38 = vld [vmem:[%s11976_s23 + $0x700] sm:$0xff]  ;;  %v7413_v15 = vld [vmem:[%s11976_s23 + $0x6e8] sm:$0xff] }
0x3498   :  { %7345 = vmatprep.subr.mxu1 %v7321_v40  ;;  %7072 = vmatpush1.msra.mxu0 %v7042_v39  ;;  %v7508_v40 = vrot.slane %v11651_v18, 4  ;;  %v7412_v39 = vld [vmem:[%s11976_s23 + $0x6e0] sm:$0xff] }
0x3499   :  { %7346 = vmatpush1.msra.mxu1 %v7320_v26  ;;  %7073 = vmatprep.subr.mxu0 %v7041_v42  ;;  %v7411_v26 = vld [vmem:[%s11976_s23 + $0x6d8] sm:$0xff]  ;;  %v7410_v42 = vld [vmem:[%s11976_s23 + $0x6d0] sm:$0xff] }
0x349a   :  { %7347 = vmatprep.subr.mxu1 %v7319_v8  ;;  %7074 = vmatpush1.msra.mxu0 %v7040_v16  ;;  %v7409_v8 = vld [vmem:[%s11976_s23 + $0x6c8] sm:$0xff]  ;;  %v7408_v16 = vld [vmem:[%s11976_s23 + $0x6c0] sm:$0xff] }
0x349b   :  { %7348 = vmatpush1.msra.mxu1 %v7318_v20  ;;  %7075 = vmatprep.subr.mxu0 %v7039_v58  ;;  %v7407_v20 = vld [vmem:[%s11976_s23 + $0x6b8] sm:$0xff]  ;;  %v7406_v58 = vld [vmem:[%s11976_s23 + $0x6b0] sm:$0xff] }
0x349c   :  { %7349 = vmatprep.subr.mxu1 %v7317_v61  ;;  %7076 = vmatpush1.msra.mxu0 %v7038_v63  ;;  %v7405_v61 = vld [vmem:[%s11976_s23 + $0x6a8] sm:$0xff]  ;;  %v7404_v63 = vld [vmem:[%s11976_s23 + $0x6a0] sm:$0xff] }
0x349d   :  { %7350 = vmatpush1.msra.mxu1 %v7316_v41  ;;  %7077 = vmatprep.subr.mxu0 %v7037_v5  ;;  %v7403_v41 = vld [vmem:[%s11976_s23 + $0x698] sm:$0xff]  ;;  %v7402_v5 = vld [vmem:[%s11976_s23 + $0x690] sm:$0xff] }
0x349e   :  { %7351 = vmatprep.subr.mxu1 %v7315_v3  ;;  %7078 = vmatpush1.msra.mxu0 %v7036_v1  ;;  %v7401_v3 = vld [vmem:[%s11976_s23 + $0x688] sm:$0xff]  ;;  %v7400_v1 = vld [vmem:[%s11976_s23 + $0x680] sm:$0xff] }
0x349f   :  { %7352 = vmatpush1.msra.mxu1 %v7314_v47  ;;  %7079 = vmatprep.subr.mxu0 %v7035_v14  ;;  %v7599_v47 = vld [vmem:[%s11976_s23 + $0x7f8] sm:$0xff]  ;;  %v7416_v14 = vrot.slane %v11651_v18, 2 }
0x34a0   :  { %7353 = vmatprep.subr.mxu1 %v7313_v50  ;;  %7080 = vmatpush1.msra.mxu0 %v7034_v23  ;;  %v7598_v50 = vld [vmem:[%s11976_s23 + $0x7f0] sm:$0xff]  ;;  %v7597_v23 = vld [vmem:[%s11976_s23 + $0x7e8] sm:$0xff] }
0x34a1   :  { %7354 = vmatpush1.msra.mxu1 %v7312_v2  ;;  %7081 = vmatprep.subr.mxu0 %v7033_v4  ;;  %v7596_v2 = vld [vmem:[%s11976_s23 + $0x7e0] sm:$0xff]  ;;  %v7595_v4 = vld [vmem:[%s11976_s23 + $0x7d8] sm:$0xff] }
0x34a2   :  { %7355 = vmatprep.subr.mxu1 %v7311_v51  ;;  %7082 = vmatpush1.msra.mxu0 %v7032_v54  ;;  %v7594_v51 = vld [vmem:[%s11976_s23 + $0x7d0] sm:$0xff]  ;;  %v7593_v54 = vld [vmem:[%s11976_s23 + $0x7c8] sm:$0xff] }
0x34a3   :  { %7115 = vmatprep.mubr.f32.mxu0 %v9536_v0  ;;  %7356 = vmatpush1.msra.mxu1 %v7310_v49  ;;  %v7592_v49 = vld [vmem:[%s11976_s23 + $0x7c0] sm:$0xff] }
0x34a4   :  { %7975 = vmatmul.mubr.msk.f32.vlgmr.msra.gmra.mxu0 %vm6219_vm9, %v7048_v55  ;;  %7251 = vmatprep.subr.mxu0 %v7231_v29  ;;  %v7590_v29 = vld [vmem:[%s11976_s23 + $0x7b0] sm:$0xff]  ;;  %v7589_v55 = vld [vmem:[%s11976_s23 + $0x7a8] sm:$0xff] }
0x34a5   :  { %7357 = vmatprep.subr.mxu1 %v7309_v56  ;;  %7252 = vmatpush1.msra.mxu0 %v7230_v48  ;;  %v7588_v56 = vld [vmem:[%s11976_s23 + $0x7a0] sm:$0xff]  ;;  %v7587_v48 = vld [vmem:[%s11976_s23 + $0x798] sm:$0xff] }
0x34a6   :  { %7358 = vmatpush1.msra.mxu1 %v7308_v6  ;;  %7391 = vmatprep.mubr.f32.mxu1 %v9536_v0  ;;  %v7586_v6 = vld [vmem:[%s11976_s23 + $0x790] sm:$0xff] }
0x34a7   :  { %7253 = vmatprep.subr.mxu0 %v7229_v17  ;;  %7978 = vmatmul.mubr.msk.f32.vlgmr.msra.gmra.mxu1 %vm6219_vm9, %v11651_v18  ;;  %v7585_v17 = vld [vmem:[%s11976_s23 + $0x788] sm:$0xff] }
0x34a8   :  { %7527 = vmatprep.subr.mxu1 %v7507_v19  ;;  %7254 = vmatpush1.msra.mxu0 %v7228_v30  ;;  %v7584_v19 = vld [vmem:[%s11976_s23 + $0x780] sm:$0xff]  ;;  %v7600_v30 = vrot.slane %v11651_v18, 6  ;;  %v7692_v18 = vld [vmem:[%s11978_s25 + $0x70] sm:$0xff] }
0x34a9   :  { %7528 = vmatpush1.msra.mxu1 %v7506_v31  ;;  %7255 = vmatprep.subr.mxu0 %v7227_v53  ;;  %v7709_v31 = vld [vmem:[%s11978_s25 + $0xf8] sm:$0xff] }
0x34aa   :  { %7529 = vmatprep.subr.mxu1 %v7505_v32  ;;  %7256 = vmatpush1.msra.mxu0 %v7226_v33  ;;  %v7693_v53 = vld [vmem:[%s11978_s25 + $0x78] sm:$0xff]  ;;  %v7708_v32 = vld [vmem:[%s11978_s25 + $0xf0] sm:$0xff]  ;;  %v7707_v33 = vld [vmem:[%s11978_s25 + $0xe8] sm:$0xff] }
0x34ab   :  { %7530 = vmatpush1.msra.mxu1 %v7504_v34  ;;  %7257 = vmatprep.subr.mxu0 %v7225_v7  ;;  %v7691_v34 = vld [vmem:[%s11978_s25 + $0x68] sm:$0xff]  ;;  %v7706_v7 = vld [vmem:[%s11978_s25 + $0xe0] sm:$0xff] }
0x34ac   :  { %7531 = vmatprep.subr.mxu1 %v7503_v21  ;;  %7258 = vmatpush1.msra.mxu0 %v7224_v22  ;;  %v7690_v21 = vld [vmem:[%s11978_s25 + $0x60] sm:$0xff]  ;;  %v7705_v22 = vld [vmem:[%s11978_s25 + $0xd8] sm:$0xff] }
0x34ad   :  { %7532 = vmatpush1.msra.mxu1 %v7502_v35  ;;  %7259 = vmatprep.subr.mxu0 %v7223_v36  ;;  %v7689_v35 = vld [vmem:[%s11978_s25 + $0x58] sm:$0xff]  ;;  %v7704_v36 = vld [vmem:[%s11978_s25 + $0xd0] sm:$0xff] }
0x34ae   :  { %7533 = vmatprep.subr.mxu1 %v7501_v27  ;;  %7260 = vmatpush1.msra.mxu0 %v7222_v28  ;;  %v7688_v27 = vld [vmem:[%s11978_s25 + $0x50] sm:$0xff]  ;;  %v7703_v28 = vld [vmem:[%s11978_s25 + $0xc8] sm:$0xff] }
0x34af   :  { %7534 = vmatpush1.msra.mxu1 %v7500_v62  ;;  %7261 = vmatprep.subr.mxu0 %v7221_v60  ;;  %v7687_v62 = vld [vmem:[%s11978_s25 + $0x48] sm:$0xff]  ;;  %v7702_v60 = vld [vmem:[%s11978_s25 + $0xc0] sm:$0xff] }
0x34b0   :  { %7535 = vmatprep.subr.mxu1 %v7499_v57  ;;  %7262 = vmatpush1.msra.mxu0 %v7220_v9  ;;  %v7686_v57 = vld [vmem:[%s11978_s25 + $0x40] sm:$0xff]  ;;  %v7701_v9 = vld [vmem:[%s11978_s25 + $0xb8] sm:$0xff] }
0x34b1   :  { %7536 = vmatpush1.msra.mxu1 %v7498_v24  ;;  %7263 = vmatprep.subr.mxu0 %v7219_v10  ;;  %v7685_v24 = vld [vmem:[%s11978_s25 + $0x38] sm:$0xff]  ;;  %v7700_v10 = vld [vmem:[%s11978_s25 + $0xb0] sm:$0xff] }
0x34b2   :  { %7537 = vmatprep.subr.mxu1 %v7497_v12  ;;  %7264 = vmatpush1.msra.mxu0 %v7218_v11  ;;  %v7684_v12 = vld [vmem:[%s11978_s25 + $0x30] sm:$0xff]  ;;  %v7699_v11 = vld [vmem:[%s11978_s25 + $0xa8] sm:$0xff] }
0x34b3   :  { %7538 = vmatpush1.msra.mxu1 %v7496_v44  ;;  %7265 = vmatprep.subr.mxu0 %v7217_v25  ;;  %v7683_v44 = vld [vmem:[%s11978_s25 + $0x28] sm:$0xff]  ;;  %v7698_v25 = vld [vmem:[%s11978_s25 + $0xa0] sm:$0xff] }
0x34b4   :  { %7539 = vmatprep.subr.mxu1 %v7495_v52  ;;  %7266 = vmatpush1.msra.mxu0 %v7216_v43  ;;  %v7682_v52 = vld [vmem:[%s11978_s25 + $0x20] sm:$0xff]  ;;  %v7697_v43 = vld [vmem:[%s11978_s25 + $0x98] sm:$0xff] }
0x34b5   :  { %7299 = vmatprep.mubr.f32.mxu0 %v9536_v0  ;;  %7540 = vmatpush1.msra.mxu1 %v7494_v59  ;;  %v7681_v59 = vld [vmem:[%s11978_s25 + $0x18] sm:$0xff] }
0x34b6   :  { %7977 = vmatmul.mubr.msk.f32.vlgmr.msra.gmra.mxu0 %vm6219_vm9, %v7232_v46  ;;  %7435 = vmatprep.subr.mxu0 %v7415_v45  ;;  %v7696_v45 = vld [vmem:[%s11978_s25 + $0x90] sm:$0xff] }
0x34b7   :  { %7541 = vmatprep.subr.mxu1 %v7493_v13  ;;  %7436 = vmatpush1.msra.mxu0 %v7414_v37  ;;  %v7680_v46 = vld [vmem:[%s11978_s25 + $0x10] sm:$0xff]  ;;  %v7695_v13 = vld [vmem:[%s11978_s25 + $0x88] sm:$0xff] }
0x34b8   :  { %7542 = vmatpush1.msra.mxu1 %v7492_v38  ;;  %7575 = vmatprep.mubr.f32.mxu1 %v9536_v0  ;;  %v7679_v37 = vld [vmem:[%s11978_s25 + $0x8] sm:$0xff]  ;;  %v7694_v38 = vld [vmem:[%s11978_s25 + $0x80] sm:$0xff] }
0x34b9   :  { %7437 = vmatprep.subr.mxu0 %v7413_v15  ;;  %7980 = vmatmul.mubr.msk.f32.vlgmr.msra.gmra.mxu1 %vm6219_vm9, %v7508_v40  ;;  %v7678_v15 = vld [vmem:[%s11978_s25] sm:$0xff]  ;;  %v6191_v40 = vlaneseq  ;;  %s9541_s25 = smov [#allocation17]  }
0x34ba   :  { %7438 = vmatpush1.msra.mxu0 %v7412_v39  ;;  %7483 = vmatprep.mubr.f32.mxu0 %v9536_v0 }
0x34bb   :  { %7439 = vmatprep.subr.mxu0 %v7411_v26  ;;  %8310 = vmatprep.subr.mxu1 %v7709_v31  ;;  %v6192_v39 = vshrl.u32 %v6191_v40, 7 }
0x34bc   :  { %7440 = vmatpush1.msra.mxu0 %v7410_v42  ;;  %8311 = vmatpush3.msra.mxu1 %v7693_v53 }
0x34bd   :  { %7441 = vmatprep.subr.mxu0 %v7409_v8  ;;  %8312 = vmatprep.subr.mxu1 %v7708_v32  ;;  %v6193_v42 = vsub.s32 0, %v6192_v39  ;;  %v6189_v8 = vld [vmem:[#allocation14] sm:$0x3] }
0x34be   :  { %7442 = vmatpush1.msra.mxu0 %v7408_v16  ;;  %8313 = vmatpush3.msra.mxu1 %v7692_v18  ;;  %v6197_v16 = vsub.s32 1, %v6192_v39 }
0x34bf   :  { %7443 = vmatprep.subr.mxu0 %v7407_v20  ;;  %8314 = vmatprep.subr.mxu1 %v7707_v33 }
0x34c0   :  { %7444 = vmatpush1.msra.mxu0 %v7406_v58  ;;  %8315 = vmatpush3.msra.mxu1 %v7691_v34  ;;  %v6194_v58 = vrot.slane %v6189_v8, %v6193_v42 }
0x34c1   :  { %7445 = vmatprep.subr.mxu0 %v7405_v61  ;;  %8316 = vmatprep.subr.mxu1 %v7706_v7 }
0x34c2   :  { %7446 = vmatpush1.msra.mxu0 %v7404_v63  ;;  %8317 = vmatpush3.msra.mxu1 %v7690_v21  ;;  %v6198_v63 = vrot.slane %v6189_v8, %v6197_v16 }
0x34c3   :  { %7447 = vmatprep.subr.mxu0 %v7403_v41  ;;  %8318 = vmatprep.subr.mxu1 %v7705_v22 }
0x34c4   :  { %7448 = vmatpush1.msra.mxu0 %v7402_v5  ;;  %8319 = vmatpush3.msra.mxu1 %v7689_v35 }
0x34c5   :  { %7449 = vmatprep.subr.mxu0 %v7401_v3  ;;  %8320 = vmatprep.subr.mxu1 %v7704_v36 }
0x34c6   :  { %7450 = vmatpush1.msra.mxu0 %v7400_v1  ;;  %8321 = vmatpush3.msra.mxu1 %v7688_v27 }
0x34c7   :  { %7979 = vmatmul.mubr.msk.f32.vlgmr.msra.gmra.mxu0 %vm6219_vm9, %v7416_v14  ;;  %7619 = vmatprep.subr.mxu0 %v7599_v47 }
0x34c8   :  { %7620 = vmatpush1.msra.mxu0 %v7598_v50  ;;  %7667 = vmatprep.mubr.f32.mxu0 %v9536_v0  ;;  %v7591_v0 = vld [vmem:[%s11976_s23 + $0x7b8] sm:$0xff]  ;;  %s7806_s23 = sshll.u32 %s9541_s25, 4  ;;  %s7807_s23 = int_to_ptr.vmem [resolvable:$true] %s7806_s23 }
0x34c9   :  { %7621 = vmatprep.subr.mxu0 %v7597_v23  ;;  %8322 = vmatprep.subr.mxu1 %v7703_v28  ;;  %s9494_s16 = scalar_lea.vmem %s7807_s23, 32  ;;  %p9499_p13 = scmp.lt.s32.totalorder %s7807_s23, %s7807_s23 }
0x34ca   :  { %7622 = vmatpush1.msra.mxu0 %v7596_v2  ;;  %8323 = vmatpush3.msra.mxu1 %v7687_v62  ;;  %p9495_p12 = scmp.ne.s32.totalorder %s7807_s23, %s9494_s16  ;;  %p9500_p0 = scmp.lt.s32.totalorder %s9494_s16, %s9494_s16 }
0x34cb   :  { %7623 = vmatprep.subr.mxu0 %v7595_v4  ;;  %8324 = vmatprep.subr.mxu1 %v7702_v60 }
0x34cc   :  { %7624 = vmatpush1.msra.mxu0 %v7594_v51  ;;  %8325 = vmatpush3.msra.mxu1 %v7686_v57  ;;  %p9501_p1 = por %p9500_p0, %p9499_p13 }
0x34cd   :  { %7625 = vmatprep.subr.mxu0 %v7593_v54  ;;  %8326 = vmatprep.subr.mxu1 %v7701_v9 }
0x34ce   :  { %7626 = vmatpush1.msra.mxu0 %v7592_v49  ;;  %8327 = vmatpush3.msra.mxu1 %v7685_v24  ;;  %p9502_p2 = pnand %p9501_p1, %p9495_p12 }
0x34cf   :  { %7627 = vmatprep.subr.mxu0 %v7591_v0  ;;  %8328 = vmatprep.subr.mxu1 %v7700_v10 }
0x34d0   :  { %7628 = vmatpush1.msra.mxu0 %v7590_v29  ;;  %8329 = vmatpush3.msra.mxu1 %v7684_v12 }
0x34d1   :  { %7629 = vmatprep.subr.mxu0 %v7589_v55  ;;  %8330 = vmatprep.subr.mxu1 %v7699_v11 }
0x34d2   :  { %7630 = vmatpush1.msra.mxu0 %v7588_v56  ;;  %8331 = vmatpush3.msra.mxu1 %v7683_v44 }
0x34d3   :  { %7631 = vmatprep.subr.mxu0 %v7587_v48  ;;  %8332 = vmatprep.subr.mxu1 %v7698_v25 }
0x34d4   :  { %7632 = vmatpush1.msra.mxu0 %v7586_v6  ;;  %8333 = vmatpush3.msra.mxu1 %v7682_v52 }
0x34d5   :  { %7633 = vmatprep.subr.mxu0 %v7585_v17  ;;  %8334 = vmatprep.subr.mxu1 %v7697_v43 }
0x34d6   :  { %7634 = vmatpush1.msra.mxu0 %v7584_v19  ;;  %8335 = vmatpush3.msra.mxu1 %v7681_v59 }
0x34d7   :  { %7981 = vmatmul.mubr.msk.f32.vlgmr.msra.gmra.mxu0 %vm6219_vm9, %v7600_v30  ;;  %8336 = vmatprep.subr.mxu1 %v7696_v45 }
0x34d8   :  { %8337 = vmatpush3.msra.mxu1 %v7680_v46 }
0x34d9   :  { %8338 = vmatprep.subr.mxu1 %v7695_v13 }
0x34da   :  { %8339 = vmatpush3.msra.mxu1 %v7679_v37 }
0x34db   :  { %8340 = vmatprep.subr.mxu1 %v7694_v38 }
0x34dc   :  { %8341 = vmatpush3.msra.mxu1 %v7678_v15 }
0x350c   :  { %v6289_v26 = vpop.f32.mrf.mxu0 }
0x350d   :  { %v6294_v41 = vadd.f32 %v6289_v26, %v6194_v58 }
0x350e   :  { %v6291_v20 = vpop.f32.mrf.mxu0  ;;  %v6473_v1 = vpop.f32.mrf.mxu1 }
0x350f   :  { %v6295_v3 = vadd.f32 %v6291_v20, %v6198_v63 }
0x3510   :  { %v6475_v23 = vpop.f32.mrf.mxu1 }
0x351c   :  { %v6381_v61 = vpop.f32.mrf.mxu0 }
0x351d   :  { %v6386_v47 = vadd.f32 %v6381_v61, %v6294_v41  ;;  %v7982_v41 = vld [vmem:[#allocation15] ss:$0 sm:$0xff] }
0x351e   :  { %v6383_v5 = vpop.f32.mrf.mxu0 }
0x351f   :  { %v6387_v50 = vadd.f32 %v6383_v5, %v6295_v3  ;;  %v6478_v2 = vadd.f32 %v6473_v1, %v6386_v47  ;;  %v6657_v54 = vpop.f32.mrf.mxu1 }
0x3521   :  { %v6479_v51 = vadd.f32 %v6475_v23, %v6387_v50  ;;  %v6659_v55 = vpop.f32.mrf.mxu1 }
0x352e   :  { %v6565_v14 = vpop.f32.mrf.mxu0 }
0x352f   :  { %v6570_v49 = vadd.f32 %v6565_v14, %v6478_v2 }
0x3530   :  { %v6567_v4 = vpop.f32.mrf.mxu0 }
0x3531   :  { %v6571_v29 = vadd.f32 %v6567_v4, %v6479_v51  ;;  %v6662_v56 = vadd.f32 %v6657_v54, %v6570_v49  ;;  %v6841_v17 = vpop.f32.mrf.mxu1 }
0x3533   :  { %v6663_v6 = vadd.f32 %v6659_v55, %v6571_v29  ;;  %v6843_v53 = vpop.f32.mrf.mxu1 }
0x3540   :  { %v6749_v0 = vpop.f32.mrf.mxu0 }
0x3541   :  { %v6754_v19 = vadd.f32 %v6749_v0, %v6662_v56 }
0x3542   :  { %v6751_v48 = vpop.f32.mrf.mxu0 }
0x3543   :  { %v6755_v31 = vadd.f32 %v6751_v48, %v6663_v6  ;;  %v6846_v32 = vadd.f32 %v6841_v17, %v6754_v19  ;;  %v7025_v34 = vpop.f32.mrf.mxu1 }
0x3545   :  { %v6847_v33 = vadd.f32 %v6843_v53, %v6755_v31  ;;  %v7027_v35 = vpop.f32.mrf.mxu1 }
0x3552   :  { %v6933_v30 = vpop.f32.mrf.mxu0 }
0x3553   :  { %v6938_v7 = vadd.f32 %v6933_v30, %v6846_v32 }
0x3554   :  { %v6935_v18 = vpop.f32.mrf.mxu0 }
0x3555   :  { %v6939_v22 = vadd.f32 %v6935_v18, %v6847_v33  ;;  %v7030_v36 = vadd.f32 %v7025_v34, %v6938_v7  ;;  %v7209_v62 = vpop.f32.mrf.mxu1 }
0x3557   :  { %v7031_v28 = vadd.f32 %v7027_v35, %v6939_v22  ;;  %v7211_v24 = vpop.f32.mrf.mxu1 }
0x3564   :  { %v7117_v21 = vpop.f32.mrf.mxu0 }
0x3565   :  { %v7122_v60 = vadd.f32 %v7117_v21, %v7030_v36 }
0x3566   :  { %v7119_v27 = vpop.f32.mrf.mxu0 }
0x3567   :  { %v7123_v9 = vadd.f32 %v7119_v27, %v7031_v28  ;;  %v7214_v10 = vadd.f32 %v7209_v62, %v7122_v60  ;;  %v7393_v44 = vpop.f32.mrf.mxu1 }
0x3569   :  { %v7215_v11 = vadd.f32 %v7211_v24, %v7123_v9  ;;  %v7395_v59 = vpop.f32.mrf.mxu1 }
0x3576   :  { %v7301_v57 = vpop.f32.mrf.mxu0 }
0x3577   :  { %v7306_v25 = vadd.f32 %v7301_v57, %v7214_v10 }
0x3578   :  { %v7303_v12 = vpop.f32.mrf.mxu0 }
0x3579   :  { %v7307_v43 = vadd.f32 %v7303_v12, %v7215_v11  ;;  %v7398_v45 = vadd.f32 %v7393_v44, %v7306_v25  ;;  %v7577_v37 = vpop.f32.mrf.mxu1 }
0x357b   :  { %v7399_v13 = vadd.f32 %v7395_v59, %v7307_v43  ;;  %v7579_v40 = vpop.f32.mrf.mxu1 }
0x3587   :  { %v7485_v52 = vpop.f32.mrf.mxu0 }
0x3588   :  { %v7490_v38 = vadd.f32 %v7485_v52, %v7398_v45 }
0x3589   :  { %v7487_v46 = vpop.f32.mrf.mxu0 }
0x358a   :  { %v7491_v15 = vadd.f32 %v7487_v46, %v7399_v13  ;;  %v7582_v39 = vadd.f32 %v7577_v37, %v7490_v38 }
0x358c   :  { %v7583_v42 = vadd.f32 %v7579_v40, %v7491_v15 }
0x3597   :  { %v7669_v26 = vpop.f32.mrf.mxu0 }
0x3598   :  { %v7674_v8 = vadd.f32 %v7669_v26, %v7582_v39 }
0x3599   :  { %v7671_v16 = vpop.f32.mrf.mxu0 }
0x359a   :  { %v7675_v20 = vadd.f32 %v7671_v16, %v7583_v42  ;;  %v7676_v61 = vmax.f32 %v7674_v8, 0.0 }
0x359c   :  { %v7677_v58 = vmax.f32 %v7675_v20, 0.0 }
0x359e   :  { %7781 = vmatprep.mubr.f32.mxu1 %v7677_v58 }
0x359f   :  { %7782 = vmatmul.mubr.f32.vlgmr.msra.gmra.mxu1 %v7676_v61 }
0x365f   :  { %v8342_v63 = vpop.f32.mrf.mxu1 }
0x3661   :  { %v8343_v5 = vpop.f32.mrf.mxu1 }
0x3662   :  { %v8344_v3 = vadd.f32 %v8343_v5, %v8342_v63 }
0x3664   :  { %v7784_v1 = vadd.f32 %v8344_v3, %v7982_v41 }
0x3666   :  { %v7788_v47 = vsel %vm7787_vm10, %v7784_v1, -inf }
0x3667   :  { %7789 = vmax.xlane.f32.xlu0 %v7788_v47 }
0x36f0   :  { %v7790_v14 = vpop.xlane.xlu0 %7789 }
0x36f1   :  { %v7791_v50 = vsub.f32 %v7784_v1, %v7790_v14 }
0x36f3   :  { %v7792_v23 = vmul.f32 1.442695, %v7791_v50 }
0x36f5   :  { %9303 = vpow2.f32 %v7792_v23 }
0x3702   :  { %v9304_v2 = vpop.eup %9303 }
0x3703   :  { %v7794_v4 = vsel %vm7787_vm10, %v9304_v2, 0.0 }
0x3704   :  { %7795 = vadd.xlane.f32.xlu1 %v7794_v4 }
0x378d   :  { %v7796_v51 = vpop.xlane.xlu1 %7795 }
0x378e   :  { %9305 = vrcp.f32 %v7796_v51 }
0x379b   :  { %v9306_v54 = vpop.eup %9305 }
0x379c   :  { %v7798_v49 = vmul.f32 %v9306_v54, %v9304_v2 }
0x379e   :  { %7799 = vst.msk [vmem:[#allocation17] sm:$0x3] %vm7787_vm10, %v7798_v49 }
0x379f   :  { %9505 = shalt.err (!%p9502_p2)
}
0x37a0   :  { %7809 = dma.vmem_to_hbm [thread:$0]  %s7807_s23, 32, %s11980_s27, [#allocation5]  }
0x37a1   :  { %9524 = dma.done.wait [#allocation5], 32  }
0x37a2   :  { %9525 = vsyncadd [#allocation5], 4294967264 }
0x37a3   :  { %7813 = vsyncpa [#allocation4], 1 }
0x37a4   :  { %7814 = vsyncpa [#allocation7], 1 }
0x37a5   :  { %7815 = vsyncpa [#allocation10], 1 }
0x37a6   :  { %7816 = vsyncpa [#allocation13], 1 }
0x37a7   :  { %7817 = vsyncpa [#allocation16], 1 }
0x37a8   :  { %7818 = vsyncpa [#allocation5], 1 }

</bundles_post_ra>
